<compile_context>
chip_gen: v7x
topology: tpu7x:2x2x1
jax: 0.10.0
libtpu: 0.0.40
codegen_flags: <defaults>
</compile_context>

<pallas_src>
import numpy as np
import jax
import jax.numpy as jnp
from jax.experimental import pallas as pl
from jax.experimental.pallas import tpu as pltpu

EPS = 1e-5  # torch.nn.BatchNorm2d default


def _full_spec(shape):
    nd = len(shape)
    return pl.BlockSpec(shape, lambda i, _nd=nd: (0,) * _nd)


def make_kernel(N, H, W, CP):
    """Fused kernel. Activations are (CP, M) f32, M = N*Hr*Wr flattened row-major over
    (n, i, j) on the lane axis; channels (zero-padded to CP) sit on sublanes."""
    assert H % 2 == 0 and W % 2 == 0
    Hh, Wh = H // 2, W // 2
    Mf, Mh = N * H * W, N * Hh * Wh

    def _iota_ij(Hr, Wr, M):
        lane = jax.lax.broadcasted_iota(jnp.int32, (1, M), 1)
        if Wr & (Wr - 1) == 0:
            j = jnp.bitwise_and(lane, Wr - 1)
            row = jnp.right_shift(lane, int(Wr).bit_length() - 1)
        else:  # not exercised at these shapes
            j = lane % Wr
            row = lane // Wr
        i = jnp.bitwise_and(row, Hr - 1) if Hr & (Hr - 1) == 0 else row % Hr
        return i, j

    def make_masks(Hr, Wr, M):
        # 0/1 f32 lane masks (1, M); applied multiplicatively (broadcast over sublanes).
        i, j = _iota_ij(Hr, Wr, M)
        f = lambda c: c.astype(jnp.float32)
        return {"t": f(i > 0), "b": f(i < Hr - 1), "l": f(j > 0), "r": f(j < Wr - 1)}

    def tap_mask(masks, di, dj):
        m = None
        if di == 0:
            m = masks["t"]
        elif di == 2:
            m = masks["b"]
        if dj == 0:
            m = masks["l"] if m is None else m * masks["l"]
        elif dj == 2:
            m = masks["r"] if m is None else m * masks["r"]
        return m

    def shifted(x, off, M):
        # tap[m] = x[m + off] (circular; wrapped lanes are zeroed by the caller's mask).
        if off == 0:
            return x
        return pltpu.roll(x, shift=(-off) % M, axis=1)

    def kernel(xph_ref, up_ref, w_ref, gb_ref, o_ref, col_ref):
        masks_h = make_masks(Hh, Wh, Mh)
        masks_f = make_masks(H, W, Mf)

        def conv3x3(x, w_idx, masks, Wr, M):
            """3x3 / stride 1 / pad 1 / no bias as ONE im2col GEMM (bf16 MXU, f32 acc)."""
            for k in range(9):
                di, dj = k // 3, k % 3
                t = shifted(x, (di - 1) * Wr + (dj - 1), M)
                m = tap_mask(masks, di, dj)
                if m is not None:
                    t = t * m
                col_ref[k * CP:(k + 1) * CP, :M] = t
            return jnp.dot(w_ref[w_idx], col_ref[:, :M].astype(jnp.bfloat16),
                           preferred_element_type=jnp.float32)               # (CP, M)

        def batchnorm(y, gb_idx, M):
            """Train-mode BatchNorm over the M lanes, two-pass centered variance."""
            g = gb_ref[gb_idx, 0]                       # (CP, 1); 0 on padded channels
            b = gb_ref[gb_idx, 1]
            mean = jnp.sum(y, axis=1, keepdims=True) * (1.0 / M)
            d = y - mean
            var = jnp.sum(d * d, axis=1, keepdims=True) * (1.0 / M)
            return d * jax.lax.rsqrt(var + EPS) * g + b

        def res_block(x, w_idx, gb_idx, masks, Wr, M):
            t = jnp.maximum(batchnorm(conv3x3(x, w_idx, masks, Wr, M), gb_idx, M), 0.0)
            u = batchnorm(conv3x3(t, w_idx + 1, masks, Wr, M), gb_idx + 1, M)
            return jnp.maximum(u + x, 0.0)

        # ---- down-conv (3x3, stride 2, pad 1) + ReLU -----------------------------------
        # Input row 2*i2 + di - 1 = 2*(i2 + dI) + p, so every stride-2 tap is a rolled /
        # masked half-res phase of x (phases pre-split in the wrapper) -> same im2col GEMM.
        for k in range(9):
            di, dj = k // 3, k % 3
            p, dI = ((1, -1), (0, 0), (1, 0))[di]
            q, dJ = ((1, -1), (0, 0), (1, 0))[dj]
            ph = xph_ref[(p * 2 + q) * CP:(p * 2 + q + 1) * CP, :]            # (CP, Mh)
            t = shifted(ph, dI * Wh + dJ, Mh)
            m = None
            if dI == -1:
                m = masks_h["t"]
            if dJ == -1:
                m = masks_h["l"] if m is None else m * masks_h["l"]
            if m is not None:
                t = t * m
            col_ref[k * CP:(k + 1) * CP, :Mh] = t
        h = jnp.maximum(jnp.dot(w_ref[0], col_ref[:, :Mh].astype(jnp.bfloat16),
                                preferred_element_type=jnp.float32), 0.0)     # (CP, Mh)

        # ---- two residual blocks at half resolution -------------------------------------
        h = res_block(h, 1, 0, masks_h, Wh, Mh)
        h = res_block(h, 3, 2, masks_h, Wh, Mh)

        # ---- nearest 2x upsample: one bf16 MXU dot with the precomputed 0/1 map ---------
        u = jnp.dot(h.astype(jnp.bfloat16), up_ref[...],
                    preferred_element_type=jnp.float32)                       # (CP, Mf)

        # ---- up-conv (3x3, stride 1) + BN + ReLU ----------------------------------------
        v = jnp.maximum(batchnorm(conv3x3(u, 5, masks_f, W, Mf), 4, Mf), 0.0)

        # ---- two residual blocks at full resolution -------------------------------------
        v = res_block(v, 6, 5, masks_f, W, Mf)
        v = res_block(v, 8, 7, masks_f, W, Mf)

        # ---- lane-dense output writeback: (N*CP, H*W) -> unmasked 256-lane stores -------
        for n in range(N):
            o_ref[n * CP:(n + 1) * CP, :] = v[:, n * (H * W):(n + 1) * (H * W)]

    return kernel


# ---------------- wrapper ----------------

def res_unet_innermost_forward(x_nchw, params):
    N, Cin, H, W = x_nchw.shape
    Cmid = params["down_w"].shape[0]
    Cout = params["up_w"].shape[0]
    Hh, Wh = H // 2, W // 2
    Mf, Mh = N * H * W, N * Hh * Wh
    CP = max(8, ((max(Cin, Cmid, Cout) + 7) // 8) * 8)       # channel pad -> full sublanes

    x = x_nchw.astype(jnp.float32)

    # Stride-2 sampling done here (cheap XLA slicing): 4 half-res spatial phases,
    # channels zero-padded to CP, flattened to the (CP, Mh) lane-dense layout.
    phases = []
    for p in (0, 1):
        for q in (0, 1):
            xp = jnp.transpose(x[:, :, p::2, q::2], (1, 0, 2, 3)).reshape(Cin, Mh)
            phases.append(jnp.pad(xp, ((0, CP - Cin), (0, 0))))
    xph = jnp.concatenate(phases, axis=0)                                   # (4*CP, Mh)

    # Nearest-neighbour 2x upsample as a precomputed 0/1 selection matrix (bf16).
    up = np.zeros((Mh, Mf), np.float32)
    m = np.arange(Mf)
    n_i, rem = m // (H * W), m % (H * W)
    ii, jj = rem // W, rem % W
    up[n_i * (Hh * Wh) + (ii // 2) * Wh + (jj // 2), m] = 1.0
    up = jnp.asarray(up, jnp.bfloat16)

    def pack_w(w):   # (cout, cin, 3, 3) -> (CP, 9*CP); column = k*CP + ci, k = kh*3 + kw
        co, ci = w.shape[0], w.shape[1]
        w9 = jnp.transpose(w.reshape(co, ci, 9), (0, 2, 1))                 # (co, k, ci)
        w9 = jnp.pad(w9, ((0, CP - co), (0, 0), (0, CP - ci)))
        return w9.reshape(CP, 9 * CP)

    def pack_gb(g, b):   # gamma/beta padded with ZEROS so padded channels stay exactly 0
        c = g.shape[0]
        return jnp.stack([jnp.pad(g, (0, CP - c)), jnp.pad(b, (0, CP - c))], 0)

    w_list, gb_list = [pack_w(params["down_w"])], []
    for blk in ("res_down1", "res_down2"):
        pb = params[blk]
        w_list += [pack_w(pb["w1"]), pack_w(pb["w2"])]
        gb_list += [pack_gb(pb["g1"], pb["b1"]), pack_gb(pb["g2"], pb["b2"])]
    w_list.append(pack_w(params["up_w"]))
    gb_list.append(pack_gb(params["up_g"], params["up_b"]))
    for blk in ("res_up1", "res_up2"):
        pb = params[blk]
        w_list += [pack_w(pb["w1"]), pack_w(pb["w2"])]
        gb_list += [pack_gb(pb["g1"], pb["b1"]), pack_gb(pb["g2"], pb["b2"])]

    w_all = jnp.stack(w_list, 0).astype(jnp.bfloat16)                        # (10, CP, 9*CP)
    gb_all = jnp.stack(gb_list, 0)[..., None].astype(jnp.float32)            # (9, 2, CP, 1)

    inputs = (xph, up, w_all, gb_all)
    out = pl.pallas_call(
        make_kernel(N, H, W, CP),
        out_shape=jax.ShapeDtypeStruct((N * CP, H * W), jnp.float32),
        grid=(1,),
        in_specs=[_full_spec(a.shape) for a in inputs],
        out_specs=_full_spec((N * CP, H * W)),
        scratch_shapes=[pltpu.VMEM((9 * CP, Mf), jnp.float32)],              # shared im2col buffer
        compiler_params=pltpu.CompilerParams(dimension_semantics=("arbitrary",)),
    )(*inputs)

    y = out.reshape(N, CP, H, W)[:, :Cout]
    # skip connection of the non-outermost block: torch.cat([x, model(x)], 1)
    return jnp.concatenate([x_nchw, y], axis=1)


# ---------------- deterministic parameter init (shapes from __init__) ----------------

def _init_conv(key, cin, cout):
    # Conv2d(cin, cout, 3, ...).weight in PyTorch layout (cout, cin, 3, 3)
    scale = 1.0 / jnp.sqrt(jnp.float32(cin * 9))
    return jax.random.normal(key, (cout, cin, 3, 3), jnp.float32) * scale


def _init_res_block(key, c):
    k1, k2 = jax.random.split(key)
    return {"w1": _init_conv(k1, c, c), "g1": jnp.ones((c,), jnp.float32),
            "b1": jnp.zeros((c,), jnp.float32),
            "w2": _init_conv(k2, c, c), "g2": jnp.ones((c,), jnp.float32),
            "b2": jnp.zeros((c,), jnp.float32)}


def init_params(key, input_nc, inner_nc, outer_nc):
    keys = jax.random.split(key, 6)
    return {
        "down_w": _init_conv(keys[0], input_nc, inner_nc),
        "res_down1": _init_res_block(keys[1], inner_nc),
        "res_down2": _init_res_block(keys[2], inner_nc),
        "up_w": _init_conv(keys[3], inner_nc, outer_nc),
        "up_g": jnp.ones((outer_nc,), jnp.float32),
        "up_b": jnp.zeros((outer_nc,), jnp.float32),
        "res_up1": _init_res_block(keys[4], outer_nc),
        "res_up2": _init_res_block(keys[5], outer_nc),
    }


if __name__ == "__main__":
    key = jax.random.PRNGKey(0)
    kx, kp = jax.random.split(key)

    # innermost block: input_nc defaults to outer_nc
    N, H, W = 2, 16, 16
    outer_nc = input_nc = 4
    inner_nc = 8

    x = jax.random.normal(kx, (N, input_nc, H, W), jnp.float32)
    params = init_params(kp, input_nc, inner_nc, outer_nc)

    fwd = jax.jit(res_unet_innermost_forward)
    out = jax.block_until_ready(fwd(x, params))

    assert out.shape == (N, input_nc + outer_nc, H, W), out.shape
    assert bool(jnp.all(jnp.isfinite(out)))
    print("KERNEL_OK")
</pallas_src>

<mosaic_0001>
module attributes {stable_mosaic.version = 11 : i64} {
  func.func @kernel(%arg0: i32, %arg1: memref<32x128xf32, #tpu.memory_space<vmem>>, %arg2: memref<128x512xbf16, #tpu.memory_space<vmem>>, %arg3: memref<10x8x72xbf16, #tpu.memory_space<vmem>>, %arg4: memref<9x2x8x1xf32, #tpu.memory_space<vmem>>, %arg5: memref<16x256xf32, #tpu.memory_space<vmem>>, %arg6: memref<72x512xf32, #tpu.memory_space<vmem>>) attributes {dimension_semantics = [#tpu.dimension_semantics<arbitrary>], iteration_bounds = array<i64: 1>, scalar_prefetch = 0 : i64, scratch_operands = 1 : i64, tpu.core_type = #tpu.core_type<tc>, window_params = [{pipeline_mode = #tpu.pipeline_mode<synchronous>, transform_indices = @transform_0, window_bounds = array<i64: 32, 128>}, {pipeline_mode = #tpu.pipeline_mode<synchronous>, transform_indices = @transform_1, window_bounds = array<i64: 128, 512>}, {pipeline_mode = #tpu.pipeline_mode<synchronous>, transform_indices = @transform_2, window_bounds = array<i64: 10, 8, 72>}, {pipeline_mode = #tpu.pipeline_mode<synchronous>, transform_indices = @transform_3, window_bounds = array<i64: 9, 2, 8, 1>}, {pipeline_mode = #tpu.pipeline_mode<synchronous>, transform_indices = @transform_4, window_bounds = array<i64: 16, 256>}]} {
    %0 = tpu.iota {dimensions = array<i32: 1>} : vector<1x128xi32>
    %c7_i32 = arith.constant 7 : i32
    %1 = vector.broadcast %c7_i32 : i32 to vector<1x128xi32>
    %2 = arith.andi %0, %1 : vector<1x128xi32>
    %c3_i32 = arith.constant 3 : i32
    %3 = vector.broadcast %c3_i32 : i32 to vector<1x128xi32>
    %4 = arith.shrsi %0, %3 : vector<1x128xi32>
    %c7_i32_0 = arith.constant 7 : i32
    %5 = vector.broadcast %c7_i32_0 : i32 to vector<1x128xi32>
    %6 = arith.andi %4, %5 : vector<1x128xi32>
    %c0_i32 = arith.constant 0 : i32
    %7 = vector.broadcast %c0_i32 : i32 to vector<1x128xi32>
    %8 = arith.cmpi sgt, %6, %7 : vector<1x128xi32>
    %9 = arith.extui %8 : vector<1x128xi1> to vector<1x128xi32>
    %10 = arith.sitofp %9 : vector<1x128xi32> to vector<1x128xf32>
    %c7_i32_1 = arith.constant 7 : i32
    %11 = vector.broadcast %c7_i32_1 : i32 to vector<1x128xi32>
    %12 = arith.cmpi slt, %6, %11 : vector<1x128xi32>
    %13 = arith.extui %12 : vector<1x128xi1> to vector<1x128xi32>
    %14 = arith.sitofp %13 : vector<1x128xi32> to vector<1x128xf32>
    %c0_i32_2 = arith.constant 0 : i32
    %15 = vector.broadcast %c0_i32_2 : i32 to vector<1x128xi32>
    %16 = arith.cmpi sgt, %2, %15 : vector<1x128xi32>
    %17 = arith.extui %16 : vector<1x128xi1> to vector<1x128xi32>
    %18 = arith.sitofp %17 : vector<1x128xi32> to vector<1x128xf32>
    %c7_i32_3 = arith.constant 7 : i32
    %19 = vector.broadcast %c7_i32_3 : i32 to vector<1x128xi32>
    %20 = arith.cmpi slt, %2, %19 : vector<1x128xi32>
    %21 = arith.extui %20 : vector<1x128xi1> to vector<1x128xi32>
    %22 = arith.sitofp %21 : vector<1x128xi32> to vector<1x128xf32>
    %23 = tpu.iota {dimensions = array<i32: 1>} : vector<1x512xi32>
    %c15_i32 = arith.constant 15 : i32
    %24 = vector.broadcast %c15_i32 : i32 to vector<1x512xi32>
    %25 = arith.andi %23, %24 : vector<1x512xi32>
    %c4_i32 = arith.constant 4 : i32
    %26 = vector.broadcast %c4_i32 : i32 to vector<1x512xi32>
    %27 = arith.shrsi %23, %26 : vector<1x512xi32>
    %c15_i32_4 = arith.constant 15 : i32
    %28 = vector.broadcast %c15_i32_4 : i32 to vector<1x512xi32>
    %29 = arith.andi %27, %28 : vector<1x512xi32>
    %c0_i32_5 = arith.constant 0 : i32
    %30 = vector.broadcast %c0_i32_5 : i32 to vector<1x512xi32>
    %31 = arith.cmpi sgt, %29, %30 : vector<1x512xi32>
    %32 = arith.extui %31 : vector<1x512xi1> to vector<1x512xi32>
    %33 = arith.sitofp %32 : vector<1x512xi32> to vector<1x512xf32>
    %c15_i32_6 = arith.constant 15 : i32
    %34 = vector.broadcast %c15_i32_6 : i32 to vector<1x512xi32>
    %35 = arith.cmpi slt, %29, %34 : vector<1x512xi32>
    %36 = arith.extui %35 : vector<1x512xi1> to vector<1x512xi32>
    %37 = arith.sitofp %36 : vector<1x512xi32> to vector<1x512xf32>
    %c0_i32_7 = arith.constant 0 : i32
    %38 = vector.broadcast %c0_i32_7 : i32 to vector<1x512xi32>
    %39 = arith.cmpi sgt, %25, %38 : vector<1x512xi32>
    %40 = arith.extui %39 : vector<1x512xi1> to vector<1x512xi32>
    %41 = arith.sitofp %40 : vector<1x512xi32> to vector<1x512xf32>
    %c15_i32_8 = arith.constant 15 : i32
    %42 = vector.broadcast %c15_i32_8 : i32 to vector<1x512xi32>
    %43 = arith.cmpi slt, %25, %42 : vector<1x512xi32>
    %44 = arith.extui %43 : vector<1x512xi1> to vector<1x512xi32>
    %45 = arith.sitofp %44 : vector<1x512xi32> to vector<1x512xf32>
    %c24 = arith.constant 24 : index
    %c0 = arith.constant 0 : index
    %46 = vector.load %arg1[%c24, %c0] : memref<32x128xf32, #tpu.memory_space<vmem>>, vector<8x128xf32>
    %c9_i32 = arith.constant 9 : i32
    %47 = tpu.dynamic_rotate %46 by %c9_i32 dim 1 : vector<8x128xf32>, i32 -> vector<8x128xf32>
    %48 = arith.mulf %10, %18 : vector<1x128xf32>
    %49 = vector.broadcast %48 : vector<1x128xf32> to vector<8x128xf32>
    %50 = arith.mulf %47, %49 : vector<8x128xf32>
    %c0_9 = arith.constant 0 : index
    %c0_10 = arith.constant 0 : index
    %51 = vector.load %arg6[%c0_9, %c0_10] : memref<72x512xf32, #tpu.memory_space<vmem>>, vector<8x128xf32>
    tpu.vector_store %arg6[%c0_9, %c0_10], %50 {strides = array<i32>} : memref<72x512xf32, #tpu.memory_space<vmem>>, vector<8x128xf32>,
    %c16 = arith.constant 16 : index
    %c0_11 = arith.constant 0 : index
    %52 = vector.load %arg1[%c16, %c0_11] : memref<32x128xf32, #tpu.memory_space<vmem>>, vector<8x128xf32>
    %c8_i32 = arith.constant 8 : i32
    %53 = tpu.dynamic_rotate %52 by %c8_i32 dim 1 : vector<8x128xf32>, i32 -> vector<8x128xf32>
    %54 = vector.broadcast %10 : vector<1x128xf32> to vector<8x128xf32>
    %55 = arith.mulf %53, %54 : vector<8x128xf32>
    %c8 = arith.constant 8 : index
    %c0_12 = arith.constant 0 : index
    %56 = vector.load %arg6[%c8, %c0_12] : memref<72x512xf32, #tpu.memory_space<vmem>>, vector<8x128xf32>
    tpu.vector_store %arg6[%c8, %c0_12], %55 {strides = array<i32>} : memref<72x512xf32, #tpu.memory_space<vmem>>, vector<8x128xf32>,
    %c24_13 = arith.constant 24 : index
    %c0_14 = arith.constant 0 : index
    %57 = vector.load %arg1[%c24_13, %c0_14] : memref<32x128xf32, #tpu.memory_space<vmem>>, vector<8x128xf32>
    %c8_i32_15 = arith.constant 8 : i32
    %58 = tpu.dynamic_rotate %57 by %c8_i32_15 dim 1 : vector<8x128xf32>, i32 -> vector<8x128xf32>
    %59 = vector.broadcast %10 : vector<1x128xf32> to vector<8x128xf32>
    %60 = arith.mulf %58, %59 : vector<8x128xf32>
    %c16_16 = arith.constant 16 : index
    %c0_17 = arith.constant 0 : index
    %61 = vector.load %arg6[%c16_16, %c0_17] : memref<72x512xf32, #tpu.memory_space<vmem>>, vector<8x128xf32>
    tpu.vector_store %arg6[%c16_16, %c0_17], %60 {strides = array<i32>} : memref<72x512xf32, #tpu.memory_space<vmem>>, vector<8x128xf32>,
    %c8_18 = arith.constant 8 : index
    %c0_19 = arith.constant 0 : index
    %62 = vector.load %arg1[%c8_18, %c0_19] : memref<32x128xf32, #tpu.memory_space<vmem>>, vector<8x128xf32>
    %c1_i32 = arith.constant 1 : i32
    %63 = tpu.dynamic_rotate %62 by %c1_i32 dim 1 : vector<8x128xf32>, i32 -> vector<8x128xf32>
    %64 = vector.broadcast %18 : vector<1x128xf32> to vector<8x128xf32>
    %65 = arith.mulf %63, %64 : vector<8x128xf32>
    %c24_20 = arith.constant 24 : index
    %c0_21 = arith.constant 0 : index
    %66 = vector.load %arg6[%c24_20, %c0_21] : memref<72x512xf32, #tpu.memory_space<vmem>>, vector<8x128xf32>
    tpu.vector_store %arg6[%c24_20, %c0_21], %65 {strides = array<i32>} : memref<72x512xf32, #tpu.memory_space<vmem>>, vector<8x128xf32>,
    %c0_22 = arith.constant 0 : index
    %c0_23 = arith.constant 0 : index
    %67 = vector.load %arg1[%c0_22, %c0_23] : memref<32x128xf32, #tpu.memory_space<vmem>>, vector<8x128xf32>
    %c32 = arith.constant 32 : index
    %c0_24 = arith.constant 0 : index
    %68 = vector.load %arg6[%c32, %c0_24] : memref<72x512xf32, #tpu.memory_space<vmem>>, vector<8x128xf32>
    tpu.vector_store %arg6[%c32, %c0_24], %67 {strides = array<i32>} : memref<72x512xf32, #tpu.memory_space<vmem>>, vector<8x128xf32>,
    %c8_25 = arith.constant 8 : index
    %c0_26 = arith.constant 0 : index
    %69 = vector.load %arg1[%c8_25, %c0_26] : memref<32x128xf32, #tpu.memory_space<vmem>>, vector<8x128xf32>
    %c40 = arith.constant 40 : index
    %c0_27 = arith.constant 0 : index
    %70 = vector.load %arg6[%c40, %c0_27] : memref<72x512xf32, #tpu.memory_space<vmem>>, vector<8x128xf32>
    tpu.vector_store %arg6[%c40, %c0_27], %69 {strides = array<i32>} : memref<72x512xf32, #tpu.memory_space<vmem>>, vector<8x128xf32>,
    %c24_28 = arith.constant 24 : index
    %c0_29 = arith.constant 0 : index
    %71 = vector.load %arg1[%c24_28, %c0_29] : memref<32x128xf32, #tpu.memory_space<vmem>>, vector<8x128xf32>
    %c1_i32_30 = arith.constant 1 : i32
    %72 = tpu.dynamic_rotate %71 by %c1_i32_30 dim 1 : vector<8x128xf32>, i32 -> vector<8x128xf32>
    %73 = vector.broadcast %18 : vector<1x128xf32> to vector<8x128xf32>
    %74 = arith.mulf %72, %73 : vector<8x128xf32>
    %c48 = arith.constant 48 : index
    %c0_31 = arith.constant 0 : index
    %75 = vector.load %arg6[%c48, %c0_31] : memref<72x512xf32, #tpu.memory_space<vmem>>, vector<8x128xf32>
    tpu.vector_store %arg6[%c48, %c0_31], %74 {strides = array<i32>} : memref<72x512xf32, #tpu.memory_space<vmem>>, vector<8x128xf32>,
    %c16_32 = arith.constant 16 : index
    %c0_33 = arith.constant 0 : index
    %76 = vector.load %arg1[%c16_32, %c0_33] : memref<32x128xf32, #tpu.memory_space<vmem>>, vector<8x128xf32>
    %c56 = arith.constant 56 : index
    %c0_34 = arith.constant 0 : index
    %77 = vector.load %arg6[%c56, %c0_34] : memref<72x512xf32, #tpu.memory_space<vmem>>, vector<8x128xf32>
    tpu.vector_store %arg6[%c56, %c0_34], %76 {strides = array<i32>} : memref<72x512xf32, #tpu.memory_space<vmem>>, vector<8x128xf32>,
    %c24_35 = arith.constant 24 : index
    %c0_36 = arith.constant 0 : index
    %78 = vector.load %arg1[%c24_35, %c0_36] : memref<32x128xf32, #tpu.memory_space<vmem>>, vector<8x128xf32>
    %c64 = arith.constant 64 : index
    %c0_37 = arith.constant 0 : index
    %79 = vector.load %arg6[%c64, %c0_37] : memref<72x512xf32, #tpu.memory_space<vmem>>, vector<8x128xf32>
    tpu.vector_store %arg6[%c64, %c0_37], %78 {strides = array<i32>} : memref<72x512xf32, #tpu.memory_space<vmem>>, vector<8x128xf32>,
    %c0_38 = arith.constant 0 : index
    %c0_39 = arith.constant 0 : index
    %c0_40 = arith.constant 0 : index
    %80 = vector.load %arg3[%c0_38, %c0_39, %c0_40] : memref<10x8x72xbf16, #tpu.memory_space<vmem>>, vector<1x8x72xbf16>
    %81 = vector.shape_cast %80 : vector<1x8x72xbf16> to vector<8x72xbf16>
    %c0_41 = arith.constant 0 : index
    %c0_42 = arith.constant 0 : index
    %82 = vector.load %arg6[%c0_41, %c0_42] : memref<72x512xf32, #tpu.memory_space<vmem>>, vector<72x128xf32>
    %83 = arith.truncf %82 : vector<72x128xf32> to vector<72x128xbf16>
    %cst = arith.constant dense<0.000000e+00> : vector<8x128xf32>
    %84 = tpu.matmul %81, %83, %cst {dimension_numbers = #tpu.dot_dimension_numbers<[1], [0], [0], [1], [0, 0, 1, 1], [], []>} : vector<8x72xbf16>, vector<72x128xbf16>, vector<8x128xf32> -> vector<8x128xf32>
    %cst_43 = arith.constant 0.000000e+00 : f32
    %85 = vector.broadcast %cst_43 : f32 to vector<8x128xf32>
    %86 = arith.maximumf %84, %85 : vector<8x128xf32>
    %c9_i32_44 = arith.constant 9 : i32
    %87 = tpu.dynamic_rotate %86 by %c9_i32_44 dim 1 : vector<8x128xf32>, i32 -> vector<8x128xf32>
    %88 = arith.mulf %10, %18 : vector<1x128xf32>
    %89 = vector.broadcast %88 : vector<1x128xf32> to vector<8x128xf32>
    %90 = arith.mulf %87, %89 : vector<8x128xf32>
    %c0_45 = arith.constant 0 : index
    %c0_46 = arith.constant 0 : index
    %91 = vector.load %arg6[%c0_45, %c0_46] : memref<72x512xf32, #tpu.memory_space<vmem>>, vector<8x128xf32>
    tpu.vector_store %arg6[%c0_45, %c0_46], %90 {strides = array<i32>} : memref<72x512xf32, #tpu.memory_space<vmem>>, vector<8x128xf32>,
    %c8_i32_47 = arith.constant 8 : i32
    %92 = tpu.dynamic_rotate %86 by %c8_i32_47 dim 1 : vector<8x128xf32>, i32 -> vector<8x128xf32>
    %93 = vector.broadcast %10 : vector<1x128xf32> to vector<8x128xf32>
    %94 = arith.mulf %92, %93 : vector<8x128xf32>
    %c8_48 = arith.constant 8 : index
    %c0_49 = arith.constant 0 : index
    %95 = vector.load %arg6[%c8_48, %c0_49] : memref<72x512xf32, #tpu.memory_space<vmem>>, vector<8x128xf32>
    tpu.vector_store %arg6[%c8_48, %c0_49], %94 {strides = array<i32>} : memref<72x512xf32, #tpu.memory_space<vmem>>, vector<8x128xf32>,
    %c7_i32_50 = arith.constant 7 : i32
    %96 = tpu.dynamic_rotate %86 by %c7_i32_50 dim 1 : vector<8x128xf32>, i32 -> vector<8x128xf32>
    %97 = arith.mulf %10, %22 : vector<1x128xf32>
    %98 = vector.broadcast %97 : vector<1x128xf32> to vector<8x128xf32>
    %99 = arith.mulf %96, %98 : vector<8x128xf32>
    %c16_51 = arith.constant 16 : index
    %c0_52 = arith.constant 0 : index
    %100 = vector.load %arg6[%c16_51, %c0_52] : memref<72x512xf32, #tpu.memory_space<vmem>>, vector<8x128xf32>
    tpu.vector_store %arg6[%c16_51, %c0_52], %99 {strides = array<i32>} : memref<72x512xf32, #tpu.memory_space<vmem>>, vector<8x128xf32>,
    %c1_i32_53 = arith.constant 1 : i32
    %101 = tpu.dynamic_rotate %86 by %c1_i32_53 dim 1 : vector<8x128xf32>, i32 -> vector<8x128xf32>
    %102 = vector.broadcast %18 : vector<1x128xf32> to vector<8x128xf32>
    %103 = arith.mulf %101, %102 : vector<8x128xf32>
    %c24_54 = arith.constant 24 : index
    %c0_55 = arith.constant 0 : index
    %104 = vector.load %arg6[%c24_54, %c0_55] : memref<72x512xf32, #tpu.memory_space<vmem>>, vector<8x128xf32>
    tpu.vector_store %arg6[%c24_54, %c0_55], %103 {strides = array<i32>} : memref<72x512xf32, #tpu.memory_space<vmem>>, vector<8x128xf32>,
    %c32_56 = arith.constant 32 : index
    %c0_57 = arith.constant 0 : index
    %105 = vector.load %arg6[%c32_56, %c0_57] : memref<72x512xf32, #tpu.memory_space<vmem>>, vector<8x128xf32>
    tpu.vector_store %arg6[%c32_56, %c0_57], %86 {strides = array<i32>} : memref<72x512xf32, #tpu.memory_space<vmem>>, vector<8x128xf32>,
    %c127_i32 = arith.constant 127 : i32
    %106 = tpu.dynamic_rotate %86 by %c127_i32 dim 1 : vector<8x128xf32>, i32 -> vector<8x128xf32>
    %107 = vector.broadcast %22 : vector<1x128xf32> to vector<8x128xf32>
    %108 = arith.mulf %106, %107 : vector<8x128xf32>
    %c40_58 = arith.constant 40 : index
    %c0_59 = arith.constant 0 : index
    %109 = vector.load %arg6[%c40_58, %c0_59] : memref<72x512xf32, #tpu.memory_space<vmem>>, vector<8x128xf32>
    tpu.vector_store %arg6[%c40_58, %c0_59], %108 {strides = array<i32>} : memref<72x512xf32, #tpu.memory_space<vmem>>, vector<8x128xf32>,
    %c121_i32 = arith.constant 121 : i32
    %110 = tpu.dynamic_rotate %86 by %c121_i32 dim 1 : vector<8x128xf32>, i32 -> vector<8x128xf32>
    %111 = arith.mulf %14, %18 : vector<1x128xf32>
    %112 = vector.broadcast %111 : vector<1x128xf32> to vector<8x128xf32>
    %113 = arith.mulf %110, %112 : vector<8x128xf32>
    %c48_60 = arith.constant 48 : index
    %c0_61 = arith.constant 0 : index
    %114 = vector.load %arg6[%c48_60, %c0_61] : memref<72x512xf32, #tpu.memory_space<vmem>>, vector<8x128xf32>
    tpu.vector_store %arg6[%c48_60, %c0_61], %113 {strides = array<i32>} : memref<72x512xf32, #tpu.memory_space<vmem>>, vector<8x128xf32>,
    %c120_i32 = arith.constant 120 : i32
    %115 = tpu.dynamic_rotate %86 by %c120_i32 dim 1 : vector<8x128xf32>, i32 -> vector<8x128xf32>
    %116 = vector.broadcast %14 : vector<1x128xf32> to vector<8x128xf32>
    %117 = arith.mulf %115, %116 : vector<8x128xf32>
    %c56_62 = arith.constant 56 : index
    %c0_63 = arith.constant 0 : index
    %118 = vector.load %arg6[%c56_62, %c0_63] : memref<72x512xf32, #tpu.memory_space<vmem>>, vector<8x128xf32>
    tpu.vector_store %arg6[%c56_62, %c0_63], %117 {strides = array<i32>} : memref<72x512xf32, #tpu.memory_space<vmem>>, vector<8x128xf32>,
    %c119_i32 = arith.constant 119 : i32
    %119 = tpu.dynamic_rotate %86 by %c119_i32 dim 1 : vector<8x128xf32>, i32 -> vector<8x128xf32>
    %120 = arith.mulf %14, %22 : vector<1x128xf32>
    %121 = vector.broadcast %120 : vector<1x128xf32> to vector<8x128xf32>
    %122 = arith.mulf %119, %121 : vector<8x128xf32>
    %c64_64 = arith.constant 64 : index
    %c0_65 = arith.constant 0 : index
    %123 = vector.load %arg6[%c64_64, %c0_65] : memref<72x512xf32, #tpu.memory_space<vmem>>, vector<8x128xf32>
    tpu.vector_store %arg6[%c64_64, %c0_65], %122 {strides = array<i32>} : memref<72x512xf32, #tpu.memory_space<vmem>>, vector<8x128xf32>,
    %c1 = arith.constant 1 : index
    %c0_66 = arith.constant 0 : index
    %c0_67 = arith.constant 0 : index
    %124 = vector.load %arg3[%c1, %c0_66, %c0_67] : memref<10x8x72xbf16, #tpu.memory_space<vmem>>, vector<1x8x72xbf16>
    %125 = vector.shape_cast %124 : vector<1x8x72xbf16> to vector<8x72xbf16>
    %c0_68 = arith.constant 0 : index
    %c0_69 = arith.constant 0 : index
    %126 = vector.load %arg6[%c0_68, %c0_69] : memref<72x512xf32, #tpu.memory_space<vmem>>, vector<72x128xf32>
    %127 = arith.truncf %126 : vector<72x128xf32> to vector<72x128xbf16>
    %cst_70 = arith.constant dense<0.000000e+00> : vector<8x128xf32>
    %128 = tpu.matmul %125, %127, %cst_70 {dimension_numbers = #tpu.dot_dimension_numbers<[1], [0], [0], [1], [0, 0, 1, 1], [], []>} : vector<8x72xbf16>, vector<72x128xbf16>, vector<8x128xf32> -> vector<8x128xf32>
    %c0_71 = arith.constant 0 : index
    %c0_72 = arith.constant 0 : index
    %c0_73 = arith.constant 0 : index
    %c0_74 = arith.constant 0 : index
    %129 = vector.load %arg4[%c0_71, %c0_72, %c0_73, %c0_74] : memref<9x2x8x1xf32, #tpu.memory_space<vmem>>, vector<1x1x8x1xf32>
    %130 = vector.shape_cast %129 : vector<1x1x8x1xf32> to vector<8x1xf32>
    %c0_75 = arith.constant 0 : index
    %c1_76 = arith.constant 1 : index
    %c0_77 = arith.constant 0 : index
    %c0_78 = arith.constant 0 : index
    %131 = vector.load %arg4[%c0_75, %c1_76, %c0_77, %c0_78] : memref<9x2x8x1xf32, #tpu.memory_space<vmem>>, vector<1x1x8x1xf32>
    %132 = vector.shape_cast %131 : vector<1x1x8x1xf32> to vector<8x1xf32>
    %cst_79 = arith.constant dense<0.000000e+00> : vector<8xf32>
    %133 = vector.multi_reduction <add>, %128, %cst_79 [1] : vector<8x128xf32> to vector<8xf32>
    %134 = vector.shape_cast %133 : vector<8xf32> to vector<8x1xf32>
    %cst_80 = arith.constant 7.812500e-03 : f32
    %135 = vector.broadcast %cst_80 : f32 to vector<8x1xf32>
    %136 = arith.mulf %134, %135 : vector<8x1xf32>
    %137 = vector.broadcast %136 : vector<8x1xf32> to vector<8x128xf32>
    %138 = arith.subf %128, %137 : vector<8x128xf32>
    %139 = arith.mulf %138, %138 : vector<8x128xf32>
    %cst_81 = arith.constant dense<0.000000e+00> : vector<8xf32>
    %140 = vector.multi_reduction <add>, %139, %cst_81 [1] : vector<8x128xf32> to vector<8xf32>
    %141 = vector.shape_cast %140 : vector<8xf32> to vector<8x1xf32>
    %cst_82 = arith.constant 7.812500e-03 : f32
    %142 = vector.broadcast %cst_82 : f32 to vector<8x1xf32>
    %143 = arith.mulf %141, %142 : vector<8x1xf32>
    %cst_83 = arith.constant 9.99999974E-6 : f32
    %144 = vector.broadcast %cst_83 : f32 to vector<8x1xf32>
    %145 = arith.addf %143, %144 : vector<8x1xf32>
    %146 = math.rsqrt %145 : vector<8x1xf32>
    %147 = vector.broadcast %146 : vector<8x1xf32> to vector<8x128xf32>
    %148 = arith.mulf %138, %147 : vector<8x128xf32>
    %149 = vector.broadcast %130 : vector<8x1xf32> to vector<8x128xf32>
    %150 = arith.mulf %148, %149 : vector<8x128xf32>
    %151 = vector.broadcast %132 : vector<8x1xf32> to vector<8x128xf32>
    %152 = arith.addf %150, %151 : vector<8x128xf32>
    %cst_84 = arith.constant 0.000000e+00 : f32
    %153 = vector.broadcast %cst_84 : f32 to vector<8x128xf32>
    %154 = arith.maximumf %152, %153 : vector<8x128xf32>
    %c9_i32_85 = arith.constant 9 : i32
    %155 = tpu.dynamic_rotate %154 by %c9_i32_85 dim 1 : vector<8x128xf32>, i32 -> vector<8x128xf32>
    %156 = arith.mulf %10, %18 : vector<1x128xf32>
    %157 = vector.broadcast %156 : vector<1x128xf32> to vector<8x128xf32>
    %158 = arith.mulf %155, %157 : vector<8x128xf32>
    %c0_86 = arith.constant 0 : index
    %c0_87 = arith.constant 0 : index
    %159 = vector.load %arg6[%c0_86, %c0_87] : memref<72x512xf32, #tpu.memory_space<vmem>>, vector<8x128xf32>
    tpu.vector_store %arg6[%c0_86, %c0_87], %158 {strides = array<i32>} : memref<72x512xf32, #tpu.memory_space<vmem>>, vector<8x128xf32>,
    %c8_i32_88 = arith.constant 8 : i32
    %160 = tpu.dynamic_rotate %154 by %c8_i32_88 dim 1 : vector<8x128xf32>, i32 -> vector<8x128xf32>
    %161 = vector.broadcast %10 : vector<1x128xf32> to vector<8x128xf32>
    %162 = arith.mulf %160, %161 : vector<8x128xf32>
    %c8_89 = arith.constant 8 : index
    %c0_90 = arith.constant 0 : index
    %163 = vector.load %arg6[%c8_89, %c0_90] : memref<72x512xf32, #tpu.memory_space<vmem>>, vector<8x128xf32>
    tpu.vector_store %arg6[%c8_89, %c0_90], %162 {strides = array<i32>} : memref<72x512xf32, #tpu.memory_space<vmem>>, vector<8x128xf32>,
    %c7_i32_91 = arith.constant 7 : i32
    %164 = tpu.dynamic_rotate %154 by %c7_i32_91 dim 1 : vector<8x128xf32>, i32 -> vector<8x128xf32>
    %165 = arith.mulf %10, %22 : vector<1x128xf32>
    %166 = vector.broadcast %165 : vector<1x128xf32> to vector<8x128xf32>
    %167 = arith.mulf %164, %166 : vector<8x128xf32>
    %c16_92 = arith.constant 16 : index
    %c0_93 = arith.constant 0 : index
    %168 = vector.load %arg6[%c16_92, %c0_93] : memref<72x512xf32, #tpu.memory_space<vmem>>, vector<8x128xf32>
    tpu.vector_store %arg6[%c16_92, %c0_93], %167 {strides = array<i32>} : memref<72x512xf32, #tpu.memory_space<vmem>>, vector<8x128xf32>,
    %c1_i32_94 = arith.constant 1 : i32
    %169 = tpu.dynamic_rotate %154 by %c1_i32_94 dim 1 : vector<8x128xf32>, i32 -> vector<8x128xf32>
    %170 = vector.broadcast %18 : vector<1x128xf32> to vector<8x128xf32>
    %171 = arith.mulf %169, %170 : vector<8x128xf32>
    %c24_95 = arith.constant 24 : index
    %c0_96 = arith.constant 0 : index
    %172 = vector.load %arg6[%c24_95, %c0_96] : memref<72x512xf32, #tpu.memory_space<vmem>>, vector<8x128xf32>
    tpu.vector_store %arg6[%c24_95, %c0_96], %171 {strides = array<i32>} : memref<72x512xf32, #tpu.memory_space<vmem>>, vector<8x128xf32>,
    %c32_97 = arith.constant 32 : index
    %c0_98 = arith.constant 0 : index
    %173 = vector.load %arg6[%c32_97, %c0_98] : memref<72x512xf32, #tpu.memory_space<vmem>>, vector<8x128xf32>
    tpu.vector_store %arg6[%c32_97, %c0_98], %154 {strides = array<i32>} : memref<72x512xf32, #tpu.memory_space<vmem>>, vector<8x128xf32>,
    %c127_i32_99 = arith.constant 127 : i32
    %174 = tpu.dynamic_rotate %154 by %c127_i32_99 dim 1 : vector<8x128xf32>, i32 -> vector<8x128xf32>
    %175 = vector.broadcast %22 : vector<1x128xf32> to vector<8x128xf32>
    %176 = arith.mulf %174, %175 : vector<8x128xf32>
    %c40_100 = arith.constant 40 : index
    %c0_101 = arith.constant 0 : index
    %177 = vector.load %arg6[%c40_100, %c0_101] : memref<72x512xf32, #tpu.memory_space<vmem>>, vector<8x128xf32>
    tpu.vector_store %arg6[%c40_100, %c0_101], %176 {strides = array<i32>} : memref<72x512xf32, #tpu.memory_space<vmem>>, vector<8x128xf32>,
    %c121_i32_102 = arith.constant 121 : i32
    %178 = tpu.dynamic_rotate %154 by %c121_i32_102 dim 1 : vector<8x128xf32>, i32 -> vector<8x128xf32>
    %179 = arith.mulf %14, %18 : vector<1x128xf32>
    %180 = vector.broadcast %179 : vector<1x128xf32> to vector<8x128xf32>
    %181 = arith.mulf %178, %180 : vector<8x128xf32>
    %c48_103 = arith.constant 48 : index
    %c0_104 = arith.constant 0 : index
    %182 = vector.load %arg6[%c48_103, %c0_104] : memref<72x512xf32, #tpu.memory_space<vmem>>, vector<8x128xf32>
    tpu.vector_store %arg6[%c48_103, %c0_104], %181 {strides = array<i32>} : memref<72x512xf32, #tpu.memory_space<vmem>>, vector<8x128xf32>,
    %c120_i32_105 = arith.constant 120 : i32
    %183 = tpu.dynamic_rotate %154 by %c120_i32_105 dim 1 : vector<8x128xf32>, i32 -> vector<8x128xf32>
    %184 = vector.broadcast %14 : vector<1x128xf32> to vector<8x128xf32>
    %185 = arith.mulf %183, %184 : vector<8x128xf32>
    %c56_106 = arith.constant 56 : index
    %c0_107 = arith.constant 0 : index
    %186 = vector.load %arg6[%c56_106, %c0_107] : memref<72x512xf32, #tpu.memory_space<vmem>>, vector<8x128xf32>
    tpu.vector_store %arg6[%c56_106, %c0_107], %185 {strides = array<i32>} : memref<72x512xf32, #tpu.memory_space<vmem>>, vector<8x128xf32>,
    %c119_i32_108 = arith.constant 119 : i32
    %187 = tpu.dynamic_rotate %154 by %c119_i32_108 dim 1 : vector<8x128xf32>, i32 -> vector<8x128xf32>
    %188 = arith.mulf %14, %22 : vector<1x128xf32>
    %189 = vector.broadcast %188 : vector<1x128xf32> to vector<8x128xf32>
    %190 = arith.mulf %187, %189 : vector<8x128xf32>
    %c64_109 = arith.constant 64 : index
    %c0_110 = arith.constant 0 : index
    %191 = vector.load %arg6[%c64_109, %c0_110] : memref<72x512xf32, #tpu.memory_space<vmem>>, vector<8x128xf32>
    tpu.vector_store %arg6[%c64_109, %c0_110], %190 {strides = array<i32>} : memref<72x512xf32, #tpu.memory_space<vmem>>, vector<8x128xf32>,
    %c2 = arith.constant 2 : index
    %c0_111 = arith.constant 0 : index
    %c0_112 = arith.constant 0 : index
    %192 = vector.load %arg3[%c2, %c0_111, %c0_112] : memref<10x8x72xbf16, #tpu.memory_space<vmem>>, vector<1x8x72xbf16>
    %193 = vector.shape_cast %192 : vector<1x8x72xbf16> to vector<8x72xbf16>
    %c0_113 = arith.constant 0 : index
    %c0_114 = arith.constant 0 : index
    %194 = vector.load %arg6[%c0_113, %c0_114] : memref<72x512xf32, #tpu.memory_space<vmem>>, vector<72x128xf32>
    %195 = arith.truncf %194 : vector<72x128xf32> to vector<72x128xbf16>
    %cst_115 = arith.constant dense<0.000000e+00> : vector<8x128xf32>
    %196 = tpu.matmul %193, %195, %cst_115 {dimension_numbers = #tpu.dot_dimension_numbers<[1], [0], [0], [1], [0, 0, 1, 1], [], []>} : vector<8x72xbf16>, vector<72x128xbf16>, vector<8x128xf32> -> vector<8x128xf32>
    %c1_116 = arith.constant 1 : index
    %c0_117 = arith.constant 0 : index
    %c0_118 = arith.constant 0 : index
    %c0_119 = arith.constant 0 : index
    %197 = vector.load %arg4[%c1_116, %c0_117, %c0_118, %c0_119] : memref<9x2x8x1xf32, #tpu.memory_space<vmem>>, vector<1x1x8x1xf32>
    %198 = vector.shape_cast %197 : vector<1x1x8x1xf32> to vector<8x1xf32>
    %c1_120 = arith.constant 1 : index
    %c1_121 = arith.constant 1 : index
    %c0_122 = arith.constant 0 : index
    %c0_123 = arith.constant 0 : index
    %199 = vector.load %arg4[%c1_120, %c1_121, %c0_122, %c0_123] : memref<9x2x8x1xf32, #tpu.memory_space<vmem>>, vector<1x1x8x1xf32>
    %200 = vector.shape_cast %199 : vector<1x1x8x1xf32> to vector<8x1xf32>
    %cst_124 = arith.constant dense<0.000000e+00> : vector<8xf32>
    %201 = vector.multi_reduction <add>, %196, %cst_124 [1] : vector<8x128xf32> to vector<8xf32>
    %202 = vector.shape_cast %201 : vector<8xf32> to vector<8x1xf32>
    %cst_125 = arith.constant 7.812500e-03 : f32
    %203 = vector.broadcast %cst_125 : f32 to vector<8x1xf32>
    %204 = arith.mulf %202, %203 : vector<8x1xf32>
    %205 = vector.broadcast %204 : vector<8x1xf32> to vector<8x128xf32>
    %206 = arith.subf %196, %205 : vector<8x128xf32>
    %207 = arith.mulf %206, %206 : vector<8x128xf32>
    %cst_126 = arith.constant dense<0.000000e+00> : vector<8xf32>
    %208 = vector.multi_reduction <add>, %207, %cst_126 [1] : vector<8x128xf32> to vector<8xf32>
    %209 = vector.shape_cast %208 : vector<8xf32> to vector<8x1xf32>
    %cst_127 = arith.constant 7.812500e-03 : f32
    %210 = vector.broadcast %cst_127 : f32 to vector<8x1xf32>
    %211 = arith.mulf %209, %210 : vector<8x1xf32>
    %cst_128 = arith.constant 9.99999974E-6 : f32
    %212 = vector.broadcast %cst_128 : f32 to vector<8x1xf32>
    %213 = arith.addf %211, %212 : vector<8x1xf32>
    %214 = math.rsqrt %213 : vector<8x1xf32>
    %215 = vector.broadcast %214 : vector<8x1xf32> to vector<8x128xf32>
    %216 = arith.mulf %206, %215 : vector<8x128xf32>
    %217 = vector.broadcast %198 : vector<8x1xf32> to vector<8x128xf32>
    %218 = arith.mulf %216, %217 : vector<8x128xf32>
    %219 = vector.broadcast %200 : vector<8x1xf32> to vector<8x128xf32>
    %220 = arith.addf %218, %219 : vector<8x128xf32>
    %221 = arith.addf %220, %86 : vector<8x128xf32>
    %cst_129 = arith.constant 0.000000e+00 : f32
    %222 = vector.broadcast %cst_129 : f32 to vector<8x128xf32>
    %223 = arith.maximumf %221, %222 : vector<8x128xf32>
    %c9_i32_130 = arith.constant 9 : i32
    %224 = tpu.dynamic_rotate %223 by %c9_i32_130 dim 1 : vector<8x128xf32>, i32 -> vector<8x128xf32>
    %225 = arith.mulf %10, %18 : vector<1x128xf32>
    %226 = vector.broadcast %225 : vector<1x128xf32> to vector<8x128xf32>
    %227 = arith.mulf %224, %226 : vector<8x128xf32>
    %c0_131 = arith.constant 0 : index
    %c0_132 = arith.constant 0 : index
    %228 = vector.load %arg6[%c0_131, %c0_132] : memref<72x512xf32, #tpu.memory_space<vmem>>, vector<8x128xf32>
    tpu.vector_store %arg6[%c0_131, %c0_132], %227 {strides = array<i32>} : memref<72x512xf32, #tpu.memory_space<vmem>>, vector<8x128xf32>,
    %c8_i32_133 = arith.constant 8 : i32
    %229 = tpu.dynamic_rotate %223 by %c8_i32_133 dim 1 : vector<8x128xf32>, i32 -> vector<8x128xf32>
    %230 = vector.broadcast %10 : vector<1x128xf32> to vector<8x128xf32>
    %231 = arith.mulf %229, %230 : vector<8x128xf32>
    %c8_134 = arith.constant 8 : index
    %c0_135 = arith.constant 0 : index
    %232 = vector.load %arg6[%c8_134, %c0_135] : memref<72x512xf32, #tpu.memory_space<vmem>>, vector<8x128xf32>
    tpu.vector_store %arg6[%c8_134, %c0_135], %231 {strides = array<i32>} : memref<72x512xf32, #tpu.memory_space<vmem>>, vector<8x128xf32>,
    %c7_i32_136 = arith.constant 7 : i32
    %233 = tpu.dynamic_rotate %223 by %c7_i32_136 dim 1 : vector<8x128xf32>, i32 -> vector<8x128xf32>
    %234 = arith.mulf %10, %22 : vector<1x128xf32>
    %235 = vector.broadcast %234 : vector<1x128xf32> to vector<8x128xf32>
    %236 = arith.mulf %233, %235 : vector<8x128xf32>
    %c16_137 = arith.constant 16 : index
    %c0_138 = arith.constant 0 : index
    %237 = vector.load %arg6[%c16_137, %c0_138] : memref<72x512xf32, #tpu.memory_space<vmem>>, vector<8x128xf32>
    tpu.vector_store %arg6[%c16_137, %c0_138], %236 {strides = array<i32>} : memref<72x512xf32, #tpu.memory_space<vmem>>, vector<8x128xf32>,
    %c1_i32_139 = arith.constant 1 : i32
    %238 = tpu.dynamic_rotate %223 by %c1_i32_139 dim 1 : vector<8x128xf32>, i32 -> vector<8x128xf32>
    %239 = vector.broadcast %18 : vector<1x128xf32> to vector<8x128xf32>
    %240 = arith.mulf %238, %239 : vector<8x128xf32>
    %c24_140 = arith.constant 24 : index
    %c0_141 = arith.constant 0 : index
    %241 = vector.load %arg6[%c24_140, %c0_141] : memref<72x512xf32, #tpu.memory_space<vmem>>, vector<8x128xf32>
    tpu.vector_store %arg6[%c24_140, %c0_141], %240 {strides = array<i32>} : memref<72x512xf32, #tpu.memory_space<vmem>>, vector<8x128xf32>,
    %c32_142 = arith.constant 32 : index
    %c0_143 = arith.constant 0 : index
    %242 = vector.load %arg6[%c32_142, %c0_143] : memref<72x512xf32, #tpu.memory_space<vmem>>, vector<8x128xf32>
    tpu.vector_store %arg6[%c32_142, %c0_143], %223 {strides = array<i32>} : memref<72x512xf32, #tpu.memory_space<vmem>>, vector<8x128xf32>,
    %c127_i32_144 = arith.constant 127 : i32
    %243 = tpu.dynamic_rotate %223 by %c127_i32_144 dim 1 : vector<8x128xf32>, i32 -> vector<8x128xf32>
    %244 = vector.broadcast %22 : vector<1x128xf32> to vector<8x128xf32>
    %245 = arith.mulf %243, %244 : vector<8x128xf32>
    %c40_145 = arith.constant 40 : index
    %c0_146 = arith.constant 0 : index
    %246 = vector.load %arg6[%c40_145, %c0_146] : memref<72x512xf32, #tpu.memory_space<vmem>>, vector<8x128xf32>
    tpu.vector_store %arg6[%c40_145, %c0_146], %245 {strides = array<i32>} : memref<72x512xf32, #tpu.memory_space<vmem>>, vector<8x128xf32>,
    %c121_i32_147 = arith.constant 121 : i32
    %247 = tpu.dynamic_rotate %223 by %c121_i32_147 dim 1 : vector<8x128xf32>, i32 -> vector<8x128xf32>
    %248 = arith.mulf %14, %18 : vector<1x128xf32>
    %249 = vector.broadcast %248 : vector<1x128xf32> to vector<8x128xf32>
    %250 = arith.mulf %247, %249 : vector<8x128xf32>
    %c48_148 = arith.constant 48 : index
    %c0_149 = arith.constant 0 : index
    %251 = vector.load %arg6[%c48_148, %c0_149] : memref<72x512xf32, #tpu.memory_space<vmem>>, vector<8x128xf32>
    tpu.vector_store %arg6[%c48_148, %c0_149], %250 {strides = array<i32>} : memref<72x512xf32, #tpu.memory_space<vmem>>, vector<8x128xf32>,
    %c120_i32_150 = arith.constant 120 : i32
    %252 = tpu.dynamic_rotate %223 by %c120_i32_150 dim 1 : vector<8x128xf32>, i32 -> vector<8x128xf32>
    %253 = vector.broadcast %14 : vector<1x128xf32> to vector<8x128xf32>
    %254 = arith.mulf %252, %253 : vector<8x128xf32>
    %c56_151 = arith.constant 56 : index
    %c0_152 = arith.constant 0 : index
    %255 = vector.load %arg6[%c56_151, %c0_152] : memref<72x512xf32, #tpu.memory_space<vmem>>, vector<8x128xf32>
    tpu.vector_store %arg6[%c56_151, %c0_152], %254 {strides = array<i32>} : memref<72x512xf32, #tpu.memory_space<vmem>>, vector<8x128xf32>,
    %c119_i32_153 = arith.constant 119 : i32
    %256 = tpu.dynamic_rotate %223 by %c119_i32_153 dim 1 : vector<8x128xf32>, i32 -> vector<8x128xf32>
    %257 = arith.mulf %14, %22 : vector<1x128xf32>
    %258 = vector.broadcast %257 : vector<1x128xf32> to vector<8x128xf32>
    %259 = arith.mulf %256, %258 : vector<8x128xf32>
    %c64_154 = arith.constant 64 : index
    %c0_155 = arith.constant 0 : index
    %260 = vector.load %arg6[%c64_154, %c0_155] : memref<72x512xf32, #tpu.memory_space<vmem>>, vector<8x128xf32>
    tpu.vector_store %arg6[%c64_154, %c0_155], %259 {strides = array<i32>} : memref<72x512xf32, #tpu.memory_space<vmem>>, vector<8x128xf32>,
    %c3 = arith.constant 3 : index
    %c0_156 = arith.constant 0 : index
    %c0_157 = arith.constant 0 : index
    %261 = vector.load %arg3[%c3, %c0_156, %c0_157] : memref<10x8x72xbf16, #tpu.memory_space<vmem>>, vector<1x8x72xbf16>
    %262 = vector.shape_cast %261 : vector<1x8x72xbf16> to vector<8x72xbf16>
    %c0_158 = arith.constant 0 : index
    %c0_159 = arith.constant 0 : index
    %263 = vector.load %arg6[%c0_158, %c0_159] : memref<72x512xf32, #tpu.memory_space<vmem>>, vector<72x128xf32>
    %264 = arith.truncf %263 : vector<72x128xf32> to vector<72x128xbf16>
    %cst_160 = arith.constant dense<0.000000e+00> : vector<8x128xf32>
    %265 = tpu.matmul %262, %264, %cst_160 {dimension_numbers = #tpu.dot_dimension_numbers<[1], [0], [0], [1], [0, 0, 1, 1], [], []>} : vector<8x72xbf16>, vector<72x128xbf16>, vector<8x128xf32> -> vector<8x128xf32>
    %c2_161 = arith.constant 2 : index
    %c0_162 = arith.constant 0 : index
    %c0_163 = arith.constant 0 : index
    %c0_164 = arith.constant 0 : index
    %266 = vector.load %arg4[%c2_161, %c0_162, %c0_163, %c0_164] : memref<9x2x8x1xf32, #tpu.memory_space<vmem>>, vector<1x1x8x1xf32>
    %267 = vector.shape_cast %266 : vector<1x1x8x1xf32> to vector<8x1xf32>
    %c2_165 = arith.constant 2 : index
    %c1_166 = arith.constant 1 : index
    %c0_167 = arith.constant 0 : index
    %c0_168 = arith.constant 0 : index
    %268 = vector.load %arg4[%c2_165, %c1_166, %c0_167, %c0_168] : memref<9x2x8x1xf32, #tpu.memory_space<vmem>>, vector<1x1x8x1xf32>
    %269 = vector.shape_cast %268 : vector<1x1x8x1xf32> to vector<8x1xf32>
    %cst_169 = arith.constant dense<0.000000e+00> : vector<8xf32>
    %270 = vector.multi_reduction <add>, %265, %cst_169 [1] : vector<8x128xf32> to vector<8xf32>
    %271 = vector.shape_cast %270 : vector<8xf32> to vector<8x1xf32>
    %cst_170 = arith.constant 7.812500e-03 : f32
    %272 = vector.broadcast %cst_170 : f32 to vector<8x1xf32>
    %273 = arith.mulf %271, %272 : vector<8x1xf32>
    %274 = vector.broadcast %273 : vector<8x1xf32> to vector<8x128xf32>
    %275 = arith.subf %265, %274 : vector<8x128xf32>
    %276 = arith.mulf %275, %275 : vector<8x128xf32>
    %cst_171 = arith.constant dense<0.000000e+00> : vector<8xf32>
    %277 = vector.multi_reduction <add>, %276, %cst_171 [1] : vector<8x128xf32> to vector<8xf32>
    %278 = vector.shape_cast %277 : vector<8xf32> to vector<8x1xf32>
    %cst_172 = arith.constant 7.812500e-03 : f32
    %279 = vector.broadcast %cst_172 : f32 to vector<8x1xf32>
    %280 = arith.mulf %278, %279 : vector<8x1xf32>
    %cst_173 = arith.constant 9.99999974E-6 : f32
    %281 = vector.broadcast %cst_173 : f32 to vector<8x1xf32>
    %282 = arith.addf %280, %281 : vector<8x1xf32>
    %283 = math.rsqrt %282 : vector<8x1xf32>
    %284 = vector.broadcast %283 : vector<8x1xf32> to vector<8x128xf32>
    %285 = arith.mulf %275, %284 : vector<8x128xf32>
    %286 = vector.broadcast %267 : vector<8x1xf32> to vector<8x128xf32>
    %287 = arith.mulf %285, %286 : vector<8x128xf32>
    %288 = vector.broadcast %269 : vector<8x1xf32> to vector<8x128xf32>
    %289 = arith.addf %287, %288 : vector<8x128xf32>
    %cst_174 = arith.constant 0.000000e+00 : f32
    %290 = vector.broadcast %cst_174 : f32 to vector<8x128xf32>
    %291 = arith.maximumf %289, %290 : vector<8x128xf32>
    %c9_i32_175 = arith.constant 9 : i32
    %292 = tpu.dynamic_rotate %291 by %c9_i32_175 dim 1 : vector<8x128xf32>, i32 -> vector<8x128xf32>
    %293 = arith.mulf %10, %18 : vector<1x128xf32>
    %294 = vector.broadcast %293 : vector<1x128xf32> to vector<8x128xf32>
    %295 = arith.mulf %292, %294 : vector<8x128xf32>
    %c0_176 = arith.constant 0 : index
    %c0_177 = arith.constant 0 : index
    %296 = vector.load %arg6[%c0_176, %c0_177] : memref<72x512xf32, #tpu.memory_space<vmem>>, vector<8x128xf32>
    tpu.vector_store %arg6[%c0_176, %c0_177], %295 {strides = array<i32>} : memref<72x512xf32, #tpu.memory_space<vmem>>, vector<8x128xf32>,
    %c8_i32_178 = arith.constant 8 : i32
    %297 = tpu.dynamic_rotate %291 by %c8_i32_178 dim 1 : vector<8x128xf32>, i32 -> vector<8x128xf32>
    %298 = vector.broadcast %10 : vector<1x128xf32> to vector<8x128xf32>
    %299 = arith.mulf %297, %298 : vector<8x128xf32>
    %c8_179 = arith.constant 8 : index
    %c0_180 = arith.constant 0 : index
    %300 = vector.load %arg6[%c8_179, %c0_180] : memref<72x512xf32, #tpu.memory_space<vmem>>, vector<8x128xf32>
    tpu.vector_store %arg6[%c8_179, %c0_180], %299 {strides = array<i32>} : memref<72x512xf32, #tpu.memory_space<vmem>>, vector<8x128xf32>,
    %c7_i32_181 = arith.constant 7 : i32
    %301 = tpu.dynamic_rotate %291 by %c7_i32_181 dim 1 : vector<8x128xf32>, i32 -> vector<8x128xf32>
    %302 = arith.mulf %10, %22 : vector<1x128xf32>
    %303 = vector.broadcast %302 : vector<1x128xf32> to vector<8x128xf32>
    %304 = arith.mulf %301, %303 : vector<8x128xf32>
    %c16_182 = arith.constant 16 : index
    %c0_183 = arith.constant 0 : index
    %305 = vector.load %arg6[%c16_182, %c0_183] : memref<72x512xf32, #tpu.memory_space<vmem>>, vector<8x128xf32>
    tpu.vector_store %arg6[%c16_182, %c0_183], %304 {strides = array<i32>} : memref<72x512xf32, #tpu.memory_space<vmem>>, vector<8x128xf32>,
    %c1_i32_184 = arith.constant 1 : i32
    %306 = tpu.dynamic_rotate %291 by %c1_i32_184 dim 1 : vector<8x128xf32>, i32 -> vector<8x128xf32>
    %307 = vector.broadcast %18 : vector<1x128xf32> to vector<8x128xf32>
    %308 = arith.mulf %306, %307 : vector<8x128xf32>
    %c24_185 = arith.constant 24 : index
    %c0_186 = arith.constant 0 : index
    %309 = vector.load %arg6[%c24_185, %c0_186] : memref<72x512xf32, #tpu.memory_space<vmem>>, vector<8x128xf32>
    tpu.vector_store %arg6[%c24_185, %c0_186], %308 {strides = array<i32>} : memref<72x512xf32, #tpu.memory_space<vmem>>, vector<8x128xf32>,
    %c32_187 = arith.constant 32 : index
    %c0_188 = arith.constant 0 : index
    %310 = vector.load %arg6[%c32_187, %c0_188] : memref<72x512xf32, #tpu.memory_space<vmem>>, vector<8x128xf32>
    tpu.vector_store %arg6[%c32_187, %c0_188], %291 {strides = array<i32>} : memref<72x512xf32, #tpu.memory_space<vmem>>, vector<8x128xf32>,
    %c127_i32_189 = arith.constant 127 : i32
    %311 = tpu.dynamic_rotate %291 by %c127_i32_189 dim 1 : vector<8x128xf32>, i32 -> vector<8x128xf32>
    %312 = vector.broadcast %22 : vector<1x128xf32> to vector<8x128xf32>
    %313 = arith.mulf %311, %312 : vector<8x128xf32>
    %c40_190 = arith.constant 40 : index
    %c0_191 = arith.constant 0 : index
    %314 = vector.load %arg6[%c40_190, %c0_191] : memref<72x512xf32, #tpu.memory_space<vmem>>, vector<8x128xf32>
    tpu.vector_store %arg6[%c40_190, %c0_191], %313 {strides = array<i32>} : memref<72x512xf32, #tpu.memory_space<vmem>>, vector<8x128xf32>,
    %c121_i32_192 = arith.constant 121 : i32
    %315 = tpu.dynamic_rotate %291 by %c121_i32_192 dim 1 : vector<8x128xf32>, i32 -> vector<8x128xf32>
    %316 = arith.mulf %14, %18 : vector<1x128xf32>
    %317 = vector.broadcast %316 : vector<1x128xf32> to vector<8x128xf32>
    %318 = arith.mulf %315, %317 : vector<8x128xf32>
    %c48_193 = arith.constant 48 : index
    %c0_194 = arith.constant 0 : index
    %319 = vector.load %arg6[%c48_193, %c0_194] : memref<72x512xf32, #tpu.memory_space<vmem>>, vector<8x128xf32>
    tpu.vector_store %arg6[%c48_193, %c0_194], %318 {strides = array<i32>} : memref<72x512xf32, #tpu.memory_space<vmem>>, vector<8x128xf32>,
    %c120_i32_195 = arith.constant 120 : i32
    %320 = tpu.dynamic_rotate %291 by %c120_i32_195 dim 1 : vector<8x128xf32>, i32 -> vector<8x128xf32>
    %321 = vector.broadcast %14 : vector<1x128xf32> to vector<8x128xf32>
    %322 = arith.mulf %320, %321 : vector<8x128xf32>
    %c56_196 = arith.constant 56 : index
    %c0_197 = arith.constant 0 : index
    %323 = vector.load %arg6[%c56_196, %c0_197] : memref<72x512xf32, #tpu.memory_space<vmem>>, vector<8x128xf32>
    tpu.vector_store %arg6[%c56_196, %c0_197], %322 {strides = array<i32>} : memref<72x512xf32, #tpu.memory_space<vmem>>, vector<8x128xf32>,
    %c119_i32_198 = arith.constant 119 : i32
    %324 = tpu.dynamic_rotate %291 by %c119_i32_198 dim 1 : vector<8x128xf32>, i32 -> vector<8x128xf32>
    %325 = arith.mulf %14, %22 : vector<1x128xf32>
    %326 = vector.broadcast %325 : vector<1x128xf32> to vector<8x128xf32>
    %327 = arith.mulf %324, %326 : vector<8x128xf32>
    %c64_199 = arith.constant 64 : index
    %c0_200 = arith.constant 0 : index
    %328 = vector.load %arg6[%c64_199, %c0_200] : memref<72x512xf32, #tpu.memory_space<vmem>>, vector<8x128xf32>
    tpu.vector_store %arg6[%c64_199, %c0_200], %327 {strides = array<i32>} : memref<72x512xf32, #tpu.memory_space<vmem>>, vector<8x128xf32>,
    %c4 = arith.constant 4 : index
    %c0_201 = arith.constant 0 : index
    %c0_202 = arith.constant 0 : index
    %329 = vector.load %arg3[%c4, %c0_201, %c0_202] : memref<10x8x72xbf16, #tpu.memory_space<vmem>>, vector<1x8x72xbf16>
    %330 = vector.shape_cast %329 : vector<1x8x72xbf16> to vector<8x72xbf16>
    %c0_203 = arith.constant 0 : index
    %c0_204 = arith.constant 0 : index
    %331 = vector.load %arg6[%c0_203, %c0_204] : memref<72x512xf32, #tpu.memory_space<vmem>>, vector<72x128xf32>
    %332 = arith.truncf %331 : vector<72x128xf32> to vector<72x128xbf16>
    %cst_205 = arith.constant dense<0.000000e+00> : vector<8x128xf32>
    %333 = tpu.matmul %330, %332, %cst_205 {dimension_numbers = #tpu.dot_dimension_numbers<[1], [0], [0], [1], [0, 0, 1, 1], [], []>} : vector<8x72xbf16>, vector<72x128xbf16>, vector<8x128xf32> -> vector<8x128xf32>
    %c3_206 = arith.constant 3 : index
    %c0_207 = arith.constant 0 : index
    %c0_208 = arith.constant 0 : index
    %c0_209 = arith.constant 0 : index
    %334 = vector.load %arg4[%c3_206, %c0_207, %c0_208, %c0_209] : memref<9x2x8x1xf32, #tpu.memory_space<vmem>>, vector<1x1x8x1xf32>
    %335 = vector.shape_cast %334 : vector<1x1x8x1xf32> to vector<8x1xf32>
    %c3_210 = arith.constant 3 : index
    %c1_211 = arith.constant 1 : index
    %c0_212 = arith.constant 0 : index
    %c0_213 = arith.constant 0 : index
    %336 = vector.load %arg4[%c3_210, %c1_211, %c0_212, %c0_213] : memref<9x2x8x1xf32, #tpu.memory_space<vmem>>, vector<1x1x8x1xf32>
    %337 = vector.shape_cast %336 : vector<1x1x8x1xf32> to vector<8x1xf32>
    %cst_214 = arith.constant dense<0.000000e+00> : vector<8xf32>
    %338 = vector.multi_reduction <add>, %333, %cst_214 [1] : vector<8x128xf32> to vector<8xf32>
    %339 = vector.shape_cast %338 : vector<8xf32> to vector<8x1xf32>
    %cst_215 = arith.constant 7.812500e-03 : f32
    %340 = vector.broadcast %cst_215 : f32 to vector<8x1xf32>
    %341 = arith.mulf %339, %340 : vector<8x1xf32>
    %342 = vector.broadcast %341 : vector<8x1xf32> to vector<8x128xf32>
    %343 = arith.subf %333, %342 : vector<8x128xf32>
    %344 = arith.mulf %343, %343 : vector<8x128xf32>
    %cst_216 = arith.constant dense<0.000000e+00> : vector<8xf32>
    %345 = vector.multi_reduction <add>, %344, %cst_216 [1] : vector<8x128xf32> to vector<8xf32>
    %346 = vector.shape_cast %345 : vector<8xf32> to vector<8x1xf32>
    %cst_217 = arith.constant 7.812500e-03 : f32
    %347 = vector.broadcast %cst_217 : f32 to vector<8x1xf32>
    %348 = arith.mulf %346, %347 : vector<8x1xf32>
    %cst_218 = arith.constant 9.99999974E-6 : f32
    %349 = vector.broadcast %cst_218 : f32 to vector<8x1xf32>
    %350 = arith.addf %348, %349 : vector<8x1xf32>
    %351 = math.rsqrt %350 : vector<8x1xf32>
    %352 = vector.broadcast %351 : vector<8x1xf32> to vector<8x128xf32>
    %353 = arith.mulf %343, %352 : vector<8x128xf32>
    %354 = vector.broadcast %335 : vector<8x1xf32> to vector<8x128xf32>
    %355 = arith.mulf %353, %354 : vector<8x128xf32>
    %356 = vector.broadcast %337 : vector<8x1xf32> to vector<8x128xf32>
    %357 = arith.addf %355, %356 : vector<8x128xf32>
    %358 = arith.addf %357, %223 : vector<8x128xf32>
    %cst_219 = arith.constant 0.000000e+00 : f32
    %359 = vector.broadcast %cst_219 : f32 to vector<8x128xf32>
    %360 = arith.maximumf %358, %359 : vector<8x128xf32>
    %361 = arith.truncf %360 : vector<8x128xf32> to vector<8x128xbf16>
    %c0_220 = arith.constant 0 : index
    %c0_221 = arith.constant 0 : index
    %362 = vector.load %arg2[%c0_220, %c0_221] : memref<128x512xbf16, #tpu.memory_space<vmem>>, vector<128x512xbf16>
    %cst_222 = arith.constant dense<0.000000e+00> : vector<8x512xf32>
    %363 = tpu.matmul %361, %362, %cst_222 {dimension_numbers = #tpu.dot_dimension_numbers<[1], [0], [0], [1], [0, 0, 1, 1], [], []>} : vector<8x128xbf16>, vector<128x512xbf16>, vector<8x512xf32> -> vector<8x512xf32>
    %c17_i32 = arith.constant 17 : i32
    %364 = tpu.dynamic_rotate %363 by %c17_i32 dim 1 : vector<8x512xf32>, i32 -> vector<8x512xf32>
    %365 = arith.mulf %33, %41 : vector<1x512xf32>
    %366 = vector.broadcast %365 : vector<1x512xf32> to vector<8x512xf32>
    %367 = arith.mulf %364, %366 : vector<8x512xf32>
    %c0_223 = arith.constant 0 : index
    %c0_224 = arith.constant 0 : index
    %368 = vector.load %arg6[%c0_223, %c0_224] : memref<72x512xf32, #tpu.memory_space<vmem>>, vector<8x512xf32>
    tpu.vector_store %arg6[%c0_223, %c0_224], %367 {strides = array<i32>} : memref<72x512xf32, #tpu.memory_space<vmem>>, vector<8x512xf32>,
    %c16_i32 = arith.constant 16 : i32
    %369 = tpu.dynamic_rotate %363 by %c16_i32 dim 1 : vector<8x512xf32>, i32 -> vector<8x512xf32>
    %370 = vector.broadcast %33 : vector<1x512xf32> to vector<8x512xf32>
    %371 = arith.mulf %369, %370 : vector<8x512xf32>
    %c8_225 = arith.constant 8 : index
    %c0_226 = arith.constant 0 : index
    %372 = vector.load %arg6[%c8_225, %c0_226] : memref<72x512xf32, #tpu.memory_space<vmem>>, vector<8x512xf32>
    tpu.vector_store %arg6[%c8_225, %c0_226], %371 {strides = array<i32>} : memref<72x512xf32, #tpu.memory_space<vmem>>, vector<8x512xf32>,
    %c15_i32_227 = arith.constant 15 : i32
    %373 = tpu.dynamic_rotate %363 by %c15_i32_227 dim 1 : vector<8x512xf32>, i32 -> vector<8x512xf32>
    %374 = arith.mulf %33, %45 : vector<1x512xf32>
    %375 = vector.broadcast %374 : vector<1x512xf32> to vector<8x512xf32>
    %376 = arith.mulf %373, %375 : vector<8x512xf32>
    %c16_228 = arith.constant 16 : index
    %c0_229 = arith.constant 0 : index
    %377 = vector.load %arg6[%c16_228, %c0_229] : memref<72x512xf32, #tpu.memory_space<vmem>>, vector<8x512xf32>
    tpu.vector_store %arg6[%c16_228, %c0_229], %376 {strides = array<i32>} : memref<72x512xf32, #tpu.memory_space<vmem>>, vector<8x512xf32>,
    %c1_i32_230 = arith.constant 1 : i32
    %378 = tpu.dynamic_rotate %363 by %c1_i32_230 dim 1 : vector<8x512xf32>, i32 -> vector<8x512xf32>
    %379 = vector.broadcast %41 : vector<1x512xf32> to vector<8x512xf32>
    %380 = arith.mulf %378, %379 : vector<8x512xf32>
    %c24_231 = arith.constant 24 : index
    %c0_232 = arith.constant 0 : index
    %381 = vector.load %arg6[%c24_231, %c0_232] : memref<72x512xf32, #tpu.memory_space<vmem>>, vector<8x512xf32>
    tpu.vector_store %arg6[%c24_231, %c0_232], %380 {strides = array<i32>} : memref<72x512xf32, #tpu.memory_space<vmem>>, vector<8x512xf32>,
    %c32_233 = arith.constant 32 : index
    %c0_234 = arith.constant 0 : index
    %382 = vector.load %arg6[%c32_233, %c0_234] : memref<72x512xf32, #tpu.memory_space<vmem>>, vector<8x512xf32>
    tpu.vector_store %arg6[%c32_233, %c0_234], %363 {strides = array<i32>} : memref<72x512xf32, #tpu.memory_space<vmem>>, vector<8x512xf32>,
    %c511_i32 = arith.constant 511 : i32
    %383 = tpu.dynamic_rotate %363 by %c511_i32 dim 1 : vector<8x512xf32>, i32 -> vector<8x512xf32>
    %384 = vector.broadcast %45 : vector<1x512xf32> to vector<8x512xf32>
    %385 = arith.mulf %383, %384 : vector<8x512xf32>
    %c40_235 = arith.constant 40 : index
    %c0_236 = arith.constant 0 : index
    %386 = vector.load %arg6[%c40_235, %c0_236] : memref<72x512xf32, #tpu.memory_space<vmem>>, vector<8x512xf32>
    tpu.vector_store %arg6[%c40_235, %c0_236], %385 {strides = array<i32>} : memref<72x512xf32, #tpu.memory_space<vmem>>, vector<8x512xf32>,
    %c497_i32 = arith.constant 497 : i32
    %387 = tpu.dynamic_rotate %363 by %c497_i32 dim 1 : vector<8x512xf32>, i32 -> vector<8x512xf32>
    %388 = arith.mulf %37, %41 : vector<1x512xf32>
    %389 = vector.broadcast %388 : vector<1x512xf32> to vector<8x512xf32>
    %390 = arith.mulf %387, %389 : vector<8x512xf32>
    %c48_237 = arith.constant 48 : index
    %c0_238 = arith.constant 0 : index
    %391 = vector.load %arg6[%c48_237, %c0_238] : memref<72x512xf32, #tpu.memory_space<vmem>>, vector<8x512xf32>
    tpu.vector_store %arg6[%c48_237, %c0_238], %390 {strides = array<i32>} : memref<72x512xf32, #tpu.memory_space<vmem>>, vector<8x512xf32>,
    %c496_i32 = arith.constant 496 : i32
    %392 = tpu.dynamic_rotate %363 by %c496_i32 dim 1 : vector<8x512xf32>, i32 -> vector<8x512xf32>
    %393 = vector.broadcast %37 : vector<1x512xf32> to vector<8x512xf32>
    %394 = arith.mulf %392, %393 : vector<8x512xf32>
    %c56_239 = arith.constant 56 : index
    %c0_240 = arith.constant 0 : index
    %395 = vector.load %arg6[%c56_239, %c0_240] : memref<72x512xf32, #tpu.memory_space<vmem>>, vector<8x512xf32>
    tpu.vector_store %arg6[%c56_239, %c0_240], %394 {strides = array<i32>} : memref<72x512xf32, #tpu.memory_space<vmem>>, vector<8x512xf32>,
    %c495_i32 = arith.constant 495 : i32
    %396 = tpu.dynamic_rotate %363 by %c495_i32 dim 1 : vector<8x512xf32>, i32 -> vector<8x512xf32>
    %397 = arith.mulf %37, %45 : vector<1x512xf32>
    %398 = vector.broadcast %397 : vector<1x512xf32> to vector<8x512xf32>
    %399 = arith.mulf %396, %398 : vector<8x512xf32>
    %c64_241 = arith.constant 64 : index
    %c0_242 = arith.constant 0 : index
    %400 = vector.load %arg6[%c64_241, %c0_242] : memref<72x512xf32, #tpu.memory_space<vmem>>, vector<8x512xf32>
    tpu.vector_store %arg6[%c64_241, %c0_242], %399 {strides = array<i32>} : memref<72x512xf32, #tpu.memory_space<vmem>>, vector<8x512xf32>,
    %c5 = arith.constant 5 : index
    %c0_243 = arith.constant 0 : index
    %c0_244 = arith.constant 0 : index
    %401 = vector.load %arg3[%c5, %c0_243, %c0_244] : memref<10x8x72xbf16, #tpu.memory_space<vmem>>, vector<1x8x72xbf16>
    %402 = vector.shape_cast %401 : vector<1x8x72xbf16> to vector<8x72xbf16>
    %c0_245 = arith.constant 0 : index
    %c0_246 = arith.constant 0 : index
    %403 = vector.load %arg6[%c0_245, %c0_246] : memref<72x512xf32, #tpu.memory_space<vmem>>, vector<72x512xf32>
    %404 = arith.truncf %403 : vector<72x512xf32> to vector<72x512xbf16>
    %cst_247 = arith.constant dense<0.000000e+00> : vector<8x512xf32>
    %405 = tpu.matmul %402, %404, %cst_247 {dimension_numbers = #tpu.dot_dimension_numbers<[1], [0], [0], [1], [0, 0, 1, 1], [], []>} : vector<8x72xbf16>, vector<72x512xbf16>, vector<8x512xf32> -> vector<8x512xf32>
    %c4_248 = arith.constant 4 : index
    %c0_249 = arith.constant 0 : index
    %c0_250 = arith.constant 0 : index
    %c0_251 = arith.constant 0 : index
    %406 = vector.load %arg4[%c4_248, %c0_249, %c0_250, %c0_251] : memref<9x2x8x1xf32, #tpu.memory_space<vmem>>, vector<1x1x8x1xf32>
    %407 = vector.shape_cast %406 : vector<1x1x8x1xf32> to vector<8x1xf32>
    %c4_252 = arith.constant 4 : index
    %c1_253 = arith.constant 1 : index
    %c0_254 = arith.constant 0 : index
    %c0_255 = arith.constant 0 : index
    %408 = vector.load %arg4[%c4_252, %c1_253, %c0_254, %c0_255] : memref<9x2x8x1xf32, #tpu.memory_space<vmem>>, vector<1x1x8x1xf32>
    %409 = vector.shape_cast %408 : vector<1x1x8x1xf32> to vector<8x1xf32>
    %cst_256 = arith.constant dense<0.000000e+00> : vector<8xf32>
    %410 = vector.multi_reduction <add>, %405, %cst_256 [1] : vector<8x512xf32> to vector<8xf32>
    %411 = vector.shape_cast %410 : vector<8xf32> to vector<8x1xf32>
    %cst_257 = arith.constant 0.001953125 : f32
    %412 = vector.broadcast %cst_257 : f32 to vector<8x1xf32>
    %413 = arith.mulf %411, %412 : vector<8x1xf32>
    %414 = vector.broadcast %413 : vector<8x1xf32> to vector<8x512xf32>
    %415 = arith.subf %405, %414 : vector<8x512xf32>
    %416 = arith.mulf %415, %415 : vector<8x512xf32>
    %cst_258 = arith.constant dense<0.000000e+00> : vector<8xf32>
    %417 = vector.multi_reduction <add>, %416, %cst_258 [1] : vector<8x512xf32> to vector<8xf32>
    %418 = vector.shape_cast %417 : vector<8xf32> to vector<8x1xf32>
    %cst_259 = arith.constant 0.001953125 : f32
    %419 = vector.broadcast %cst_259 : f32 to vector<8x1xf32>
    %420 = arith.mulf %418, %419 : vector<8x1xf32>
    %cst_260 = arith.constant 9.99999974E-6 : f32
    %421 = vector.broadcast %cst_260 : f32 to vector<8x1xf32>
    %422 = arith.addf %420, %421 : vector<8x1xf32>
    %423 = math.rsqrt %422 : vector<8x1xf32>
    %424 = vector.broadcast %423 : vector<8x1xf32> to vector<8x512xf32>
    %425 = arith.mulf %415, %424 : vector<8x512xf32>
    %426 = vector.broadcast %407 : vector<8x1xf32> to vector<8x512xf32>
    %427 = arith.mulf %425, %426 : vector<8x512xf32>
    %428 = vector.broadcast %409 : vector<8x1xf32> to vector<8x512xf32>
    %429 = arith.addf %427, %428 : vector<8x512xf32>
    %cst_261 = arith.constant 0.000000e+00 : f32
    %430 = vector.broadcast %cst_261 : f32 to vector<8x512xf32>
    %431 = arith.maximumf %429, %430 : vector<8x512xf32>
    %c17_i32_262 = arith.constant 17 : i32
    %432 = tpu.dynamic_rotate %431 by %c17_i32_262 dim 1 : vector<8x512xf32>, i32 -> vector<8x512xf32>
    %433 = arith.mulf %33, %41 : vector<1x512xf32>
    %434 = vector.broadcast %433 : vector<1x512xf32> to vector<8x512xf32>
    %435 = arith.mulf %432, %434 : vector<8x512xf32>
    %c0_263 = arith.constant 0 : index
    %c0_264 = arith.constant 0 : index
    %436 = vector.load %arg6[%c0_263, %c0_264] : memref<72x512xf32, #tpu.memory_space<vmem>>, vector<8x512xf32>
    tpu.vector_store %arg6[%c0_263, %c0_264], %435 {strides = array<i32>} : memref<72x512xf32, #tpu.memory_space<vmem>>, vector<8x512xf32>,
    %c16_i32_265 = arith.constant 16 : i32
    %437 = tpu.dynamic_rotate %431 by %c16_i32_265 dim 1 : vector<8x512xf32>, i32 -> vector<8x512xf32>
    %438 = vector.broadcast %33 : vector<1x512xf32> to vector<8x512xf32>
    %439 = arith.mulf %437, %438 : vector<8x512xf32>
    %c8_266 = arith.constant 8 : index
    %c0_267 = arith.constant 0 : index
    %440 = vector.load %arg6[%c8_266, %c0_267] : memref<72x512xf32, #tpu.memory_space<vmem>>, vector<8x512xf32>
    tpu.vector_store %arg6[%c8_266, %c0_267], %439 {strides = array<i32>} : memref<72x512xf32, #tpu.memory_space<vmem>>, vector<8x512xf32>,
    %c15_i32_268 = arith.constant 15 : i32
    %441 = tpu.dynamic_rotate %431 by %c15_i32_268 dim 1 : vector<8x512xf32>, i32 -> vector<8x512xf32>
    %442 = arith.mulf %33, %45 : vector<1x512xf32>
    %443 = vector.broadcast %442 : vector<1x512xf32> to vector<8x512xf32>
    %444 = arith.mulf %441, %443 : vector<8x512xf32>
    %c16_269 = arith.constant 16 : index
    %c0_270 = arith.constant 0 : index
    %445 = vector.load %arg6[%c16_269, %c0_270] : memref<72x512xf32, #tpu.memory_space<vmem>>, vector<8x512xf32>
    tpu.vector_store %arg6[%c16_269, %c0_270], %444 {strides = array<i32>} : memref<72x512xf32, #tpu.memory_space<vmem>>, vector<8x512xf32>,
    %c1_i32_271 = arith.constant 1 : i32
    %446 = tpu.dynamic_rotate %431 by %c1_i32_271 dim 1 : vector<8x512xf32>, i32 -> vector<8x512xf32>
    %447 = vector.broadcast %41 : vector<1x512xf32> to vector<8x512xf32>
    %448 = arith.mulf %446, %447 : vector<8x512xf32>
    %c24_272 = arith.constant 24 : index
    %c0_273 = arith.constant 0 : index
    %449 = vector.load %arg6[%c24_272, %c0_273] : memref<72x512xf32, #tpu.memory_space<vmem>>, vector<8x512xf32>
    tpu.vector_store %arg6[%c24_272, %c0_273], %448 {strides = array<i32>} : memref<72x512xf32, #tpu.memory_space<vmem>>, vector<8x512xf32>,
    %c32_274 = arith.constant 32 : index
    %c0_275 = arith.constant 0 : index
    %450 = vector.load %arg6[%c32_274, %c0_275] : memref<72x512xf32, #tpu.memory_space<vmem>>, vector<8x512xf32>
    tpu.vector_store %arg6[%c32_274, %c0_275], %431 {strides = array<i32>} : memref<72x512xf32, #tpu.memory_space<vmem>>, vector<8x512xf32>,
    %c511_i32_276 = arith.constant 511 : i32
    %451 = tpu.dynamic_rotate %431 by %c511_i32_276 dim 1 : vector<8x512xf32>, i32 -> vector<8x512xf32>
    %452 = vector.broadcast %45 : vector<1x512xf32> to vector<8x512xf32>
    %453 = arith.mulf %451, %452 : vector<8x512xf32>
    %c40_277 = arith.constant 40 : index
    %c0_278 = arith.constant 0 : index
    %454 = vector.load %arg6[%c40_277, %c0_278] : memref<72x512xf32, #tpu.memory_space<vmem>>, vector<8x512xf32>
    tpu.vector_store %arg6[%c40_277, %c0_278], %453 {strides = array<i32>} : memref<72x512xf32, #tpu.memory_space<vmem>>, vector<8x512xf32>,
    %c497_i32_279 = arith.constant 497 : i32
    %455 = tpu.dynamic_rotate %431 by %c497_i32_279 dim 1 : vector<8x512xf32>, i32 -> vector<8x512xf32>
    %456 = arith.mulf %37, %41 : vector<1x512xf32>
    %457 = vector.broadcast %456 : vector<1x512xf32> to vector<8x512xf32>
    %458 = arith.mulf %455, %457 : vector<8x512xf32>
    %c48_280 = arith.constant 48 : index
    %c0_281 = arith.constant 0 : index
    %459 = vector.load %arg6[%c48_280, %c0_281] : memref<72x512xf32, #tpu.memory_space<vmem>>, vector<8x512xf32>
    tpu.vector_store %arg6[%c48_280, %c0_281], %458 {strides = array<i32>} : memref<72x512xf32, #tpu.memory_space<vmem>>, vector<8x512xf32>,
    %c496_i32_282 = arith.constant 496 : i32
    %460 = tpu.dynamic_rotate %431 by %c496_i32_282 dim 1 : vector<8x512xf32>, i32 -> vector<8x512xf32>
    %461 = vector.broadcast %37 : vector<1x512xf32> to vector<8x512xf32>
    %462 = arith.mulf %460, %461 : vector<8x512xf32>
    %c56_283 = arith.constant 56 : index
    %c0_284 = arith.constant 0 : index
    %463 = vector.load %arg6[%c56_283, %c0_284] : memref<72x512xf32, #tpu.memory_space<vmem>>, vector<8x512xf32>
    tpu.vector_store %arg6[%c56_283, %c0_284], %462 {strides = array<i32>} : memref<72x512xf32, #tpu.memory_space<vmem>>, vector<8x512xf32>,
    %c495_i32_285 = arith.constant 495 : i32
    %464 = tpu.dynamic_rotate %431 by %c495_i32_285 dim 1 : vector<8x512xf32>, i32 -> vector<8x512xf32>
    %465 = arith.mulf %37, %45 : vector<1x512xf32>
    %466 = vector.broadcast %465 : vector<1x512xf32> to vector<8x512xf32>
    %467 = arith.mulf %464, %466 : vector<8x512xf32>
    %c64_286 = arith.constant 64 : index
    %c0_287 = arith.constant 0 : index
    %468 = vector.load %arg6[%c64_286, %c0_287] : memref<72x512xf32, #tpu.memory_space<vmem>>, vector<8x512xf32>
    tpu.vector_store %arg6[%c64_286, %c0_287], %467 {strides = array<i32>} : memref<72x512xf32, #tpu.memory_space<vmem>>, vector<8x512xf32>,
    %c6 = arith.constant 6 : index
    %c0_288 = arith.constant 0 : index
    %c0_289 = arith.constant 0 : index
    %469 = vector.load %arg3[%c6, %c0_288, %c0_289] : memref<10x8x72xbf16, #tpu.memory_space<vmem>>, vector<1x8x72xbf16>
    %470 = vector.shape_cast %469 : vector<1x8x72xbf16> to vector<8x72xbf16>
    %c0_290 = arith.constant 0 : index
    %c0_291 = arith.constant 0 : index
    %471 = vector.load %arg6[%c0_290, %c0_291] : memref<72x512xf32, #tpu.memory_space<vmem>>, vector<72x512xf32>
    %472 = arith.truncf %471 : vector<72x512xf32> to vector<72x512xbf16>
    %cst_292 = arith.constant dense<0.000000e+00> : vector<8x512xf32>
    %473 = tpu.matmul %470, %472, %cst_292 {dimension_numbers = #tpu.dot_dimension_numbers<[1], [0], [0], [1], [0, 0, 1, 1], [], []>} : vector<8x72xbf16>, vector<72x512xbf16>, vector<8x512xf32> -> vector<8x512xf32>
    %c5_293 = arith.constant 5 : index
    %c0_294 = arith.constant 0 : index
    %c0_295 = arith.constant 0 : index
    %c0_296 = arith.constant 0 : index
    %474 = vector.load %arg4[%c5_293, %c0_294, %c0_295, %c0_296] : memref<9x2x8x1xf32, #tpu.memory_space<vmem>>, vector<1x1x8x1xf32>
    %475 = vector.shape_cast %474 : vector<1x1x8x1xf32> to vector<8x1xf32>
    %c5_297 = arith.constant 5 : index
    %c1_298 = arith.constant 1 : index
    %c0_299 = arith.constant 0 : index
    %c0_300 = arith.constant 0 : index
    %476 = vector.load %arg4[%c5_297, %c1_298, %c0_299, %c0_300] : memref<9x2x8x1xf32, #tpu.memory_space<vmem>>, vector<1x1x8x1xf32>
    %477 = vector.shape_cast %476 : vector<1x1x8x1xf32> to vector<8x1xf32>
    %cst_301 = arith.constant dense<0.000000e+00> : vector<8xf32>
    %478 = vector.multi_reduction <add>, %473, %cst_301 [1] : vector<8x512xf32> to vector<8xf32>
    %479 = vector.shape_cast %478 : vector<8xf32> to vector<8x1xf32>
    %cst_302 = arith.constant 0.001953125 : f32
    %480 = vector.broadcast %cst_302 : f32 to vector<8x1xf32>
    %481 = arith.mulf %479, %480 : vector<8x1xf32>
    %482 = vector.broadcast %481 : vector<8x1xf32> to vector<8x512xf32>
    %483 = arith.subf %473, %482 : vector<8x512xf32>
    %484 = arith.mulf %483, %483 : vector<8x512xf32>
    %cst_303 = arith.constant dense<0.000000e+00> : vector<8xf32>
    %485 = vector.multi_reduction <add>, %484, %cst_303 [1] : vector<8x512xf32> to vector<8xf32>
    %486 = vector.shape_cast %485 : vector<8xf32> to vector<8x1xf32>
    %cst_304 = arith.constant 0.001953125 : f32
    %487 = vector.broadcast %cst_304 : f32 to vector<8x1xf32>
    %488 = arith.mulf %486, %487 : vector<8x1xf32>
    %cst_305 = arith.constant 9.99999974E-6 : f32
    %489 = vector.broadcast %cst_305 : f32 to vector<8x1xf32>
    %490 = arith.addf %488, %489 : vector<8x1xf32>
    %491 = math.rsqrt %490 : vector<8x1xf32>
    %492 = vector.broadcast %491 : vector<8x1xf32> to vector<8x512xf32>
    %493 = arith.mulf %483, %492 : vector<8x512xf32>
    %494 = vector.broadcast %475 : vector<8x1xf32> to vector<8x512xf32>
    %495 = arith.mulf %493, %494 : vector<8x512xf32>
    %496 = vector.broadcast %477 : vector<8x1xf32> to vector<8x512xf32>
    %497 = arith.addf %495, %496 : vector<8x512xf32>
    %cst_306 = arith.constant 0.000000e+00 : f32
    %498 = vector.broadcast %cst_306 : f32 to vector<8x512xf32>
    %499 = arith.maximumf %497, %498 : vector<8x512xf32>
    %c17_i32_307 = arith.constant 17 : i32
    %500 = tpu.dynamic_rotate %499 by %c17_i32_307 dim 1 : vector<8x512xf32>, i32 -> vector<8x512xf32>
    %501 = arith.mulf %33, %41 : vector<1x512xf32>
    %502 = vector.broadcast %501 : vector<1x512xf32> to vector<8x512xf32>
    %503 = arith.mulf %500, %502 : vector<8x512xf32>
    %c0_308 = arith.constant 0 : index
    %c0_309 = arith.constant 0 : index
    %504 = vector.load %arg6[%c0_308, %c0_309] : memref<72x512xf32, #tpu.memory_space<vmem>>, vector<8x512xf32>
    tpu.vector_store %arg6[%c0_308, %c0_309], %503 {strides = array<i32>} : memref<72x512xf32, #tpu.memory_space<vmem>>, vector<8x512xf32>,
    %c16_i32_310 = arith.constant 16 : i32
    %505 = tpu.dynamic_rotate %499 by %c16_i32_310 dim 1 : vector<8x512xf32>, i32 -> vector<8x512xf32>
    %506 = vector.broadcast %33 : vector<1x512xf32> to vector<8x512xf32>
    %507 = arith.mulf %505, %506 : vector<8x512xf32>
    %c8_311 = arith.constant 8 : index
    %c0_312 = arith.constant 0 : index
    %508 = vector.load %arg6[%c8_311, %c0_312] : memref<72x512xf32, #tpu.memory_space<vmem>>, vector<8x512xf32>
    tpu.vector_store %arg6[%c8_311, %c0_312], %507 {strides = array<i32>} : memref<72x512xf32, #tpu.memory_space<vmem>>, vector<8x512xf32>,
    %c15_i32_313 = arith.constant 15 : i32
    %509 = tpu.dynamic_rotate %499 by %c15_i32_313 dim 1 : vector<8x512xf32>, i32 -> vector<8x512xf32>
    %510 = arith.mulf %33, %45 : vector<1x512xf32>
    %511 = vector.broadcast %510 : vector<1x512xf32> to vector<8x512xf32>
    %512 = arith.mulf %509, %511 : vector<8x512xf32>
    %c16_314 = arith.constant 16 : index
    %c0_315 = arith.constant 0 : index
    %513 = vector.load %arg6[%c16_314, %c0_315] : memref<72x512xf32, #tpu.memory_space<vmem>>, vector<8x512xf32>
    tpu.vector_store %arg6[%c16_314, %c0_315], %512 {strides = array<i32>} : memref<72x512xf32, #tpu.memory_space<vmem>>, vector<8x512xf32>,
    %c1_i32_316 = arith.constant 1 : i32
    %514 = tpu.dynamic_rotate %499 by %c1_i32_316 dim 1 : vector<8x512xf32>, i32 -> vector<8x512xf32>
    %515 = vector.broadcast %41 : vector<1x512xf32> to vector<8x512xf32>
    %516 = arith.mulf %514, %515 : vector<8x512xf32>
    %c24_317 = arith.constant 24 : index
    %c0_318 = arith.constant 0 : index
    %517 = vector.load %arg6[%c24_317, %c0_318] : memref<72x512xf32, #tpu.memory_space<vmem>>, vector<8x512xf32>
    tpu.vector_store %arg6[%c24_317, %c0_318], %516 {strides = array<i32>} : memref<72x512xf32, #tpu.memory_space<vmem>>, vector<8x512xf32>,
    %c32_319 = arith.constant 32 : index
    %c0_320 = arith.constant 0 : index
    %518 = vector.load %arg6[%c32_319, %c0_320] : memref<72x512xf32, #tpu.memory_space<vmem>>, vector<8x512xf32>
    tpu.vector_store %arg6[%c32_319, %c0_320], %499 {strides = array<i32>} : memref<72x512xf32, #tpu.memory_space<vmem>>, vector<8x512xf32>,
    %c511_i32_321 = arith.constant 511 : i32
    %519 = tpu.dynamic_rotate %499 by %c511_i32_321 dim 1 : vector<8x512xf32>, i32 -> vector<8x512xf32>
    %520 = vector.broadcast %45 : vector<1x512xf32> to vector<8x512xf32>
    %521 = arith.mulf %519, %520 : vector<8x512xf32>
    %c40_322 = arith.constant 40 : index
    %c0_323 = arith.constant 0 : index
    %522 = vector.load %arg6[%c40_322, %c0_323] : memref<72x512xf32, #tpu.memory_space<vmem>>, vector<8x512xf32>
    tpu.vector_store %arg6[%c40_322, %c0_323], %521 {strides = array<i32>} : memref<72x512xf32, #tpu.memory_space<vmem>>, vector<8x512xf32>,
    %c497_i32_324 = arith.constant 497 : i32
    %523 = tpu.dynamic_rotate %499 by %c497_i32_324 dim 1 : vector<8x512xf32>, i32 -> vector<8x512xf32>
    %524 = arith.mulf %37, %41 : vector<1x512xf32>
    %525 = vector.broadcast %524 : vector<1x512xf32> to vector<8x512xf32>
    %526 = arith.mulf %523, %525 : vector<8x512xf32>
    %c48_325 = arith.constant 48 : index
    %c0_326 = arith.constant 0 : index
    %527 = vector.load %arg6[%c48_325, %c0_326] : memref<72x512xf32, #tpu.memory_space<vmem>>, vector<8x512xf32>
    tpu.vector_store %arg6[%c48_325, %c0_326], %526 {strides = array<i32>} : memref<72x512xf32, #tpu.memory_space<vmem>>, vector<8x512xf32>,
    %c496_i32_327 = arith.constant 496 : i32
    %528 = tpu.dynamic_rotate %499 by %c496_i32_327 dim 1 : vector<8x512xf32>, i32 -> vector<8x512xf32>
    %529 = vector.broadcast %37 : vector<1x512xf32> to vector<8x512xf32>
    %530 = arith.mulf %528, %529 : vector<8x512xf32>
    %c56_328 = arith.constant 56 : index
    %c0_329 = arith.constant 0 : index
    %531 = vector.load %arg6[%c56_328, %c0_329] : memref<72x512xf32, #tpu.memory_space<vmem>>, vector<8x512xf32>
    tpu.vector_store %arg6[%c56_328, %c0_329], %530 {strides = array<i32>} : memref<72x512xf32, #tpu.memory_space<vmem>>, vector<8x512xf32>,
    %c495_i32_330 = arith.constant 495 : i32
    %532 = tpu.dynamic_rotate %499 by %c495_i32_330 dim 1 : vector<8x512xf32>, i32 -> vector<8x512xf32>
    %533 = arith.mulf %37, %45 : vector<1x512xf32>
    %534 = vector.broadcast %533 : vector<1x512xf32> to vector<8x512xf32>
    %535 = arith.mulf %532, %534 : vector<8x512xf32>
    %c64_331 = arith.constant 64 : index
    %c0_332 = arith.constant 0 : index
    %536 = vector.load %arg6[%c64_331, %c0_332] : memref<72x512xf32, #tpu.memory_space<vmem>>, vector<8x512xf32>
    tpu.vector_store %arg6[%c64_331, %c0_332], %535 {strides = array<i32>} : memref<72x512xf32, #tpu.memory_space<vmem>>, vector<8x512xf32>,
    %c7 = arith.constant 7 : index
    %c0_333 = arith.constant 0 : index
    %c0_334 = arith.constant 0 : index
    %537 = vector.load %arg3[%c7, %c0_333, %c0_334] : memref<10x8x72xbf16, #tpu.memory_space<vmem>>, vector<1x8x72xbf16>
    %538 = vector.shape_cast %537 : vector<1x8x72xbf16> to vector<8x72xbf16>
    %c0_335 = arith.constant 0 : index
    %c0_336 = arith.constant 0 : index
    %539 = vector.load %arg6[%c0_335, %c0_336] : memref<72x512xf32, #tpu.memory_space<vmem>>, vector<72x512xf32>
    %540 = arith.truncf %539 : vector<72x512xf32> to vector<72x512xbf16>
    %cst_337 = arith.constant dense<0.000000e+00> : vector<8x512xf32>
    %541 = tpu.matmul %538, %540, %cst_337 {dimension_numbers = #tpu.dot_dimension_numbers<[1], [0], [0], [1], [0, 0, 1, 1], [], []>} : vector<8x72xbf16>, vector<72x512xbf16>, vector<8x512xf32> -> vector<8x512xf32>
    %c6_338 = arith.constant 6 : index
    %c0_339 = arith.constant 0 : index
    %c0_340 = arith.constant 0 : index
    %c0_341 = arith.constant 0 : index
    %542 = vector.load %arg4[%c6_338, %c0_339, %c0_340, %c0_341] : memref<9x2x8x1xf32, #tpu.memory_space<vmem>>, vector<1x1x8x1xf32>
    %543 = vector.shape_cast %542 : vector<1x1x8x1xf32> to vector<8x1xf32>
    %c6_342 = arith.constant 6 : index
    %c1_343 = arith.constant 1 : index
    %c0_344 = arith.constant 0 : index
    %c0_345 = arith.constant 0 : index
    %544 = vector.load %arg4[%c6_342, %c1_343, %c0_344, %c0_345] : memref<9x2x8x1xf32, #tpu.memory_space<vmem>>, vector<1x1x8x1xf32>
    %545 = vector.shape_cast %544 : vector<1x1x8x1xf32> to vector<8x1xf32>
    %cst_346 = arith.constant dense<0.000000e+00> : vector<8xf32>
    %546 = vector.multi_reduction <add>, %541, %cst_346 [1] : vector<8x512xf32> to vector<8xf32>
    %547 = vector.shape_cast %546 : vector<8xf32> to vector<8x1xf32>
    %cst_347 = arith.constant 0.001953125 : f32
    %548 = vector.broadcast %cst_347 : f32 to vector<8x1xf32>
    %549 = arith.mulf %547, %548 : vector<8x1xf32>
    %550 = vector.broadcast %549 : vector<8x1xf32> to vector<8x512xf32>
    %551 = arith.subf %541, %550 : vector<8x512xf32>
    %552 = arith.mulf %551, %551 : vector<8x512xf32>
    %cst_348 = arith.constant dense<0.000000e+00> : vector<8xf32>
    %553 = vector.multi_reduction <add>, %552, %cst_348 [1] : vector<8x512xf32> to vector<8xf32>
    %554 = vector.shape_cast %553 : vector<8xf32> to vector<8x1xf32>
    %cst_349 = arith.constant 0.001953125 : f32
    %555 = vector.broadcast %cst_349 : f32 to vector<8x1xf32>
    %556 = arith.mulf %554, %555 : vector<8x1xf32>
    %cst_350 = arith.constant 9.99999974E-6 : f32
    %557 = vector.broadcast %cst_350 : f32 to vector<8x1xf32>
    %558 = arith.addf %556, %557 : vector<8x1xf32>
    %559 = math.rsqrt %558 : vector<8x1xf32>
    %560 = vector.broadcast %559 : vector<8x1xf32> to vector<8x512xf32>
    %561 = arith.mulf %551, %560 : vector<8x512xf32>
    %562 = vector.broadcast %543 : vector<8x1xf32> to vector<8x512xf32>
    %563 = arith.mulf %561, %562 : vector<8x512xf32>
    %564 = vector.broadcast %545 : vector<8x1xf32> to vector<8x512xf32>
    %565 = arith.addf %563, %564 : vector<8x512xf32>
    %566 = arith.addf %565, %431 : vector<8x512xf32>
    %cst_351 = arith.constant 0.000000e+00 : f32
    %567 = vector.broadcast %cst_351 : f32 to vector<8x512xf32>
    %568 = arith.maximumf %566, %567 : vector<8x512xf32>
    %c17_i32_352 = arith.constant 17 : i32
    %569 = tpu.dynamic_rotate %568 by %c17_i32_352 dim 1 : vector<8x512xf32>, i32 -> vector<8x512xf32>
    %570 = arith.mulf %33, %41 : vector<1x512xf32>
    %571 = vector.broadcast %570 : vector<1x512xf32> to vector<8x512xf32>
    %572 = arith.mulf %569, %571 : vector<8x512xf32>
    %c0_353 = arith.constant 0 : index
    %c0_354 = arith.constant 0 : index
    %573 = vector.load %arg6[%c0_353, %c0_354] : memref<72x512xf32, #tpu.memory_space<vmem>>, vector<8x512xf32>
    tpu.vector_store %arg6[%c0_353, %c0_354], %572 {strides = array<i32>} : memref<72x512xf32, #tpu.memory_space<vmem>>, vector<8x512xf32>,
    %c16_i32_355 = arith.constant 16 : i32
    %574 = tpu.dynamic_rotate %568 by %c16_i32_355 dim 1 : vector<8x512xf32>, i32 -> vector<8x512xf32>
    %575 = vector.broadcast %33 : vector<1x512xf32> to vector<8x512xf32>
    %576 = arith.mulf %574, %575 : vector<8x512xf32>
    %c8_356 = arith.constant 8 : index
    %c0_357 = arith.constant 0 : index
    %577 = vector.load %arg6[%c8_356, %c0_357] : memref<72x512xf32, #tpu.memory_space<vmem>>, vector<8x512xf32>
    tpu.vector_store %arg6[%c8_356, %c0_357], %576 {strides = array<i32>} : memref<72x512xf32, #tpu.memory_space<vmem>>, vector<8x512xf32>,
    %c15_i32_358 = arith.constant 15 : i32
    %578 = tpu.dynamic_rotate %568 by %c15_i32_358 dim 1 : vector<8x512xf32>, i32 -> vector<8x512xf32>
    %579 = arith.mulf %33, %45 : vector<1x512xf32>
    %580 = vector.broadcast %579 : vector<1x512xf32> to vector<8x512xf32>
    %581 = arith.mulf %578, %580 : vector<8x512xf32>
    %c16_359 = arith.constant 16 : index
    %c0_360 = arith.constant 0 : index
    %582 = vector.load %arg6[%c16_359, %c0_360] : memref<72x512xf32, #tpu.memory_space<vmem>>, vector<8x512xf32>
    tpu.vector_store %arg6[%c16_359, %c0_360], %581 {strides = array<i32>} : memref<72x512xf32, #tpu.memory_space<vmem>>, vector<8x512xf32>,
    %c1_i32_361 = arith.constant 1 : i32
    %583 = tpu.dynamic_rotate %568 by %c1_i32_361 dim 1 : vector<8x512xf32>, i32 -> vector<8x512xf32>
    %584 = vector.broadcast %41 : vector<1x512xf32> to vector<8x512xf32>
    %585 = arith.mulf %583, %584 : vector<8x512xf32>
    %c24_362 = arith.constant 24 : index
    %c0_363 = arith.constant 0 : index
    %586 = vector.load %arg6[%c24_362, %c0_363] : memref<72x512xf32, #tpu.memory_space<vmem>>, vector<8x512xf32>
    tpu.vector_store %arg6[%c24_362, %c0_363], %585 {strides = array<i32>} : memref<72x512xf32, #tpu.memory_space<vmem>>, vector<8x512xf32>,
    %c32_364 = arith.constant 32 : index
    %c0_365 = arith.constant 0 : index
    %587 = vector.load %arg6[%c32_364, %c0_365] : memref<72x512xf32, #tpu.memory_space<vmem>>, vector<8x512xf32>
    tpu.vector_store %arg6[%c32_364, %c0_365], %568 {strides = array<i32>} : memref<72x512xf32, #tpu.memory_space<vmem>>, vector<8x512xf32>,
    %c511_i32_366 = arith.constant 511 : i32
    %588 = tpu.dynamic_rotate %568 by %c511_i32_366 dim 1 : vector<8x512xf32>, i32 -> vector<8x512xf32>
    %589 = vector.broadcast %45 : vector<1x512xf32> to vector<8x512xf32>
    %590 = arith.mulf %588, %589 : vector<8x512xf32>
    %c40_367 = arith.constant 40 : index
    %c0_368 = arith.constant 0 : index
    %591 = vector.load %arg6[%c40_367, %c0_368] : memref<72x512xf32, #tpu.memory_space<vmem>>, vector<8x512xf32>
    tpu.vector_store %arg6[%c40_367, %c0_368], %590 {strides = array<i32>} : memref<72x512xf32, #tpu.memory_space<vmem>>, vector<8x512xf32>,
    %c497_i32_369 = arith.constant 497 : i32
    %592 = tpu.dynamic_rotate %568 by %c497_i32_369 dim 1 : vector<8x512xf32>, i32 -> vector<8x512xf32>
    %593 = arith.mulf %37, %41 : vector<1x512xf32>
    %594 = vector.broadcast %593 : vector<1x512xf32> to vector<8x512xf32>
    %595 = arith.mulf %592, %594 : vector<8x512xf32>
    %c48_370 = arith.constant 48 : index
    %c0_371 = arith.constant 0 : index
    %596 = vector.load %arg6[%c48_370, %c0_371] : memref<72x512xf32, #tpu.memory_space<vmem>>, vector<8x512xf32>
    tpu.vector_store %arg6[%c48_370, %c0_371], %595 {strides = array<i32>} : memref<72x512xf32, #tpu.memory_space<vmem>>, vector<8x512xf32>,
    %c496_i32_372 = arith.constant 496 : i32
    %597 = tpu.dynamic_rotate %568 by %c496_i32_372 dim 1 : vector<8x512xf32>, i32 -> vector<8x512xf32>
    %598 = vector.broadcast %37 : vector<1x512xf32> to vector<8x512xf32>
    %599 = arith.mulf %597, %598 : vector<8x512xf32>
    %c56_373 = arith.constant 56 : index
    %c0_374 = arith.constant 0 : index
    %600 = vector.load %arg6[%c56_373, %c0_374] : memref<72x512xf32, #tpu.memory_space<vmem>>, vector<8x512xf32>
    tpu.vector_store %arg6[%c56_373, %c0_374], %599 {strides = array<i32>} : memref<72x512xf32, #tpu.memory_space<vmem>>, vector<8x512xf32>,
    %c495_i32_375 = arith.constant 495 : i32
    %601 = tpu.dynamic_rotate %568 by %c495_i32_375 dim 1 : vector<8x512xf32>, i32 -> vector<8x512xf32>
    %602 = arith.mulf %37, %45 : vector<1x512xf32>
    %603 = vector.broadcast %602 : vector<1x512xf32> to vector<8x512xf32>
    %604 = arith.mulf %601, %603 : vector<8x512xf32>
    %c64_376 = arith.constant 64 : index
    %c0_377 = arith.constant 0 : index
    %605 = vector.load %arg6[%c64_376, %c0_377] : memref<72x512xf32, #tpu.memory_space<vmem>>, vector<8x512xf32>
    tpu.vector_store %arg6[%c64_376, %c0_377], %604 {strides = array<i32>} : memref<72x512xf32, #tpu.memory_space<vmem>>, vector<8x512xf32>,
    %c8_378 = arith.constant 8 : index
    %c0_379 = arith.constant 0 : index
    %c0_380 = arith.constant 0 : index
    %606 = vector.load %arg3[%c8_378, %c0_379, %c0_380] : memref<10x8x72xbf16, #tpu.memory_space<vmem>>, vector<1x8x72xbf16>
    %607 = vector.shape_cast %606 : vector<1x8x72xbf16> to vector<8x72xbf16>
    %c0_381 = arith.constant 0 : index
    %c0_382 = arith.constant 0 : index
    %608 = vector.load %arg6[%c0_381, %c0_382] : memref<72x512xf32, #tpu.memory_space<vmem>>, vector<72x512xf32>
    %609 = arith.truncf %608 : vector<72x512xf32> to vector<72x512xbf16>
    %cst_383 = arith.constant dense<0.000000e+00> : vector<8x512xf32>
    %610 = tpu.matmul %607, %609, %cst_383 {dimension_numbers = #tpu.dot_dimension_numbers<[1], [0], [0], [1], [0, 0, 1, 1], [], []>} : vector<8x72xbf16>, vector<72x512xbf16>, vector<8x512xf32> -> vector<8x512xf32>
    %c7_384 = arith.constant 7 : index
    %c0_385 = arith.constant 0 : index
    %c0_386 = arith.constant 0 : index
    %c0_387 = arith.constant 0 : index
    %611 = vector.load %arg4[%c7_384, %c0_385, %c0_386, %c0_387] : memref<9x2x8x1xf32, #tpu.memory_space<vmem>>, vector<1x1x8x1xf32>
    %612 = vector.shape_cast %611 : vector<1x1x8x1xf32> to vector<8x1xf32>
    %c7_388 = arith.constant 7 : index
    %c1_389 = arith.constant 1 : index
    %c0_390 = arith.constant 0 : index
    %c0_391 = arith.constant 0 : index
    %613 = vector.load %arg4[%c7_388, %c1_389, %c0_390, %c0_391] : memref<9x2x8x1xf32, #tpu.memory_space<vmem>>, vector<1x1x8x1xf32>
    %614 = vector.shape_cast %613 : vector<1x1x8x1xf32> to vector<8x1xf32>
    %cst_392 = arith.constant dense<0.000000e+00> : vector<8xf32>
    %615 = vector.multi_reduction <add>, %610, %cst_392 [1] : vector<8x512xf32> to vector<8xf32>
    %616 = vector.shape_cast %615 : vector<8xf32> to vector<8x1xf32>
    %cst_393 = arith.constant 0.001953125 : f32
    %617 = vector.broadcast %cst_393 : f32 to vector<8x1xf32>
    %618 = arith.mulf %616, %617 : vector<8x1xf32>
    %619 = vector.broadcast %618 : vector<8x1xf32> to vector<8x512xf32>
    %620 = arith.subf %610, %619 : vector<8x512xf32>
    %621 = arith.mulf %620, %620 : vector<8x512xf32>
    %cst_394 = arith.constant dense<0.000000e+00> : vector<8xf32>
    %622 = vector.multi_reduction <add>, %621, %cst_394 [1] : vector<8x512xf32> to vector<8xf32>
    %623 = vector.shape_cast %622 : vector<8xf32> to vector<8x1xf32>
    %cst_395 = arith.constant 0.001953125 : f32
    %624 = vector.broadcast %cst_395 : f32 to vector<8x1xf32>
    %625 = arith.mulf %623, %624 : vector<8x1xf32>
    %cst_396 = arith.constant 9.99999974E-6 : f32
    %626 = vector.broadcast %cst_396 : f32 to vector<8x1xf32>
    %627 = arith.addf %625, %626 : vector<8x1xf32>
    %628 = math.rsqrt %627 : vector<8x1xf32>
    %629 = vector.broadcast %628 : vector<8x1xf32> to vector<8x512xf32>
    %630 = arith.mulf %620, %629 : vector<8x512xf32>
    %631 = vector.broadcast %612 : vector<8x1xf32> to vector<8x512xf32>
    %632 = arith.mulf %630, %631 : vector<8x512xf32>
    %633 = vector.broadcast %614 : vector<8x1xf32> to vector<8x512xf32>
    %634 = arith.addf %632, %633 : vector<8x512xf32>
    %cst_397 = arith.constant 0.000000e+00 : f32
    %635 = vector.broadcast %cst_397 : f32 to vector<8x512xf32>
    %636 = arith.maximumf %634, %635 : vector<8x512xf32>
    %c17_i32_398 = arith.constant 17 : i32
    %637 = tpu.dynamic_rotate %636 by %c17_i32_398 dim 1 : vector<8x512xf32>, i32 -> vector<8x512xf32>
    %638 = arith.mulf %33, %41 : vector<1x512xf32>
    %639 = vector.broadcast %638 : vector<1x512xf32> to vector<8x512xf32>
    %640 = arith.mulf %637, %639 : vector<8x512xf32>
    %c0_399 = arith.constant 0 : index
    %c0_400 = arith.constant 0 : index
    %641 = vector.load %arg6[%c0_399, %c0_400] : memref<72x512xf32, #tpu.memory_space<vmem>>, vector<8x512xf32>
    tpu.vector_store %arg6[%c0_399, %c0_400], %640 {strides = array<i32>} : memref<72x512xf32, #tpu.memory_space<vmem>>, vector<8x512xf32>,
    %c16_i32_401 = arith.constant 16 : i32
    %642 = tpu.dynamic_rotate %636 by %c16_i32_401 dim 1 : vector<8x512xf32>, i32 -> vector<8x512xf32>
    %643 = vector.broadcast %33 : vector<1x512xf32> to vector<8x512xf32>
    %644 = arith.mulf %642, %643 : vector<8x512xf32>
    %c8_402 = arith.constant 8 : index
    %c0_403 = arith.constant 0 : index
    %645 = vector.load %arg6[%c8_402, %c0_403] : memref<72x512xf32, #tpu.memory_space<vmem>>, vector<8x512xf32>
    tpu.vector_store %arg6[%c8_402, %c0_403], %644 {strides = array<i32>} : memref<72x512xf32, #tpu.memory_space<vmem>>, vector<8x512xf32>,
    %c15_i32_404 = arith.constant 15 : i32
    %646 = tpu.dynamic_rotate %636 by %c15_i32_404 dim 1 : vector<8x512xf32>, i32 -> vector<8x512xf32>
    %647 = arith.mulf %33, %45 : vector<1x512xf32>
    %648 = vector.broadcast %647 : vector<1x512xf32> to vector<8x512xf32>
    %649 = arith.mulf %646, %648 : vector<8x512xf32>
    %c16_405 = arith.constant 16 : index
    %c0_406 = arith.constant 0 : index
    %650 = vector.load %arg6[%c16_405, %c0_406] : memref<72x512xf32, #tpu.memory_space<vmem>>, vector<8x512xf32>
    tpu.vector_store %arg6[%c16_405, %c0_406], %649 {strides = array<i32>} : memref<72x512xf32, #tpu.memory_space<vmem>>, vector<8x512xf32>,
    %c1_i32_407 = arith.constant 1 : i32
    %651 = tpu.dynamic_rotate %636 by %c1_i32_407 dim 1 : vector<8x512xf32>, i32 -> vector<8x512xf32>
    %652 = vector.broadcast %41 : vector<1x512xf32> to vector<8x512xf32>
    %653 = arith.mulf %651, %652 : vector<8x512xf32>
    %c24_408 = arith.constant 24 : index
    %c0_409 = arith.constant 0 : index
    %654 = vector.load %arg6[%c24_408, %c0_409] : memref<72x512xf32, #tpu.memory_space<vmem>>, vector<8x512xf32>
    tpu.vector_store %arg6[%c24_408, %c0_409], %653 {strides = array<i32>} : memref<72x512xf32, #tpu.memory_space<vmem>>, vector<8x512xf32>,
    %c32_410 = arith.constant 32 : index
    %c0_411 = arith.constant 0 : index
    %655 = vector.load %arg6[%c32_410, %c0_411] : memref<72x512xf32, #tpu.memory_space<vmem>>, vector<8x512xf32>
    tpu.vector_store %arg6[%c32_410, %c0_411], %636 {strides = array<i32>} : memref<72x512xf32, #tpu.memory_space<vmem>>, vector<8x512xf32>,
    %c511_i32_412 = arith.constant 511 : i32
    %656 = tpu.dynamic_rotate %636 by %c511_i32_412 dim 1 : vector<8x512xf32>, i32 -> vector<8x512xf32>
    %657 = vector.broadcast %45 : vector<1x512xf32> to vector<8x512xf32>
    %658 = arith.mulf %656, %657 : vector<8x512xf32>
    %c40_413 = arith.constant 40 : index
    %c0_414 = arith.constant 0 : index
    %659 = vector.load %arg6[%c40_413, %c0_414] : memref<72x512xf32, #tpu.memory_space<vmem>>, vector<8x512xf32>
    tpu.vector_store %arg6[%c40_413, %c0_414], %658 {strides = array<i32>} : memref<72x512xf32, #tpu.memory_space<vmem>>, vector<8x512xf32>,
    %c497_i32_415 = arith.constant 497 : i32
    %660 = tpu.dynamic_rotate %636 by %c497_i32_415 dim 1 : vector<8x512xf32>, i32 -> vector<8x512xf32>
    %661 = arith.mulf %37, %41 : vector<1x512xf32>
    %662 = vector.broadcast %661 : vector<1x512xf32> to vector<8x512xf32>
    %663 = arith.mulf %660, %662 : vector<8x512xf32>
    %c48_416 = arith.constant 48 : index
    %c0_417 = arith.constant 0 : index
    %664 = vector.load %arg6[%c48_416, %c0_417] : memref<72x512xf32, #tpu.memory_space<vmem>>, vector<8x512xf32>
    tpu.vector_store %arg6[%c48_416, %c0_417], %663 {strides = array<i32>} : memref<72x512xf32, #tpu.memory_space<vmem>>, vector<8x512xf32>,
    %c496_i32_418 = arith.constant 496 : i32
    %665 = tpu.dynamic_rotate %636 by %c496_i32_418 dim 1 : vector<8x512xf32>, i32 -> vector<8x512xf32>
    %666 = vector.broadcast %37 : vector<1x512xf32> to vector<8x512xf32>
    %667 = arith.mulf %665, %666 : vector<8x512xf32>
    %c56_419 = arith.constant 56 : index
    %c0_420 = arith.constant 0 : index
    %668 = vector.load %arg6[%c56_419, %c0_420] : memref<72x512xf32, #tpu.memory_space<vmem>>, vector<8x512xf32>
    tpu.vector_store %arg6[%c56_419, %c0_420], %667 {strides = array<i32>} : memref<72x512xf32, #tpu.memory_space<vmem>>, vector<8x512xf32>,
    %c495_i32_421 = arith.constant 495 : i32
    %669 = tpu.dynamic_rotate %636 by %c495_i32_421 dim 1 : vector<8x512xf32>, i32 -> vector<8x512xf32>
    %670 = arith.mulf %37, %45 : vector<1x512xf32>
    %671 = vector.broadcast %670 : vector<1x512xf32> to vector<8x512xf32>
    %672 = arith.mulf %669, %671 : vector<8x512xf32>
    %c64_422 = arith.constant 64 : index
    %c0_423 = arith.constant 0 : index
    %673 = vector.load %arg6[%c64_422, %c0_423] : memref<72x512xf32, #tpu.memory_space<vmem>>, vector<8x512xf32>
    tpu.vector_store %arg6[%c64_422, %c0_423], %672 {strides = array<i32>} : memref<72x512xf32, #tpu.memory_space<vmem>>, vector<8x512xf32>,
    %c9 = arith.constant 9 : index
    %c0_424 = arith.constant 0 : index
    %c0_425 = arith.constant 0 : index
    %674 = vector.load %arg3[%c9, %c0_424, %c0_425] : memref<10x8x72xbf16, #tpu.memory_space<vmem>>, vector<1x8x72xbf16>
    %675 = vector.shape_cast %674 : vector<1x8x72xbf16> to vector<8x72xbf16>
    %c0_426 = arith.constant 0 : index
    %c0_427 = arith.constant 0 : index
    %676 = vector.load %arg6[%c0_426, %c0_427] : memref<72x512xf32, #tpu.memory_space<vmem>>, vector<72x512xf32>
    %677 = arith.truncf %676 : vector<72x512xf32> to vector<72x512xbf16>
    %cst_428 = arith.constant dense<0.000000e+00> : vector<8x512xf32>
    %678 = tpu.matmul %675, %677, %cst_428 {dimension_numbers = #tpu.dot_dimension_numbers<[1], [0], [0], [1], [0, 0, 1, 1], [], []>} : vector<8x72xbf16>, vector<72x512xbf16>, vector<8x512xf32> -> vector<8x512xf32>
    %c8_429 = arith.constant 8 : index
    %c0_430 = arith.constant 0 : index
    %c0_431 = arith.constant 0 : index
    %c0_432 = arith.constant 0 : index
    %679 = vector.load %arg4[%c8_429, %c0_430, %c0_431, %c0_432] : memref<9x2x8x1xf32, #tpu.memory_space<vmem>>, vector<1x1x8x1xf32>
    %680 = vector.shape_cast %679 : vector<1x1x8x1xf32> to vector<8x1xf32>
    %c8_433 = arith.constant 8 : index
    %c1_434 = arith.constant 1 : index
    %c0_435 = arith.constant 0 : index
    %c0_436 = arith.constant 0 : index
    %681 = vector.load %arg4[%c8_433, %c1_434, %c0_435, %c0_436] : memref<9x2x8x1xf32, #tpu.memory_space<vmem>>, vector<1x1x8x1xf32>
    %682 = vector.shape_cast %681 : vector<1x1x8x1xf32> to vector<8x1xf32>
    %cst_437 = arith.constant dense<0.000000e+00> : vector<8xf32>
    %683 = vector.multi_reduction <add>, %678, %cst_437 [1] : vector<8x512xf32> to vector<8xf32>
    %684 = vector.shape_cast %683 : vector<8xf32> to vector<8x1xf32>
    %cst_438 = arith.constant 0.001953125 : f32
    %685 = vector.broadcast %cst_438 : f32 to vector<8x1xf32>
    %686 = arith.mulf %684, %685 : vector<8x1xf32>
    %687 = vector.broadcast %686 : vector<8x1xf32> to vector<8x512xf32>
    %688 = arith.subf %678, %687 : vector<8x512xf32>
    %689 = arith.mulf %688, %688 : vector<8x512xf32>
    %cst_439 = arith.constant dense<0.000000e+00> : vector<8xf32>
    %690 = vector.multi_reduction <add>, %689, %cst_439 [1] : vector<8x512xf32> to vector<8xf32>
    %691 = vector.shape_cast %690 : vector<8xf32> to vector<8x1xf32>
    %cst_440 = arith.constant 0.001953125 : f32
    %692 = vector.broadcast %cst_440 : f32 to vector<8x1xf32>
    %693 = arith.mulf %691, %692 : vector<8x1xf32>
    %cst_441 = arith.constant 9.99999974E-6 : f32
    %694 = vector.broadcast %cst_441 : f32 to vector<8x1xf32>
    %695 = arith.addf %693, %694 : vector<8x1xf32>
    %696 = math.rsqrt %695 : vector<8x1xf32>
    %697 = vector.broadcast %696 : vector<8x1xf32> to vector<8x512xf32>
    %698 = arith.mulf %688, %697 : vector<8x512xf32>
    %699 = vector.broadcast %680 : vector<8x1xf32> to vector<8x512xf32>
    %700 = arith.mulf %698, %699 : vector<8x512xf32>
    %701 = vector.broadcast %682 : vector<8x1xf32> to vector<8x512xf32>
    %702 = arith.addf %700, %701 : vector<8x512xf32>
    %703 = arith.addf %702, %568 : vector<8x512xf32>
    %cst_442 = arith.constant 0.000000e+00 : f32
    %704 = vector.broadcast %cst_442 : f32 to vector<8x512xf32>
    %705 = arith.maximumf %703, %704 : vector<8x512xf32>
    %706 = vector.extract_strided_slice %705 {offsets = [0, 0], sizes = [8, 256], strides = [1, 1]} : vector<8x512xf32> to vector<8x256xf32>
    %c0_443 = arith.constant 0 : index
    %c0_444 = arith.constant 0 : index
    %707 = vector.load %arg5[%c0_443, %c0_444] : memref<16x256xf32, #tpu.memory_space<vmem>>, vector<8x256xf32>
    tpu.vector_store %arg5[%c0_443, %c0_444], %706 {strides = array<i32>} : memref<16x256xf32, #tpu.memory_space<vmem>>, vector<8x256xf32>,
    %708 = vector.extract_strided_slice %705 {offsets = [0, 256], sizes = [8, 256], strides = [1, 1]} : vector<8x512xf32> to vector<8x256xf32>
    %c8_445 = arith.constant 8 : index
    %c0_446 = arith.constant 0 : index
    %709 = vector.load %arg5[%c8_445, %c0_446] : memref<16x256xf32, #tpu.memory_space<vmem>>, vector<8x256xf32>
    tpu.vector_store %arg5[%c8_445, %c0_446], %708 {strides = array<i32>} : memref<16x256xf32, #tpu.memory_space<vmem>>, vector<8x256xf32>,
    return
  }
  func.func @transform_0(%arg0: i32) -> (i32, i32) {
    %c0_i32 = arith.constant 0 : i32
    %c0_i32_0 = arith.constant 0 : i32
    %c0_i32_1 = arith.constant 0 : i32
    return %c0_i32, %c0_i32_0 : i32, i32
  }
  func.func @transform_1(%arg0: i32) -> (i32, i32) {
    %c0_i32 = arith.constant 0 : i32
    %c0_i32_0 = arith.constant 0 : i32
    %c0_i32_1 = arith.constant 0 : i32
    return %c0_i32, %c0_i32_0 : i32, i32
  }
  func.func @transform_2(%arg0: i32) -> (i32, i32, i32) {
    %c0_i32 = arith.constant 0 : i32
    %c0_i32_0 = arith.constant 0 : i32
    %c0_i32_1 = arith.constant 0 : i32
    %c0_i32_2 = arith.constant 0 : i32
    return %c0_i32, %c0_i32_0, %c0_i32_1 : i32, i32, i32
  }
  func.func @transform_3(%arg0: i32) -> (i32, i32, i32, i32) {
    %c0_i32 = arith.constant 0 : i32
    %c0_i32_0 = arith.constant 0 : i32
    %c0_i32_1 = arith.constant 0 : i32
    %c0_i32_2 = arith.constant 0 : i32
    %c0_i32_3 = arith.constant 0 : i32
    return %c0_i32, %c0_i32_0, %c0_i32_1, %c0_i32_2 : i32, i32, i32, i32
  }
  func.func @transform_4(%arg0: i32) -> (i32, i32) {
    %c0_i32 = arith.constant 0 : i32
    %c0_i32_0 = arith.constant 0 : i32
    %c0_i32_1 = arith.constant 0 : i32
    return %c0_i32, %c0_i32_0 : i32, i32
  }
}

</mosaic_0001>

<bundles_post_ra>
// kernel: res_unet_innermost_forward.1
= control target key start
LH: loop header
LB: loop body
LE: loop exit
PB: predicated region body
PF: predicated region fallthrough
CT: control target
= control target key end

     0   :  { %v3150_v1 = vmov 0.0   ;;  %s3151_s17 = smov 8   ;;  %s3152_s18 = smov 9   ;;  %vm3154_vm0 = vmmov 0   ;;  %v18_v6 = vlaneseq  ;;  %vm151_vm3 = vcmask 1043456   ;;  %s4692_s0 = inlined_call_operand.vmem [shape: f32[32,128], index: 0, kind: input, shape index: {}]   ;;  %s4693_s2 = inlined_call_operand.vmem [shape: bf16[10,8,72], index: 2, kind: input, shape index: {}]   ;;  %s4694_s3 = inlined_call_operand.vmem [shape: f32[9,2,8,1], index: 3, kind: input, shape index: {}]   ;;  %s4695_s1 = inlined_call_operand.vmem [shape: bf16[128,512], index: 1, kind: input, shape index: {}]   ;;  %s4696_s4 = inlined_call_operand.vmem [shape: f32[16,256], index: 4, kind: output, shape index: {}]  }
   0x1   :  { %v109_v0 = vld [vmem:[%s4692_s0 + $0x18] sm:$0xff]  ;;  %2995 = vmatprep.subr.bf16.mxu0 %v3150_v1  ;;  %3009 = vmatprep.subr.bf16.mxu1 %v3150_v1  ;;  %v114_v2 = vld [vmem:[%s4692_s0 + $0x8] sm:$0xff]  ;;  %v119_v3 = vld [vmem:[%s4692_s0] sm:$0xff]  ;;  %s3153_s25 = smov 1   ;;  %vm147_vm4 = vcmask 588800   ;;  %s3155_s27 = smov 7  }
   0x2   :  { %110 = vrot.lane.b32.xlu1 %v109_v0, %s3151_s17  ;;  %99 = vrot.lane.b32.xlu0 %v109_v0, %s3152_s18  ;;  %v104_v4 = vld [vmem:[%s4692_s0 + $0x10] sm:$0xff]  ;;  %v144_v5 = vpack.c.bf16 %v114_v2, %v119_v3  ;;  %v3215_v7 = vand.u32 127, %v18_v6  ;;  %v146_v27 = vpack.c.bf16 %v109_v0, %v109_v0  ;;  %v132_v29 = vld [vmem:[%s4693_s2] sm:$0xf]  ;;  %s3156_s28 = smov 121   ;;  %s3157_s29 = smov 127  }
   0x3   :  { %3005 = vmatprep.mubr.msk.bf16.mxu0 %vm3154_vm0, %v3150_v1  ;;  %3019 = vmatprep.mubr.msk.bf16.mxu1 %vm3154_vm0, %v3150_v1  ;;  %s3158_s30 = smov 119   ;;  %s3159_s5 = smov 120   ;;  %v2883_v62 = vld [vmem:[%s4693_s2 + $0x4] sm:$0xf] }
   0x4   :  { %v21_v8 = vshra.s32 %v3215_v7, 3  ;;  %v20_v10 = vand.u32 7, %v3215_v7  ;;  %v153_v28 = vsel %vm151_vm3, %v146_v27, 0  ;;  %s3162_s21 = smov 16   ;;  %s3163_s22 = smov 113   ;;  %vm975_vm9 = vcmp.lt.s32.totalorder %v3215_v7, 17 }
   0x5   :  { %s3164_s23 = smov 15   ;;  %s3165_s24 = smov 112   ;;  %vm1000_vm10 = vcmp.lt.s32.totalorder %v3215_v7, 16 }
   0x6   :  { %115 = vrot.lane.b32.xlu1 %v114_v2, %s3153_s25  ;;  %105 = vrot.lane.b32.xlu0 %v104_v4, %s3151_s17  ;;  %v3218_v9 = vand.u32 7, %v21_v8  ;;  %vm29_vm2 = vcmp.gt.s32.totalorder %v20_v10, 0  ;;  %vm32_vm5 = vcmp.lt.s32.totalorder %v20_v10, 7  ;;  %s3166_s0 = smov 111  }
   0x7   :  { %v3226_v12 = vsel %vm29_vm2, 1.0, %v3150_v1  ;;  %v3268_v35 = vsel %vm32_vm5, 1.0, %v3150_v1 }
   0x8   :  { %vm23_vm1 = vcmp.gt.s32.totalorder %v3218_v9, 0  ;;  %vm26_vm6 = vcmp.lt.s32.totalorder %v3218_v9, 7 }
   0x9   :  { %v3223_v11 = vsel %vm23_vm1, 1.0, %v3150_v1  ;;  %v3280_v46 = vsel %vm26_vm6, 1.0, %v3150_v1 }
   0xa   :  { %124 = vrot.lane.b32.xlu0 %v109_v0, %s3153_s25  ;;  %v3230_v15 = vmul.f32 %v3226_v12, %v3223_v11  ;;  %v3274_v40 = vmul.f32 %v3268_v35, %v3223_v11  ;;  %v3285_v50 = vmul.f32 %v3226_v12, %v3280_v46  ;;  %v3290_v52 = vmul.f32 %v3268_v35, %v3280_v46 }
  0x74   :  { %v111_v13 = vpop.permute.xlu1 %110  ;;  %v100_v14 = vpop.permute.xlu0 %99 }
  0x75   :  { %v102_v18 = vmul.f32 %v3230_v15, %v100_v14  ;;  %v112_v20 = vmul.f32 %v3223_v11, %v111_v13  ;;  %v294_v13 = vld [vmem:[%s4694_s3] sm:$0xff] }
  0x78   :  { %v116_v16 = vpop.permute.xlu1 %115  ;;  %v106_v17 = vpop.permute.xlu0 %105 }
  0x79   :  { %v107_v19 = vmul.f32 %v3223_v11, %v106_v17  ;;  %v117_v21 = vmul.f32 %v3226_v12, %v116_v16 }
  0x7b   :  { %v142_v22 = vpack.c.bf16 %v107_v19, %v102_v18  ;;  %v143_v24 = vpack.c.bf16 %v117_v21, %v112_v20 }
  0x7c   :  { %v125_v23 = vpop.permute.xlu0 %124 }
  0x7d   :  { %2996 = vmatpush3.bf16.msra.mxu0 %v142_v22  ;;  %v126_v25 = vmul.f32 %v3226_v12, %v125_v23 }
  0x7e   :  { %2997 = vmatprep.subr.bf16.mxu0 %v3150_v1 }
  0x7f   :  { %v145_v26 = vpack.c.bf16 %v104_v4, %v126_v25  ;;  %v3160_v4 = vmov 0  }
  0x80   :  { %3082 = vset.pattern.permute.xlu0 %v3160_v4  ;;  %3083 = vset.pattern.permute.xlu1 %v3160_v4 }
  0x81   :  { %2998 = vmatpush3.bf16.msra.mxu0 %v143_v24 }
  0x82   :  { %2999 = vmatprep.subr.bf16.mxu0 %v3150_v1 }
  0x85   :  { %3000 = vmatpush3.bf16.msra.mxu0 %v144_v5  ;;  %v2885_v5 = vld [vmem:[%s4694_s3 + $0x8] sm:$0xff] }
  0x86   :  { %3001 = vmatprep.subr.bf16.mxu0 %v3150_v1 }
  0x89   :  { %3002 = vmatpush3.bf16.msra.mxu0 %v145_v26 }
  0x8a   :  { %3003 = vmatprep.subr.bf16.mxu0 %v3150_v1 }
  0x8d   :  { %3004 = vmatpush3.bf16.msra.mxu0 %v153_v28 }
  0x8e   :  { %3023 = vmatprep.subr.bf16.mxu0 %v3150_v1 }
  0x90   :  { %3006 = vmatmul.mubr.msk.bf16.vlgmr.msra.gmra.mrb[0].mxu0 %vm147_vm4, %v132_v29 }
  0x91   :  { %3033 = vmatprep.mubr.msk.bf16.mxu0 %vm3154_vm0, %v3150_v1 }
 0x163   :  { %v189_v30 = vpop.f32.mrb[0].mxu0 }
 0x164   :  { %v3249_v31 = vmax.f32 %v189_v30, 0.0  ;;  %v3007_v32 = vpop.f32.mrb[1].mxu0 }
 0x165   :  { %v192_v33 = vpop.f32.mrb[2].mxu0 }
 0x166   :  { %200 = vrot.lane.b32.xlu0 %v3249_v31, %s3151_s17  ;;  %196 = vrot.lane.b32.xlu1 %v3249_v31, %s3152_s18  ;;  %v3008_v34 = vpop.f32.mrb[3].mxu0 }
 0x16a   :  { %209 = vrot.lane.b32.xlu0 %v3249_v31, %s3153_s25  ;;  %204 = vrot.lane.b32.xlu1 %v3249_v31, %s3155_s27 }
 0x16e   :  { %218 = vrot.lane.b32.xlu0 %v3249_v31, %s3156_s28  ;;  %214 = vrot.lane.b32.xlu1 %v3249_v31, %s3157_s29 }
 0x172   :  { %227 = vrot.lane.b32.xlu0 %v3249_v31, %s3158_s30  ;;  %223 = vrot.lane.b32.xlu1 %v3249_v31, %s3159_s5 }
 0x1d8   :  { %v201_v36 = vpop.permute.xlu0 %200  ;;  %v197_v37 = vpop.permute.xlu1 %196 }
 0x1d9   :  { %v202_v38 = vmul.f32 %v3223_v11, %v201_v36  ;;  %v198_v39 = vmul.f32 %v197_v37, %v3230_v15 }
 0x1db   :  { %v243_v41 = vpack.c.bf16 %v202_v38, %v198_v39 }
 0x1dc   :  { %v210_v42 = vpop.permute.xlu0 %209  ;;  %v205_v43 = vpop.permute.xlu1 %204 }
 0x1dd   :  { %v211_v44 = vmul.f32 %v3226_v12, %v210_v42  ;;  %v207_v45 = vmul.f32 %v3274_v40, %v205_v43  ;;  %3010 = vmatpush3.bf16.msra.mxu1 %v243_v41 }
 0x1de   :  { %3011 = vmatprep.subr.bf16.mxu1 %v3150_v1 }
 0x1df   :  { %v244_v47 = vpack.c.bf16 %v211_v44, %v207_v45 }
 0x1e0   :  { %v219_v48 = vpop.permute.xlu0 %218  ;;  %v215_v49 = vpop.permute.xlu1 %214 }
 0x1e1   :  { %v216_v51 = vmul.f32 %v3268_v35, %v215_v49  ;;  %3012 = vmatpush3.bf16.msra.mxu1 %v244_v47  ;;  %v221_v56 = vmul.f32 %v3285_v50, %v219_v48 }
 0x1e2   :  { %3013 = vmatprep.subr.bf16.mxu1 %v3150_v1 }
 0x1e3   :  { %v245_v53 = vpack.c.bf16 %v216_v51, %v3249_v31 }
 0x1e4   :  { %v228_v54 = vpop.permute.xlu0 %227  ;;  %v224_v55 = vpop.permute.xlu1 %223 }
 0x1e5   :  { %v230_v57 = vmul.f32 %v3290_v52, %v228_v54  ;;  %v225_v58 = vmul.f32 %v3280_v46, %v224_v55  ;;  %3014 = vmatpush3.bf16.msra.mxu1 %v245_v53  ;;  %v2886_v53 = vld [vmem:[%s4693_s2 + $0x8] sm:$0xf] }
 0x1e6   :  { %3015 = vmatprep.subr.bf16.mxu1 %v3150_v1 }
 0x1e7   :  { %v246_v59 = vpack.c.bf16 %v225_v58, %v221_v56  ;;  %v247_v60 = vpack.c.bf16 %v230_v57, %v230_v57  ;;  %v2889_v58 = vld [vmem:[%s4694_s3 + $0x18] sm:$0xff] }
 0x1e9   :  { %3016 = vmatpush3.bf16.msra.mxu1 %v246_v59  ;;  %v252_v61 = vsel %vm151_vm3, %v247_v60, 0 }
 0x1ea   :  { %3017 = vmatprep.subr.bf16.mxu1 %v3150_v1 }
 0x1ed   :  { %3018 = vmatpush3.bf16.msra.mxu1 %v252_v61 }
 0x1ee   :  { %3037 = vmatprep.subr.bf16.mxu1 %v3150_v1 }
 0x1f0   :  { %3020 = vmatmul.mubr.msk.bf16.vlgmr.msra.gmra.mrb[0].mxu1 %vm147_vm4, %v2883_v62 }
 0x1f1   :  { %3047 = vmatprep.mubr.msk.bf16.mxu1 %vm3154_vm0, %v3150_v1 }
 0x2c3   :  { %v288_v63 = vpop.f32.mrb[0].mxu1 }
 0x2c4   :  { %297 = vadd.xlane.f32.xlu1 %v288_v63  ;;  %v3021_v0 = vpop.f32.mrb[1].mxu1 }
 0x2c5   :  { %v291_v2 = vpop.f32.mrb[2].mxu1 }
 0x2c6   :  { %v3022_v3 = vpop.f32.mrb[3].mxu1 }
 0x2d5   :  { %316 = vperm.xlu1 %3083, %v2885_v5  }
 0x351   :  { %v298_v6 = vpop.xlane.xlu1 %297 }
 0x352   :  { %v299_v8 = vmul.f32 0.0078125, %v298_v6 }
 0x354   :  { %v300_v9 = vsub.f32 %v288_v63, %v299_v8  ;;  %v2888_v63 = vld [vmem:[%s4694_s3 + $0x10] sm:$0xff] }
 0x355   :  { %v317_v21 = vpop.permute.xlu1 %316 }
 0x356   :  { %v301_v10 = vmul.f32 %v300_v9, %v300_v9 }
 0x358   :  { %302 = vadd.xlane.f32.xlu0 %v301_v10 }
 0x36e   :  { %310 = vperm.xlu0 %3082, %v294_v13  }
 0x3e5   :  { %v303_v14 = vpop.xlane.xlu0 %302 }
 0x3e6   :  { %v304_v16 = vmul.f32 0.0078125, %v303_v14 }
 0x3e8   :  { %v305_v17 = vadd.f32 1e-05, %v304_v16 }
 0x3ea   :  { %3132 = vrsqrt.f32 %v305_v17 }
 0x3ed   :  { %v311_v19 = vpop.permute.xlu0 %310 }
 0x3f4   :  { %v3133_v18 = vpop.eup %3132 }
 0x3f5   :  { %v307_v20 = vmul.f32 %v3133_v18, %v300_v9 }
 0x3f7   :  { %v313_v22 = vmul.f32 %v311_v19, %v307_v20 }
 0x3f9   :  { %v319_v23 = vadd.f32 %v317_v21, %v313_v22 }
 0x3fb   :  { %v320_v24 = vmax.f32 %v319_v23, 0.0 }
 0x3fd   :  { %350 = vrot.lane.b32.xlu0 %v320_v24, %s3158_s30  ;;  %321 = vrot.lane.b32.xlu1 %v320_v24, %s3152_s18 }
 0x401   :  { %325 = vrot.lane.b32.xlu1 %v320_v24, %s3151_s17 }
 0x405   :  { %329 = vrot.lane.b32.xlu1 %v320_v24, %s3155_s27 }
 0x409   :  { %333 = vrot.lane.b32.xlu1 %v320_v24, %s3153_s25 }
 0x40d   :  { %338 = vrot.lane.b32.xlu1 %v320_v24, %s3157_s29 }
 0x411   :  { %342 = vrot.lane.b32.xlu1 %v320_v24, %s3156_s28 }
 0x415   :  { %346 = vrot.lane.b32.xlu1 %v320_v24, %s3159_s5 }
 0x46f   :  { %v322_v25 = vpop.permute.xlu1 %321  ;;  %v351_v42 = vpop.permute.xlu0 %350 }
 0x470   :  { %v323_v27 = vmul.f32 %v322_v25, %v3230_v15  ;;  %v352_v43 = vmul.f32 %v351_v42, %v3290_v52 }
 0x472   :  { %v369_v49 = vpack.c.bf16 %v352_v43, %v352_v43 }
 0x473   :  { %v326_v26 = vpop.permute.xlu1 %325 }
 0x474   :  { %v327_v28 = vmul.f32 %v3223_v11, %v326_v26  ;;  %v374_v51 = vsel %vm151_vm3, %v369_v49, 0 }
 0x476   :  { %v365_v29 = vpack.c.bf16 %v327_v28, %v323_v27 }
 0x477   :  { %v330_v30 = vpop.permute.xlu1 %329 }
 0x478   :  { %3024 = vmatpush3.bf16.msra.mxu0 %v365_v29  ;;  %v331_v33 = vmul.f32 %v330_v30, %v3274_v40 }
 0x479   :  { %3025 = vmatprep.subr.bf16.mxu0 %v3150_v1 }
 0x47b   :  { %v334_v32 = vpop.permute.xlu1 %333 }
 0x47c   :  { %v335_v34 = vmul.f32 %v3226_v12, %v334_v32 }
 0x47e   :  { %v366_v36 = vpack.c.bf16 %v335_v34, %v331_v33 }
 0x47f   :  { %v339_v37 = vpop.permute.xlu1 %338 }
 0x480   :  { %v340_v38 = vmul.f32 %v3268_v35, %v339_v37  ;;  %3026 = vmatpush3.bf16.msra.mxu0 %v366_v36 }
 0x481   :  { %3027 = vmatprep.subr.bf16.mxu0 %v3150_v1 }
 0x482   :  { %v367_v39 = vpack.c.bf16 %v340_v38, %v320_v24 }
 0x483   :  { %v343_v41 = vpop.permute.xlu1 %342 }
 0x484   :  { %3028 = vmatpush3.bf16.msra.mxu0 %v367_v39  ;;  %v344_v45 = vmul.f32 %v343_v41, %v3285_v50  ;;  %v2890_v41 = vld [vmem:[%s4693_s2 + $0xc] sm:$0xf] }
 0x485   :  { %3029 = vmatprep.subr.bf16.mxu0 %v3150_v1 }
 0x487   :  { %v347_v44 = vpop.permute.xlu1 %346 }
 0x488   :  { %v348_v47 = vmul.f32 %v3280_v46, %v347_v44 }
 0x48a   :  { %v368_v48 = vpack.c.bf16 %v348_v47, %v344_v45  ;;  %v2893_v47 = vld [vmem:[%s4694_s3 + $0x28] sm:$0xff] }
 0x48c   :  { %3030 = vmatpush3.bf16.msra.mxu0 %v368_v48 }
 0x48d   :  { %3031 = vmatprep.subr.bf16.mxu0 %v3150_v1 }
 0x490   :  { %3032 = vmatpush3.bf16.msra.mxu0 %v374_v51 }
 0x491   :  { %3051 = vmatprep.subr.bf16.mxu0 %v3150_v1 }
 0x493   :  { %3034 = vmatmul.mubr.msk.bf16.vlgmr.msra.gmra.mrb[4].mxu0 %vm147_vm4, %v2886_v53 }
 0x494   :  { %3061 = vmatprep.mubr.msk.bf16.mxu0 %vm3154_vm0, %v3150_v1 }
 0x566   :  { %v410_v54 = vpop.f32.mrb[4].mxu0 }
 0x567   :  { %420 = vadd.xlane.f32.xlu1 %v410_v54  ;;  %v3035_v55 = vpop.f32.mrb[5].mxu0 }
 0x568   :  { %v413_v56 = vpop.f32.mrb[6].mxu0 }
 0x569   :  { %v3036_v57 = vpop.f32.mrb[7].mxu0 }
 0x578   :  { %439 = vperm.xlu1 %3083, %v2889_v58  }
 0x5f4   :  { %v421_v59 = vpop.xlane.xlu1 %420 }
 0x5f5   :  { %v422_v60 = vmul.f32 0.0078125, %v421_v59 }
 0x5f7   :  { %v423_v61 = vsub.f32 %v410_v54, %v422_v60  ;;  %v2892_v54 = vld [vmem:[%s4694_s3 + $0x20] sm:$0xff] }
 0x5f8   :  { %v440_v10 = vpop.permute.xlu1 %439 }
 0x5f9   :  { %v424_v62 = vmul.f32 %v423_v61, %v423_v61 }
 0x5fb   :  { %425 = vadd.xlane.f32.xlu0 %v424_v62 }
 0x611   :  { %433 = vperm.xlu0 %3082, %v2888_v63  }
 0x688   :  { %v426_v0 = vpop.xlane.xlu0 %425 }
 0x689   :  { %v427_v2 = vmul.f32 0.0078125, %v426_v0 }
 0x68b   :  { %v428_v3 = vadd.f32 1e-05, %v427_v2 }
 0x68d   :  { %3134 = vrsqrt.f32 %v428_v3 }
 0x690   :  { %v434_v8 = vpop.permute.xlu0 %433 }
 0x697   :  { %v3135_v5 = vpop.eup %3134 }
 0x698   :  { %v430_v6 = vmul.f32 %v3135_v5, %v423_v61 }
 0x69a   :  { %v436_v9 = vmul.f32 %v434_v8, %v430_v6 }
 0x69c   :  { %v442_v13 = vadd.f32 %v440_v10, %v436_v9 }
 0x69e   :  { %v443_v14 = vadd.f32 %v442_v13, %v3249_v31 }
 0x6a0   :  { %v3350_v16 = vmax.f32 %v443_v14, 0.0 }
 0x6a2   :  { %449 = vrot.lane.b32.xlu0 %v3350_v16, %s3151_s17  ;;  %445 = vrot.lane.b32.xlu1 %v3350_v16, %s3152_s18 }
 0x6a6   :  { %457 = vrot.lane.b32.xlu0 %v3350_v16, %s3153_s25  ;;  %453 = vrot.lane.b32.xlu1 %v3350_v16, %s3155_s27 }
 0x6aa   :  { %466 = vrot.lane.b32.xlu0 %v3350_v16, %s3156_s28  ;;  %462 = vrot.lane.b32.xlu1 %v3350_v16, %s3157_s29 }
 0x6ae   :  { %474 = vrot.lane.b32.xlu0 %v3350_v16, %s3158_s30  ;;  %470 = vrot.lane.b32.xlu1 %v3350_v16, %s3159_s5 }
 0x714   :  { %v450_v31 = vpop.permute.xlu0 %449  ;;  %v446_v17 = vpop.permute.xlu1 %445 }
 0x715   :  { %v451_v18 = vmul.f32 %v3223_v11, %v450_v31  ;;  %v447_v19 = vmul.f32 %v446_v17, %v3230_v15 }
 0x717   :  { %v489_v20 = vpack.c.bf16 %v451_v18, %v447_v19 }
 0x718   :  { %v458_v21 = vpop.permute.xlu0 %457  ;;  %v454_v22 = vpop.permute.xlu1 %453 }
 0x719   :  { %v459_v23 = vmul.f32 %v3226_v12, %v458_v21  ;;  %v455_v24 = vmul.f32 %v454_v22, %v3274_v40  ;;  %3038 = vmatpush3.bf16.msra.mxu1 %v489_v20 }
 0x71a   :  { %3039 = vmatprep.subr.bf16.mxu1 %v3150_v1 }
 0x71b   :  { %v490_v25 = vpack.c.bf16 %v459_v23, %v455_v24  ;;  %v2894_v24 = vld [vmem:[%s4693_s2 + $0x10] sm:$0xf] }
 0x71c   :  { %v467_v26 = vpop.permute.xlu0 %466  ;;  %v463_v27 = vpop.permute.xlu1 %462 }
 0x71d   :  { %v464_v28 = vmul.f32 %v3268_v35, %v463_v27  ;;  %3040 = vmatpush3.bf16.msra.mxu1 %v490_v25  ;;  %v468_v33 = vmul.f32 %v467_v26, %v3285_v50  ;;  %v2897_v26 = vld [vmem:[%s4694_s3 + $0x38] sm:$0xff]  ;;  %v3084_v27 = vld [vmem:[%s4695_s1] ss:$16 sps:$4 sm:$0xff]  }
 0x71e   :  { %3041 = vmatprep.subr.bf16.mxu1 %v3150_v1 }
 0x71f   :  { %v491_v29 = vpack.c.bf16 %v464_v28, %v3350_v16  ;;  %v3086_v28 = vld [vmem:[%s4695_s1 + $0x4] ss:$16 sps:$4 sm:$0xff]  }
 0x720   :  { %v475_v30 = vpop.permute.xlu0 %474  ;;  %v471_v32 = vpop.permute.xlu1 %470 }
 0x721   :  { %v476_v34 = vmul.f32 %v475_v30, %v3290_v52  ;;  %v472_v36 = vmul.f32 %v3280_v46, %v471_v32  ;;  %3042 = vmatpush3.bf16.msra.mxu1 %v491_v29  ;;  %v3087_v29 = vld [vmem:[%s4695_s1 + $0x8] ss:$16 sps:$4 sm:$0xff]   ;;  %v3089_v30 = vld [vmem:[%s4695_s1 + $0xc] ss:$16 sps:$4 sm:$0xff]   ;;  %v3090_v32 = vld [vmem:[%s4695_s1 + $0x20] ss:$16 sps:$4 sm:$0xff]  }
 0x722   :  { %3043 = vmatprep.subr.bf16.mxu1 %v3150_v1 }
 0x723   :  { %v492_v37 = vpack.c.bf16 %v472_v36, %v468_v33  ;;  %v493_v38 = vpack.c.bf16 %v476_v34, %v476_v34  ;;  %v3092_v33 = vld [vmem:[%s4695_s1 + $0x24] ss:$16 sps:$4 sm:$0xff]   ;;  %v3093_v34 = vld [vmem:[%s4695_s1 + $0x28] ss:$16 sps:$4 sm:$0xff]   ;;  %v3095_v36 = vld [vmem:[%s4695_s1 + $0x2c] ss:$16 sps:$4 sm:$0xff]  }
 0x725   :  { %3044 = vmatpush3.bf16.msra.mxu1 %v492_v37  ;;  %v498_v39 = vsel %vm151_vm3, %v493_v38, 0 }
 0x726   :  { %3045 = vmatprep.subr.bf16.mxu1 %v3150_v1 }
 0x729   :  { %3046 = vmatpush3.bf16.msra.mxu1 %v498_v39 }
 0x72a   :  { %885 = vmatprep.subr.bf16.mxu1 %v3086_v28 }
 0x72c   :  { %3048 = vmatmul.mubr.msk.bf16.vlgmr.msra.gmra.mrb[4].mxu1 %vm147_vm4, %v2890_v41 }
 0x72d   :  { %917 = vmatprep.mubr.bf16.mxu1 %v3160_v4  ;;  %886 = vmatpush1.bf16.msra.mxu1 %v3084_v27 }
 0x72e   :  { %887 = vmatprep.subr.bf16.mxu1 %v3092_v33 }
 0x731   :  { %888 = vmatpush1.bf16.msra.mxu1 %v3090_v32 }
 0x7ff   :  { %v534_v42 = vpop.f32.mrb[4].mxu1 }
 0x800   :  { %544 = vadd.xlane.f32.xlu1 %v534_v42  ;;  %v3049_v43 = vpop.f32.mrb[5].mxu1 }
 0x801   :  { %v537_v44 = vpop.f32.mrb[6].mxu1  ;;  %v3101_v43 = vld [vmem:[%s4695_s1 + $0x4c] ss:$16 sps:$4 sm:$0xff]  }
 0x802   :  { %v3050_v45 = vpop.f32.mrb[7].mxu1  ;;  %v3096_v44 = vld [vmem:[%s4695_s1 + $0x40] ss:$16 sps:$4 sm:$0xff]  }
 0x803   :  { %v3099_v45 = vld [vmem:[%s4695_s1 + $0x48] ss:$16 sps:$4 sm:$0xff]  }
 0x811   :  { %563 = vperm.xlu1 %3083, %v2893_v47   ;;  %v3102_v47 = vld [vmem:[%s4695_s1 + $0x60] ss:$16 sps:$4 sm:$0xff]  }
 0x88d   :  { %v545_v48 = vpop.xlane.xlu1 %544 }
 0x88e   :  { %v546_v49 = vmul.f32 0.0078125, %v545_v48  ;;  %v3104_v48 = vld [vmem:[%s4695_s1 + $0x64] ss:$16 sps:$4 sm:$0xff]  }
 0x890   :  { %v547_v51 = vsub.f32 %v534_v42, %v546_v49  ;;  %v3098_v42 = vld [vmem:[%s4695_s1 + $0x44] ss:$16 sps:$4 sm:$0xff]  }
 0x891   :  { %v564_v62 = vpop.permute.xlu1 %563  ;;  %889 = vmatprep.subr.bf16.mxu1 %v3098_v42  ;;  %v2896_v49 = vld [vmem:[%s4694_s3 + $0x30] sm:$0xff] }
 0x892   :  { %v548_v53 = vmul.f32 %v547_v51, %v547_v51  ;;  %890 = vmatpush1.bf16.msra.mxu1 %v3096_v44 }
 0x893   :  { %891 = vmatprep.subr.bf16.mxu1 %v3104_v48 }
 0x894   :  { %549 = vadd.xlane.f32.xlu0 %v548_v53  ;;  %v3107_v53 = vld [vmem:[%s4695_s1 + $0x6c] ss:$16 sps:$4 sm:$0xff]  }
 0x896   :  { %892 = vmatpush1.bf16.msra.mxu1 %v3102_v47 }
 0x8aa   :  { %557 = vperm.xlu0 %3082, %v2892_v54   ;;  %v3110_v54 = vld [vmem:[%s4695_s1 + $0x84] ss:$16 sps:$4 sm:$0xff]  }
 0x8ab   :  { %893 = vmatprep.subr.bf16.mxu1 %v3110_v54 }
 0x921   :  { %v550_v55 = vpop.xlane.xlu0 %549 }
 0x922   :  { %v551_v56 = vmul.f32 0.0078125, %v550_v55  ;;  %v3113_v55 = vld [vmem:[%s4695_s1 + $0x8c] ss:$16 sps:$4 sm:$0xff]  }
 0x924   :  { %v552_v57 = vadd.f32 1e-05, %v551_v56  ;;  %v3108_v56 = vld [vmem:[%s4695_s1 + $0x80] ss:$16 sps:$4 sm:$0xff]  }
 0x925   :  { %894 = vmatpush1.bf16.msra.mxu1 %v3108_v56 }
 0x926   :  { %3136 = vrsqrt.f32 %v552_v57  ;;  %v3111_v57 = vld [vmem:[%s4695_s1 + $0x88] ss:$16 sps:$4 sm:$0xff]  }
 0x929   :  { %v558_v60 = vpop.permute.xlu0 %557 }
 0x930   :  { %v3137_v58 = vpop.eup %3136 }
 0x931   :  { %v554_v59 = vmul.f32 %v3137_v58, %v547_v51  ;;  %v3105_v51 = vld [vmem:[%s4695_s1 + $0x68] ss:$16 sps:$4 sm:$0xff]   ;;  %v3116_v58 = vld [vmem:[%s4695_s1 + $0xa4] ss:$16 sps:$4 sm:$0xff]  }
 0x932   :  { %895 = vmatprep.subr.bf16.mxu1 %v3116_v58 }
 0x933   :  { %v560_v61 = vmul.f32 %v558_v60, %v554_v59  ;;  %v3119_v59 = vld [vmem:[%s4695_s1 + $0xac] ss:$16 sps:$4 sm:$0xff]   ;;  %v3114_v60 = vld [vmem:[%s4695_s1 + $0xa0] ss:$16 sps:$4 sm:$0xff]  }
 0x934   :  { %896 = vmatpush1.bf16.msra.mxu1 %v3114_v60 }
 0x935   :  { %v566_v63 = vadd.f32 %v564_v62, %v560_v61  ;;  %v3117_v61 = vld [vmem:[%s4695_s1 + $0xa8] ss:$16 sps:$4 sm:$0xff]   ;;  %v3122_v62 = vld [vmem:[%s4695_s1 + $0xc4] ss:$16 sps:$4 sm:$0xff]  }
 0x936   :  { %897 = vmatprep.subr.bf16.mxu1 %v3122_v62 }
 0x937   :  { %v567_v0 = vmax.f32 %v566_v63, 0.0  ;;  %v3125_v63 = vld [vmem:[%s4695_s1 + $0xcc] ss:$16 sps:$4 sm:$0xff]  }
 0x939   :  { %572 = vrot.lane.b32.xlu0 %v567_v0, %s3151_s17  ;;  %568 = vrot.lane.b32.xlu1 %v567_v0, %s3152_s18 }
 0x93d   :  { %580 = vrot.lane.b32.xlu0 %v567_v0, %s3153_s25  ;;  %576 = vrot.lane.b32.xlu1 %v567_v0, %s3155_s27 }
 0x941   :  { %589 = vrot.lane.b32.xlu0 %v567_v0, %s3156_s28  ;;  %585 = vrot.lane.b32.xlu1 %v567_v0, %s3157_s29 }
 0x945   :  { %597 = vrot.lane.b32.xlu0 %v567_v0, %s3158_s30  ;;  %593 = vrot.lane.b32.xlu1 %v567_v0, %s3159_s5 }
 0x9ab   :  { %v573_v2 = vpop.permute.xlu0 %572  ;;  %v569_v3 = vpop.permute.xlu1 %568 }
 0x9ac   :  { %v574_v5 = vmul.f32 %v3223_v11, %v573_v2  ;;  %v570_v6 = vmul.f32 %v569_v3, %v3230_v15  ;;  %v3123_v2 = vld [vmem:[%s4695_s1 + $0xc8] ss:$16 sps:$4 sm:$0xff]   ;;  %v3128_v3 = vld [vmem:[%s4695_s1 + $0xe4] ss:$16 sps:$4 sm:$0xff]  }
 0x9ae   :  { %v612_v8 = vpack.c.bf16 %v574_v5, %v570_v6  ;;  %v3131_v5 = vld [vmem:[%s4695_s1 + $0xec] ss:$16 sps:$4 sm:$0xff]   ;;  %v3126_v6 = vld [vmem:[%s4695_s1 + $0xe0] ss:$16 sps:$4 sm:$0xff]  }
 0x9af   :  { %v581_v9 = vpop.permute.xlu0 %580  ;;  %v577_v10 = vpop.permute.xlu1 %576 }
 0x9b0   :  { %v582_v13 = vmul.f32 %v3226_v12, %v581_v9  ;;  %v578_v14 = vmul.f32 %v577_v10, %v3274_v40  ;;  %3052 = vmatpush3.bf16.msra.mxu0 %v612_v8  ;;  %v3129_v8 = vld [vmem:[%s4695_s1 + $0xe8] ss:$16 sps:$4 sm:$0xff]  }
 0x9b1   :  { %3053 = vmatprep.subr.bf16.mxu0 %v3150_v1 }
 0x9b2   :  { %v613_v31 = vpack.c.bf16 %v582_v13, %v578_v14 }
 0x9b3   :  { %v590_v17 = vpop.permute.xlu0 %589  ;;  %v586_v18 = vpop.permute.xlu1 %585 }
 0x9b4   :  { %v587_v19 = vmul.f32 %v3268_v35, %v586_v18  ;;  %3054 = vmatpush3.bf16.msra.mxu0 %v613_v31  ;;  %v591_v21 = vmul.f32 %v590_v17, %v3285_v50 }
 0x9b5   :  { %3055 = vmatprep.subr.bf16.mxu0 %v3150_v1 }
 0x9b6   :  { %v614_v11 = vpack.c.bf16 %v587_v19, %v567_v0  ;;  %v3120_v0 = vld [vmem:[%s4695_s1 + $0xc0] ss:$16 sps:$4 sm:$0xff]   ;;  %s3161_s1 = smov 17  }
 0x9b7   :  { %v598_v15 = vpop.permute.xlu0 %597  ;;  %v594_v20 = vpop.permute.xlu1 %593  ;;  %898 = vmatpush1.bf16.msra.mxu1 %v3120_v0 }
 0x9b8   :  { %v599_v12 = vmul.f32 %v598_v15, %v3290_v52  ;;  %v595_v40 = vmul.f32 %v3280_v46, %v594_v20  ;;  %3056 = vmatpush3.bf16.msra.mxu0 %v614_v11  ;;  %899 = vmatprep.subr.bf16.mxu1 %v3128_v3 }
 0x9b9   :  { %3057 = vmatprep.subr.bf16.mxu0 %v3150_v1 }
 0x9ba   :  { %v615_v22 = vpack.c.bf16 %v595_v40, %v591_v21  ;;  %v616_v23 = vpack.c.bf16 %v599_v12, %v599_v12 }
 0x9bb   :  { %900 = vmatpush1.bf16.msra.mxu1 %v3126_v6 }
 0x9bc   :  { %3058 = vmatpush3.bf16.msra.mxu0 %v615_v22  ;;  %v621_v35 = vsel %vm151_vm3, %v616_v23, 0 }
 0x9bd   :  { %3059 = vmatprep.subr.bf16.mxu0 %v3150_v1 }
 0x9c0   :  { %3060 = vmatpush3.bf16.msra.mxu0 %v621_v35 }
 0x9c1   :  { %926 = vmatprep.subr.bf16.mxu0 %v3089_v30 }
 0x9c3   :  { %3062 = vmatmul.mubr.msk.bf16.vlgmr.msra.gmra.mrb[8].mxu0 %vm147_vm4, %v2894_v24 }
 0x9c4   :  { %958 = vmatprep.mubr.bf16.mxu0 %v3160_v4  ;;  %927 = vmatpush1.bf16.msra.mxu0 %v3087_v29  ;;  %v35_v29 = vadd.s32 128, %v3215_v7 }
 0x9c5   :  { %928 = vmatprep.subr.bf16.mxu0 %v3095_v36 }
 0x9c6   :  { %v43_v33 = vshra.s32 %v35_v29, 4 }
 0x9c8   :  { %929 = vmatpush1.bf16.msra.mxu0 %v3093_v34 }
 0x9c9   :  { %930 = vmatprep.subr.bf16.mxu0 %v3101_v43 }
 0x9cc   :  { %931 = vmatpush1.bf16.msra.mxu0 %v3099_v45  ;;  %v42_v45 = vshra.s32 %v3215_v7, 4 }
 0x9cd   :  { %932 = vmatprep.subr.bf16.mxu0 %v3107_v53 }
 0x9ce   :  { %v3639_v58 = vand.u32 15, %v42_v45 }
 0x9d0   :  { %933 = vmatpush1.bf16.msra.mxu0 %v3105_v51  ;;  %vm50_vm15 = vcmp.gt.s32.totalorder %v3639_v58, 0 }
 0x9d1   :  { %934 = vmatprep.subr.bf16.mxu0 %v3113_v55 }
 0x9d4   :  { %935 = vmatpush1.bf16.msra.mxu0 %v3111_v57  ;;  %v38_v57 = vand.u32 15, %v3215_v7 }
 0x9d5   :  { %936 = vmatprep.subr.bf16.mxu0 %v3119_v59 }
 0x9d6   :  { %vm74_vm14 = vcmp.gt.s32.totalorder %v38_v57, 0  ;;  %vm86_vm5 = vcmp.lt.s32.totalorder %v38_v57, 15 }
 0x9d8   :  { %937 = vmatpush1.bf16.msra.mxu0 %v3117_v61 }
 0x9d9   :  { %938 = vmatprep.subr.bf16.mxu0 %v3125_v63 }
 0x9dc   :  { %939 = vmatpush1.bf16.msra.mxu0 %v3123_v2 }
 0x9dd   :  { %940 = vmatprep.subr.bf16.mxu0 %v3131_v5 }
 0x9e0   :  { %941 = vmatpush1.bf16.msra.mxu0 %v3129_v8 }
 0xa96   :  { %v657_v46 = vpop.f32.mrb[8].mxu0 }
 0xa97   :  { %667 = vadd.xlane.f32.xlu1 %v657_v46  ;;  %v3063_v50 = vpop.f32.mrb[9].mxu0 }
 0xa98   :  { %v660_v52 = vpop.f32.mrb[10].mxu0 }
 0xa99   :  { %v3064_v25 = vpop.f32.mrb[11].mxu0 }
 0xaa8   :  { %686 = vperm.xlu1 %3083, %v2897_v26  }
 0xb24   :  { %v668_v37 = vpop.xlane.xlu1 %667 }
 0xb25   :  { %v669_v38 = vmul.f32 0.0078125, %v668_v37  ;;  %v36_v37 = vadd.s32 256, %v3215_v7 }
 0xb27   :  { %v670_v39 = vsub.f32 %v657_v46, %v669_v38  ;;  %v39_v38 = vand.u32 15, %v35_v29  ;;  %v44_v44 = vshra.s32 %v36_v37, 4  ;;  %v40_v48 = vand.u32 15, %v36_v37 }
 0xb28   :  { %v687_v19 = vpop.permute.xlu1 %686 }
 0xb29   :  { %v671_v41 = vmul.f32 %v670_v39, %v670_v39  ;;  %vm75_vm8 = vcmp.gt.s32.totalorder %v39_v38, 0  ;;  %v3633_v53 = vand.u32 15, %v44_v44  ;;  %vm76_vm12 = vcmp.gt.s32.totalorder %v40_v48, 0 }
 0xb2a   :  { %v3631_v51 = vsel %vm75_vm8, 1.0, %v3150_v1  ;;  %vm87_vm0 = vcmp.lt.s32.totalorder %v39_v38, 15  ;;  %vm88_vm2 = vcmp.lt.s32.totalorder %v40_v48, 15  ;;  %v3665_v6 = vsel %vm76_vm12, 1.0, %v3150_v1 }
 0xb2b   :  { %672 = vadd.xlane.f32.xlu0 %v671_v41  ;;  %v37_v41 = vadd.s32 384, %v3215_v7  ;;  %vm52_vm11 = vcmp.gt.s32.totalorder %v3633_v53, 0  ;;  %vm1046_vm8 = vcmp.lt.s32.totalorder %v3215_v7, 1 }
 0xb2c   :  { %v3662_v5 = vsel %vm52_vm11, 1.0, %v3150_v1  ;;  %vm62_vm11 = vcmp.lt.s32.totalorder %v3639_v58, 15 }
 0xb2d   :  { %v45_v47 = vshra.s32 %v37_v41, 4  ;;  %v41_v56 = vand.u32 15, %v37_v41 }
 0xb2f   :  { %v3646_v60 = vand.u32 15, %v45_v47  ;;  %vm77_vm13 = vcmp.gt.s32.totalorder %v41_v56, 0  ;;  %vm89_vm6 = vcmp.lt.s32.totalorder %v41_v56, 15 }
 0xb30   :  { %v3668_v8 = vsel %vm77_vm13, 1.0, %v3150_v1  ;;  %v3722_v37 = vsel %vm89_vm6, 1.0, %v3150_v1  ;;  %vm1071_vm13 = vcmp.lt.s32.totalorder %v3215_v7, 127 }
 0xb31   :  { %vm53_vm1 = vcmp.gt.s32.totalorder %v3646_v60, 0 }
 0xb41   :  { %680 = vperm.xlu0 %3082, %v2896_v49  }
 0xbb8   :  { %v673_v9 = vpop.xlane.xlu0 %672 }
 0xbb9   :  { %v674_v10 = vmul.f32 0.0078125, %v673_v9  ;;  %v3671_v9 = vsel %vm74_vm14, 1.0, %v3150_v1  ;;  %vm1092_vm14 = vcmp.lt.s32.totalorder %v3215_v7, 113 }
 0xbbb   :  { %v675_v13 = vadd.f32 1e-05, %v674_v10 }
 0xbbd   :  { %3138 = vrsqrt.f32 %v675_v13  ;;  %v3676_v13 = vsel %vm50_vm15, 1.0, %v3150_v1  ;;  %vm64_vm15 = vcmp.lt.s32.totalorder %v3633_v53, 15 }
 0xbc0   :  { %v681_v17 = vpop.permute.xlu0 %680 }
 0xbc7   :  { %v3139_v14 = vpop.eup %3138 }
 0xbc8   :  { %v677_v31 = vmul.f32 %v3139_v14, %v670_v39  ;;  %v3618_v39 = vand.u32 15, %v43_v33 }
 0xbca   :  { %v683_v18 = vmul.f32 %v681_v17, %v677_v31  ;;  %vm51_vm7 = vcmp.gt.s32.totalorder %v3618_v39, 0  ;;  %v3679_v17 = vsel %vm87_vm0, 1.0, %v3150_v1  ;;  %vm63_vm12 = vcmp.lt.s32.totalorder %v3618_v39, 15 }
 0xbcb   :  { %v3628_v49 = vsel %vm51_vm7, 1.0, %v3150_v1  ;;  %vm1021_vm7 = vcmp.lt.s32.totalorder %v3215_v7, 15  ;;  %v3765_v39 = vsel %vm62_vm11, 1.0, %v3150_v1  ;;  %vm65_vm0 = vcmp.lt.s32.totalorder %v3646_v60, 15 }
 0xbcc   :  { %v689_v11 = vadd.f32 %v687_v19, %v683_v18  ;;  %v3643_v59 = vmul.f32 %v3631_v51, %v3628_v49  ;;  %v3682_v18 = vsel %vm53_vm1, 1.0, %v3150_v1  ;;  %v3685_v19 = vsel %vm88_vm2, 1.0, %v3150_v1 }
 0xbcd   :  { %vm1117_vm1 = vcmp.lt.s32.totalorder %v3215_v7, 112  ;;  %v3831_v53 = vsel %vm65_vm0, 1.0, %v3150_v1  ;;  %vm1138_vm2 = vcmp.lt.s32.totalorder %v3215_v7, 111  ;;  %v2958_v7 = vld [vmem:[%s4693_s2 + $0x24] sm:$0xf] }
 0xbce   :  { %v690_v15 = vadd.f32 %v689_v11, %v3350_v16  ;;  %v3689_v11 = vmul.f32 %v3665_v6, %v3662_v5 }
 0xbd0   :  { %v691_v20 = vmax.f32 %v690_v15, 0.0 }
 0xbd2   :  { %v692_v21 = vpack.c.bf16 %v691_v20, %v691_v20  ;;  %v3696_v20 = vmul.f32 %v3671_v9, %v3676_v13 }
 0xbd4   :  { %918 = vmatmul.mubr.bf16.vlgmr.msra.gmra.mrb[8].mxu1 %v692_v21  ;;  %959 = vmatmul.mubr.bf16.vlgmr.msra.gmra.mrb[12].mxu0 %v692_v21  ;;  %v3700_v21 = vmul.f32 %v3668_v8, %v3682_v18 }
 0xbd5   :  { %1260 = vmatprep.mubr.bf16.mxu1 %v3160_v4  ;;  %1301 = vmatprep.mubr.bf16.mxu0 %v3160_v4 }
 0xca7   :  { %v3524_v12 = vpop.f32.mrb[8].mxu1  ;;  %v3526_v40 = vpop.f32.mrb[12].mxu0 }
 0xca8   :  { %967 = vrot.lane.b32.xlu1 %v3524_v12, %s3161_s1  ;;  %v3530_v22 = vpop.f32.mrb[9].mxu1  ;;  %996 = vrot.lane.b32.xlu0 %v3526_v40, %s3162_s21  ;;  %v3534_v16 = vpop.f32.mrb[13].mxu0 }
 0xca9   :  { %v923_v23 = vpop.f32.mrb[10].mxu1  ;;  %v964_v35 = vpop.f32.mrb[14].mxu0 }
 0xcaa   :  { %v924_v24 = vpop.f32.mrb[11].mxu1  ;;  %v965_v46 = vpop.f32.mrb[15].mxu0 }
 0xcab   :  { %v3711_v24 = vmul.f32 %v3679_v17, %v3628_v49  ;;  %v3715_v46 = vmul.f32 %v3685_v19, %v3662_v5 }
 0xcac   :  { %992 = vrot.lane.b32.xlu1 %v3524_v12, %s3162_s21  ;;  %1042 = vrot.lane.b32.xlu0 %v3526_v40, %s3153_s25 }
 0xcb0   :  { %1067 = vrot.lane.b32.xlu0 %v3526_v40, %s3157_s29  ;;  %971 = vrot.lane.b32.xlu1 %v3526_v40, %s3161_s1 }
 0xcb4   :  { %1088 = vrot.lane.b32.xlu0 %v3526_v40, %s3163_s22  ;;  %1013 = vrot.lane.b32.xlu1 %v3524_v12, %s3164_s23 }
 0xcb8   :  { %1113 = vrot.lane.b32.xlu0 %v3526_v40, %s3165_s24  ;;  %1038 = vrot.lane.b32.xlu1 %v3524_v12, %s3153_s25 }
 0xcbc   :  { %1109 = vrot.lane.b32.xlu0 %v3524_v12, %s3165_s24  ;;  %1017 = vrot.lane.b32.xlu1 %v3526_v40, %s3164_s23 }
 0xcc0   :  { %969 = vrot.lane.b32.xlu0 %v3530_v22, %s3161_s1  ;;  %1063 = vrot.lane.b32.xlu1 %v3524_v12, %s3157_s29 }
 0xcc4   :  { %994 = vrot.lane.b32.xlu0 %v3530_v22, %s3162_s21  ;;  %1084 = vrot.lane.b32.xlu1 %v3524_v12, %s3163_s22 }
 0xcc8   :  { %1130 = vrot.lane.b32.xlu1 %v3524_v12, %s3166_s0  ;;  %998 = vrot.lane.b32.xlu0 %v3534_v16, %s3162_s21 }
 0xccc   :  { %1015 = vrot.lane.b32.xlu0 %v3530_v22, %s3164_s23  ;;  %973 = vrot.lane.b32.xlu1 %v3534_v16, %s3161_s1 }
 0xcd0   :  { %1040 = vrot.lane.b32.xlu0 %v3530_v22, %s3153_s25  ;;  %1019 = vrot.lane.b32.xlu1 %v3534_v16, %s3164_s23 }
 0xcd4   :  { %1044 = vrot.lane.b32.xlu0 %v3534_v16, %s3153_s25  ;;  %1065 = vrot.lane.b32.xlu1 %v3530_v22, %s3157_s29 }
 0xcd8   :  { %1069 = vrot.lane.b32.xlu0 %v3534_v16, %s3157_s29  ;;  %1086 = vrot.lane.b32.xlu1 %v3530_v22, %s3163_s22 }
 0xcdc   :  { %1115 = vrot.lane.b32.xlu0 %v3534_v16, %s3165_s24  ;;  %1111 = vrot.lane.b32.xlu1 %v3530_v22, %s3165_s24 }
 0xce0   :  { %1132 = vrot.lane.b32.xlu0 %v3530_v22, %s3166_s0  ;;  %1090 = vrot.lane.b32.xlu1 %v3534_v16, %s3163_s22 }
 0xce4   :  { %1136 = vrot.lane.b32.xlu0 %v3534_v16, %s3166_s0  ;;  %1134 = vrot.lane.b32.xlu1 %v3526_v40, %s3166_s0 }
 0xd1a   :  { %v3596_v50 = vpop.permute.xlu1 %967  ;;  %v3598_v52 = vpop.permute.xlu0 %996 }
 0xd1e   :  { %v3600_v25 = vpop.permute.xlu1 %992  ;;  %v3602_v26 = vpop.permute.xlu0 %1042 }
 0xd22   :  { %v3604_v27 = vpop.permute.xlu0 %1067  ;;  %v3606_v28 = vpop.permute.xlu1 %971 }
 0xd26   :  { %v3609_v30 = vpop.permute.xlu0 %1088  ;;  %v3611_v32 = vpop.permute.xlu1 %1013 }
 0xd2a   :  { %v3613_v34 = vpop.permute.xlu0 %1113  ;;  %v3615_v36 = vpop.permute.xlu1 %1038 }
 0xd2e   :  { %v3621_v42 = vpop.permute.xlu0 %1109  ;;  %v3623_v43 = vpop.permute.xlu1 %1017 }
 0xd32   :  { %v970_v54 = vpop.permute.xlu0 %969  ;;  %v3636_v55 = vpop.permute.xlu1 %1063 }
 0xd33   :  { %v978_v61 = vsel %vm975_vm9, %v3596_v50, %v970_v54 }
 0xd34   :  { %v985_v2 = vmul.f32 %v3643_v59, %v978_v61 }
 0xd36   :  { %v995_v62 = vpop.permute.xlu0 %994  ;;  %v3652_v63 = vpop.permute.xlu1 %1084 }
 0xd37   :  { %v1003_v0 = vsel %vm1000_vm10, %v3600_v25, %v995_v62  ;;  %v1002_v15 = vsel %vm1000_vm10, %v995_v62, %v3598_v52 }
 0xd38   :  { %v1006_v3 = vmul.f32 %v3628_v49, %v1003_v0  ;;  %v1007_v38 = vmul.f32 %v3662_v5, %v1002_v15 }
 0xd3a   :  { %v3673_v10 = vpop.permute.xlu1 %1130  ;;  %v999_v14 = vpop.permute.xlu0 %998  ;;  %v1194_v31 = vpack.c.bf16 %v1006_v3, %v985_v2 }
 0xd3b   :  { %v1001_v23 = vsel %vm1000_vm10, %v3598_v52, %v999_v14  ;;  %v1004_v35 = vsel %vm1000_vm10, %v999_v14, %v3600_v25  ;;  %v3719_v52 = vsel %vm86_vm5, 1.0, %v3150_v1  ;;  %v977_v25 = vsel %vm975_vm9, %v970_v54, %v3606_v28 }
 0xd3c   :  { %1228 = vmatprep.subr.bf16.mxu1 %v1194_v31  ;;  %v1005_v45 = vmul.f32 %v3676_v13, %v1004_v35  ;;  %v1008_v47 = vmul.f32 %v3682_v18, %v1001_v23  ;;  %v3743_v57 = vmul.f32 %v3719_v52, %v3676_v13 }
 0xd3e   :  { %v1016_v29 = vpop.permute.xlu0 %1015  ;;  %v974_v33 = vpop.permute.xlu1 %973 }
 0xd3f   :  { %v976_v41 = vsel %vm975_vm9, %v3606_v28, %v974_v33  ;;  %v979_v44 = vsel %vm975_vm9, %v974_v33, %v3596_v50  ;;  %v1024_v54 = vsel %vm1021_vm7, %v3611_v32, %v1016_v29  ;;  %v3747_v28 = vmul.f32 %v3722_v37, %v3682_v18 }
 0xd40   :  { %v984_v48 = vmul.f32 %v3696_v20, %v979_v44  ;;  %v987_v56 = vmul.f32 %v3700_v21, %v976_v41  ;;  %v986_v50 = vmul.f32 %v3689_v11, %v977_v25  ;;  %v1031_v15 = vmul.f32 %v3711_v24, %v1024_v54 }
 0xd41   :  { %v3771_v33 = vsel %vm63_vm12, 1.0, %v3150_v1 }
 0xd42   :  { %v1193_v61 = vpack.c.bf16 %v1005_v45, %v984_v48  ;;  %v1041_v62 = vpop.permute.xlu0 %1040  ;;  %v1020_v0 = vpop.permute.xlu1 %1019  ;;  %v1196_v2 = vpack.c.bf16 %v1008_v47, %v987_v56  ;;  %v1195_v31 = vpack.c.bf16 %v1007_v38, %v986_v50 }
 0xd43   :  { %v1048_v3 = vsel %vm1046_vm8, %v1041_v62, %v3602_v26  ;;  %v1049_v14 = vsel %vm1046_vm8, %v3615_v36, %v1041_v62  ;;  %v1025_v58 = vsel %vm1021_vm7, %v1020_v0, %v3611_v32  ;;  %v1022_v35 = vsel %vm1021_vm7, %v3623_v43, %v1020_v0 }
 0xd44   :  { %v1052_v23 = vmul.f32 %v3631_v51, %v1049_v14  ;;  %1229 = vmatpush1.bf16.msra.mxu1 %v1193_v61  ;;  %1269 = vmatprep.subr.bf16.mxu0 %v1196_v2  ;;  %v1023_v32 = vsel %vm1021_vm7, %v1016_v29, %v3623_v43  ;;  %v1053_v25 = vmul.f32 %v3665_v6, %v1048_v3 }
 0xd45   :  { %v1030_v38 = vmul.f32 %v3743_v57, %v1025_v58  ;;  %1270 = vmatpush1.bf16.msra.mxu0 %v1195_v31  ;;  %v1033_v56 = vmul.f32 %v3747_v28, %v1022_v35  ;;  %v1032_v61 = vmul.f32 %v3715_v46, %v1023_v32  ;;  %v3803_v62 = vmul.f32 %v3631_v51, %v3771_v33 }
 0xd46   :  { %v1045_v41 = vpop.permute.xlu0 %1044  ;;  %v1066_v44 = vpop.permute.xlu1 %1065  ;;  %v1198_v45 = vpack.c.bf16 %v1052_v23, %v1031_v15  ;;  %v3817_v35 = vsel %vm64_vm15, 1.0, %v3150_v1 }
 0xd47   :  { %v1047_v47 = vsel %vm1046_vm8, %v3602_v26, %v1045_v41  ;;  %v1050_v48 = vsel %vm1046_vm8, %v1045_v41, %v3615_v36  ;;  %v1073_v43 = vsel %vm1071_vm13, %v1066_v44, %v3604_v27  ;;  %v1074_v29 = vsel %vm1071_vm13, %v3636_v55, %v1066_v44 }
 0xd48   :  { %v1051_v54 = vmul.f32 %v3671_v9, %v1050_v48  ;;  %v1054_v50 = vmul.f32 %v3668_v8, %v1047_v47  ;;  %v1077_v26 = vmul.f32 %v3679_v17, %v1073_v43  ;;  %1230 = vmatprep.subr.bf16.mxu1 %v1198_v45  ;;  %v3799_v36 = vmul.f32 %v3671_v9, %v3765_v39 }
 0xd49   :  { %v1076_v2 = vmul.f32 %v3719_v52, %v1074_v29  ;;  %v1199_v32 = vpack.c.bf16 %v1053_v25, %v1032_v61  ;;  %v3836_v25 = vmul.f32 %v3719_v52, %v3765_v39  ;;  %v3843_v60 = vmul.f32 %v3665_v6, %v3817_v35 }
 0xd4a   :  { %v1197_v0 = vpack.c.bf16 %v1051_v54, %v1030_v38  ;;  %v1070_v3 = vpop.permute.xlu0 %1069  ;;  %v1087_v14 = vpop.permute.xlu1 %1086  ;;  %v1200_v58 = vpack.c.bf16 %v1054_v50, %v1033_v56  ;;  %v1202_v31 = vpack.c.bf16 %v1077_v26, %v3530_v22  ;;  %v3867_v26 = vmul.f32 %v3722_v37, %v3831_v53 }
 0xd4b   :  { %v1072_v15 = vsel %vm1071_vm13, %v3604_v27, %v1070_v3  ;;  %v1075_v23 = vsel %vm1071_vm13, %v1070_v3, %v3636_v55  ;;  %v1095_v27 = vsel %vm1092_vm14, %v3652_v63, %v1087_v14  ;;  %v1094_v55 = vsel %vm1092_vm14, %v1087_v14, %v3609_v30 }
 0xd4c   :  { %v1078_v38 = vmul.f32 %v3685_v19, %v1072_v15  ;;  %v1079_v22 = vmul.f32 %v3722_v37, %v1075_v23  ;;  %1231 = vmatpush1.bf16.msra.mxu1 %v1197_v0  ;;  %1271 = vmatprep.subr.bf16.mxu0 %v1200_v58  ;;  %v1201_v41 = vpack.c.bf16 %v1076_v2, %v3524_v12 }
 0xd4d   :  { %1232 = vmatprep.subr.bf16.mxu1 %v1202_v31  ;;  %1272 = vmatpush1.bf16.msra.mxu0 %v1199_v32  ;;  %v1101_v1 = vmul.f32 %v3799_v36, %v1095_v27  ;;  %v3875_v14 = vmul.f32 %v3685_v19, %v3817_v35 }
 0xd4e   :  { %v1203_v44 = vpack.c.bf16 %v1078_v38, %v3526_v40  ;;  %v1116_v45 = vpop.permute.xlu0 %1115  ;;  %v1112_v47 = vpop.permute.xlu1 %1111  ;;  %v1204_v48 = vpack.c.bf16 %v1079_v22, %v3534_v16  ;;  %v3854_v40 = vmul.f32 %v3668_v8, %v3831_v53  ;;  %v1102_v16 = vmul.f32 %v3803_v62, %v1094_v55 }
 0xd4f   :  { %v1119_v43 = vsel %vm1117_vm1, %v1112_v47, %v3613_v34  ;;  %v1120_v12 = vsel %vm1117_vm1, %v3621_v42, %v1112_v47  ;;  %v1118_v29 = vsel %vm1117_vm1, %v3613_v34, %v1116_v45  ;;  %v1121_v50 = vsel %vm1117_vm1, %v1116_v45, %v3621_v42 }
 0xd50   :  { %v1122_v56 = vmul.f32 %v3765_v39, %v1120_v12  ;;  %v1123_v54 = vmul.f32 %v3771_v33, %v1119_v43  ;;  %1233 = vmatpush1.bf16.msra.mxu1 %v1201_v41  ;;  %1273 = vmatprep.subr.bf16.mxu0 %v1204_v48  ;;  %v3871_v34 = vmul.f32 %v3679_v17, %v3771_v33 }
 0xd51   :  { %1274 = vmatpush1.bf16.msra.mxu0 %v1203_v44  ;;  %v1124_v42 = vmul.f32 %v3817_v35, %v1118_v29  ;;  %v1125_v23 = vmul.f32 %v3831_v53, %v1121_v50 }
 0xd52   :  { %v1205_v61 = vpack.c.bf16 %v1122_v56, %v1101_v1  ;;  %v1133_v0 = vpop.permute.xlu0 %1132  ;;  %v1091_v2 = vpop.permute.xlu1 %1090  ;;  %v1206_v3 = vpack.c.bf16 %v1123_v54, %v1102_v16  ;;  %v2930_v54 = vld [vmem:[%s4693_s2 + $0x14] sm:$0xf] }
 0xd53   :  { %v1141_v58 = vsel %vm1138_vm2, %v3673_v10, %v1133_v0  ;;  %v1093_v31 = vsel %vm1092_vm14, %v3609_v30, %v1091_v2  ;;  %v1096_v15 = vsel %vm1092_vm14, %v1091_v2, %v3652_v63 }
 0xd54   :  { %v1147_v32 = vmul.f32 %v3836_v25, %v1141_v58  ;;  %v1103_v38 = vmul.f32 %v3843_v60, %v1093_v31  ;;  %v1104_v22 = vmul.f32 %v3854_v40, %v1096_v15  ;;  %1234 = vmatprep.subr.bf16.mxu1 %v1206_v3 }
 0xd55   :  { %1235 = vmatpush1.bf16.msra.mxu1 %v1205_v61 }
 0xd56   :  { %v1207_v27 = vpack.c.bf16 %v1124_v42, %v1103_v38  ;;  %v1137_v55 = vpop.permute.xlu0 %1136  ;;  %v1135_v41 = vpop.permute.xlu1 %1134  ;;  %v1208_v44 = vpack.c.bf16 %v1125_v23, %v1104_v22  ;;  %v1209_v47 = vpack.c.bf16 %v1147_v32, %v1147_v32  ;;  %v2936_v38 = vld [vmem:[%s4694_s3 + $0x48] sm:$0xff] }
 0xd57   :  { %v1142_v30 = vsel %vm1138_vm2, %v1137_v55, %v3673_v10  ;;  %v1139_v63 = vsel %vm1138_vm2, %v1135_v41, %v1137_v55  ;;  %v1140_v45 = vsel %vm1138_vm2, %v1133_v0, %v1135_v41 }
 0xd58   :  { %v1150_v48 = vmul.f32 %v3867_v26, %v1142_v30  ;;  %v1148_v1 = vmul.f32 %v3871_v34, %v1140_v45  ;;  %v1149_v43 = vmul.f32 %v3875_v14, %v1139_v63  ;;  %1275 = vmatprep.subr.bf16.mxu0 %v1208_v44  ;;  %v1217_v10 = vsel %vm151_vm3, %v1209_v47, 0 }
 0xd59   :  { %1276 = vmatpush1.bf16.msra.mxu0 %v1207_v27 }
 0xd5a   :  { %v1212_v12 = vpack.c.bf16 %v1150_v48, %v1150_v48  ;;  %v1210_v16 = vpack.c.bf16 %v1148_v1, %v1148_v1  ;;  %v1211_v29 = vpack.c.bf16 %v1149_v43, %v1149_v43 }
 0xd5c   :  { %2931 = vmatprep.subr.msk.bf16.mxu1 %vm151_vm3, %v1210_v16  ;;  %2933 = vmatprep.subr.msk.bf16.mxu0 %vm151_vm3, %v1212_v12  ;;  %v1223_v56 = vsel %vm151_vm3, %v1211_v29, 0  ;;  %v2935_v16 = vld [vmem:[%s4694_s3 + $0x40] sm:$0xff] }
 0xd5d   :  { %1237 = vmatpush1.bf16.msra.mxu1 %v1217_v10  ;;  %1278 = vmatpush1.bf16.msra.mxu0 %v1223_v56 }
 0xd60   :  { %2932 = vmatmul.mubr.msk.bf16.vlgmr.msra.gmra.mrb[12].mxu1 %vm147_vm4, %v2930_v54  ;;  %2934 = vmatmul.mubr.msk.bf16.vlgmr.msra.gmra.mrb[16].mxu0 %vm147_vm4, %v2930_v54 }
 0xd61   :  { %1631 = vmatprep.mubr.bf16.mxu1 %v3160_v4  ;;  %1672 = vmatprep.mubr.bf16.mxu0 %v3160_v4 }
 0xe33   :  { %v1262_v50 = vpop.f32.mrb[12].mxu1  ;;  %v1303_v61 = vpop.f32.mrb[16].mxu0 }
 0xe34   :  { %v1264_v0 = vpop.f32.mrb[13].mxu1  ;;  %v1305_v2 = vpop.f32.mrb[17].mxu0 }
 0xe35   :  { %v1314_v3 = vadd.f32 %v1264_v0, %v1262_v50  ;;  %v1266_v42 = vpop.f32.mrb[14].mxu1  ;;  %v1307_v58 = vpop.f32.mrb[18].mxu0 }
 0xe36   :  { %v1267_v31 = vpop.f32.mrb[15].mxu1  ;;  %v1308_v15 = vpop.f32.mrb[19].mxu0 }
 0xe37   :  { %v1315_v23 = vadd.f32 %v1314_v3, %v1303_v61 }
 0xe39   :  { %v1316_v32 = vadd.f32 %v1315_v23, %v1305_v2 }
 0xe3b   :  { %1317 = vadd.xlane.f32.xlu1 %v1316_v32 }
 0xe4c   :  { %1351 = vperm.xlu1 %3083, %v2936_v38  }
 0xec8   :  { %v1318_v22 = vpop.xlane.xlu1 %1317 }
 0xec9   :  { %v1319_v27 = vmul.f32 0.001953125, %v1318_v22 }
 0xecb   :  { %v1320_v55 = vsub.f32 %v1262_v50, %v1319_v27  ;;  %v1321_v41 = vsub.f32 %v1264_v0, %v1319_v27  ;;  %v1322_v44 = vsub.f32 %v1303_v61, %v1319_v27  ;;  %v1323_v30 = vsub.f32 %v1305_v2, %v1319_v27 }
 0xecc   :  { %v1352_v58 = vpop.permute.xlu1 %1351 }
 0xecd   :  { %v1324_v63 = vmul.f32 %v1320_v55, %v1320_v55  ;;  %v1325_v45 = vmul.f32 %v1321_v41, %v1321_v41  ;;  %v1326_v47 = vmul.f32 %v1322_v44, %v1322_v44  ;;  %v1327_v1 = vmul.f32 %v1323_v30, %v1323_v30 }
 0xecf   :  { %v1328_v48 = vadd.f32 %v1325_v45, %v1324_v63 }
 0xed1   :  { %v1329_v43 = vadd.f32 %v1328_v48, %v1326_v47 }
 0xed3   :  { %v1330_v12 = vadd.f32 %v1329_v43, %v1327_v1 }
 0xed5   :  { %1331 = vadd.xlane.f32.xlu0 %v1330_v12 }
 0xeeb   :  { %1342 = vperm.xlu0 %3082, %v2935_v16  }
 0xf62   :  { %v1332_v29 = vpop.xlane.xlu0 %1331 }
 0xf63   :  { %v1333_v10 = vmul.f32 0.001953125, %v1332_v29 }
 0xf65   :  { %v1334_v56 = vadd.f32 1e-05, %v1333_v10 }
 0xf67   :  { %3140 = vrsqrt.f32 %v1334_v56 }
 0xf6a   :  { %v1343_v0 = vpop.permute.xlu0 %1342 }
 0xf71   :  { %v3141_v54 = vpop.eup %3140 }
 0xf72   :  { %v1336_v50 = vmul.f32 %v3141_v54, %v1320_v55  ;;  %v1337_v61 = vmul.f32 %v3141_v54, %v1321_v41  ;;  %v1339_v2 = vmul.f32 %v3141_v54, %v1323_v30  ;;  %v1338_v23 = vmul.f32 %v3141_v54, %v1322_v44 }
 0xf74   :  { %v1345_v3 = vmul.f32 %v1343_v0, %v1336_v50  ;;  %v1346_v42 = vmul.f32 %v1343_v0, %v1337_v61  ;;  %v1348_v32 = vmul.f32 %v1343_v0, %v1339_v2  ;;  %v1347_v27 = vmul.f32 %v1343_v0, %v1338_v23 }
 0xf76   :  { %v1354_v31 = vadd.f32 %v1352_v58, %v1345_v3  ;;  %v1355_v15 = vadd.f32 %v1352_v58, %v1346_v42  ;;  %v1357_v55 = vadd.f32 %v1352_v58, %v1348_v32  ;;  %v1356_v41 = vadd.f32 %v1352_v58, %v1347_v27 }
 0xf78   :  { %v3918_v38 = vmax.f32 %v1354_v31, 0.0  ;;  %v3920_v22 = vmax.f32 %v1355_v15, 0.0  ;;  %v3930_v44 = vmax.f32 %v1357_v55, 0.0  ;;  %v3936_v30 = vmax.f32 %v1356_v41, 0.0 }
 0xf7a   :  { %1364 = vrot.lane.b32.xlu0 %v3920_v22, %s3161_s1  ;;  %1362 = vrot.lane.b32.xlu1 %v3918_v38, %s3161_s1 }
 0xf7e   :  { %1384 = vrot.lane.b32.xlu0 %v3920_v22, %s3162_s21  ;;  %1382 = vrot.lane.b32.xlu1 %v3918_v38, %s3162_s21 }
 0xf82   :  { %1388 = vrot.lane.b32.xlu0 %v3930_v44, %s3162_s21  ;;  %1368 = vrot.lane.b32.xlu1 %v3930_v44, %s3161_s1 }
 0xf86   :  { %1386 = vrot.lane.b32.xlu0 %v3936_v30, %s3162_s21  ;;  %1366 = vrot.lane.b32.xlu1 %v3936_v30, %s3161_s1 }
 0xf8a   :  { %1404 = vrot.lane.b32.xlu0 %v3920_v22, %s3164_s23  ;;  %1402 = vrot.lane.b32.xlu1 %v3918_v38, %s3164_s23 }
 0xf8e   :  { %1424 = vrot.lane.b32.xlu0 %v3920_v22, %s3153_s25  ;;  %1422 = vrot.lane.b32.xlu1 %v3918_v38, %s3153_s25 }
 0xf92   :  { %1428 = vrot.lane.b32.xlu0 %v3930_v44, %s3153_s25  ;;  %1408 = vrot.lane.b32.xlu1 %v3930_v44, %s3164_s23 }
 0xf96   :  { %1426 = vrot.lane.b32.xlu0 %v3936_v30, %s3153_s25  ;;  %1406 = vrot.lane.b32.xlu1 %v3936_v30, %s3164_s23 }
 0xf9a   :  { %1450 = vrot.lane.b32.xlu0 %v3936_v30, %s3157_s29  ;;  %1448 = vrot.lane.b32.xlu1 %v3920_v22, %s3157_s29 }
 0xf9e   :  { %1452 = vrot.lane.b32.xlu0 %v3930_v44, %s3157_s29  ;;  %1446 = vrot.lane.b32.xlu1 %v3918_v38, %s3157_s29 }
 0xfa2   :  { %1470 = vrot.lane.b32.xlu0 %v3936_v30, %s3163_s22  ;;  %1468 = vrot.lane.b32.xlu1 %v3920_v22, %s3163_s22 }
 0xfa6   :  { %1490 = vrot.lane.b32.xlu0 %v3936_v30, %s3165_s24  ;;  %1488 = vrot.lane.b32.xlu1 %v3920_v22, %s3165_s24 }
 0xfaa   :  { %1486 = vrot.lane.b32.xlu0 %v3918_v38, %s3165_s24  ;;  %1466 = vrot.lane.b32.xlu1 %v3918_v38, %s3163_s22 }
 0xfae   :  { %1492 = vrot.lane.b32.xlu0 %v3930_v44, %s3165_s24  ;;  %1472 = vrot.lane.b32.xlu1 %v3930_v44, %s3163_s22 }
 0xfb2   :  { %1508 = vrot.lane.b32.xlu0 %v3920_v22, %s3166_s0  ;;  %1506 = vrot.lane.b32.xlu1 %v3918_v38, %s3166_s0 }
 0xfb6   :  { %1512 = vrot.lane.b32.xlu0 %v3930_v44, %s3166_s0  ;;  %1510 = vrot.lane.b32.xlu1 %v3936_v30, %s3166_s0 }
 0xfec   :  { %v1365_v63 = vpop.permute.xlu0 %1364  ;;  %v1363_v45 = vpop.permute.xlu1 %1362 }
 0xfed   :  { %v1372_v47 = vsel %vm975_vm9, %v1363_v45, %v1365_v63 }
 0xfee   :  { %v1375_v12 = vmul.f32 %v1372_v47, %v3643_v59 }
 0xff0   :  { %v1385_v48 = vpop.permute.xlu0 %1384  ;;  %v1383_v1 = vpop.permute.xlu1 %1382 }
 0xff1   :  { %v1392_v43 = vsel %vm1000_vm10, %v1383_v1, %v1385_v48 }
 0xff2   :  { %v1395_v16 = vmul.f32 %v3628_v49, %v1392_v43 }
 0xff4   :  { %v1389_v29 = vpop.permute.xlu0 %1388  ;;  %v1369_v10 = vpop.permute.xlu1 %1368  ;;  %v1565_v56 = vpack.c.bf16 %v1395_v16, %v1375_v12 }
 0xff5   :  { %v1393_v54 = vsel %vm1000_vm10, %v1389_v29, %v1383_v1  ;;  %v1373_v50 = vsel %vm975_vm9, %v1369_v10, %v1363_v45 }
 0xff6   :  { %v1394_v61 = vmul.f32 %v3676_v13, %v1393_v54  ;;  %v1374_v0 = vmul.f32 %v1373_v50, %v3696_v20  ;;  %1599 = vmatprep.subr.bf16.mxu1 %v1565_v56 }
 0xff8   :  { %v1564_v2 = vpack.c.bf16 %v1394_v61, %v1374_v0  ;;  %v1387_v3 = vpop.permute.xlu0 %1386  ;;  %v1367_v42 = vpop.permute.xlu1 %1366 }
 0xff9   :  { %v1390_v58 = vsel %vm1000_vm10, %v1387_v3, %v1389_v29  ;;  %v1391_v31 = vsel %vm1000_vm10, %v1385_v48, %v1387_v3  ;;  %v1370_v15 = vsel %vm975_vm9, %v1367_v42, %v1369_v10  ;;  %v1371_v23 = vsel %vm975_vm9, %v1365_v63, %v1367_v42 }
 0xffa   :  { %v1396_v32 = vmul.f32 %v3662_v5, %v1391_v31  ;;  %v1397_v27 = vmul.f32 %v3682_v18, %v1390_v58  ;;  %v1376_v55 = vmul.f32 %v1371_v23, %v3689_v11  ;;  %v1377_v41 = vmul.f32 %v1370_v15, %v3700_v21  ;;  %1600 = vmatpush1.bf16.msra.mxu1 %v1564_v2 }
 0xffc   :  { %v1566_v45 = vpack.c.bf16 %v1396_v32, %v1376_v55  ;;  %v1405_v47 = vpop.permute.xlu0 %1404  ;;  %v1403_v1 = vpop.permute.xlu1 %1402  ;;  %v1567_v43 = vpack.c.bf16 %v1397_v27, %v1377_v41 }
 0xffd   :  { %v1412_v48 = vsel %vm1021_vm7, %v1403_v1, %v1405_v47 }
 0xffe   :  { %1640 = vmatprep.subr.bf16.mxu0 %v1567_v43  ;;  %v1415_v29 = vmul.f32 %v1412_v48, %v3711_v24 }
 0xfff   :  { %1641 = vmatpush1.bf16.msra.mxu0 %v1566_v45 }
0x1000   :  { %v1425_v12 = vpop.permute.xlu0 %1424  ;;  %v1423_v63 = vpop.permute.xlu1 %1422 }
0x1001   :  { %v1432_v16 = vsel %vm1046_vm8, %v1423_v63, %v1425_v12 }
0x1002   :  { %v1435_v10 = vmul.f32 %v3631_v51, %v1432_v16 }
0x1004   :  { %v1429_v56 = vpop.permute.xlu0 %1428  ;;  %v1409_v54 = vpop.permute.xlu1 %1408  ;;  %v1569_v50 = vpack.c.bf16 %v1435_v10, %v1415_v29 }
0x1005   :  { %v1433_v61 = vsel %vm1046_vm8, %v1429_v56, %v1423_v63  ;;  %v1413_v0 = vsel %vm1021_vm7, %v1409_v54, %v1403_v1 }
0x1006   :  { %v1434_v2 = vmul.f32 %v3671_v9, %v1433_v61  ;;  %v1414_v3 = vmul.f32 %v1413_v0, %v3743_v57  ;;  %1601 = vmatprep.subr.bf16.mxu1 %v1569_v50 }
0x1008   :  { %v1568_v42 = vpack.c.bf16 %v1434_v2, %v1414_v3  ;;  %v1427_v58 = vpop.permute.xlu0 %1426  ;;  %v1407_v31 = vpop.permute.xlu1 %1406 }
0x1009   :  { %v1430_v15 = vsel %vm1046_vm8, %v1427_v58, %v1429_v56  ;;  %v1431_v23 = vsel %vm1046_vm8, %v1425_v12, %v1427_v58  ;;  %v1410_v32 = vsel %vm1021_vm7, %v1407_v31, %v1409_v54  ;;  %v1411_v27 = vsel %vm1021_vm7, %v1405_v47, %v1407_v31 }
0x100a   :  { %v1436_v55 = vmul.f32 %v3665_v6, %v1431_v23  ;;  %v1437_v41 = vmul.f32 %v3668_v8, %v1430_v15  ;;  %v1416_v45 = vmul.f32 %v1411_v27, %v3715_v46  ;;  %v1417_v1 = vmul.f32 %v1410_v32, %v3747_v28  ;;  %1602 = vmatpush1.bf16.msra.mxu1 %v1568_v42 }
0x100c   :  { %v1570_v43 = vpack.c.bf16 %v1436_v55, %v1416_v45  ;;  %v1451_v48 = vpop.permute.xlu0 %1450  ;;  %v1449_v63 = vpop.permute.xlu1 %1448  ;;  %v1571_v16 = vpack.c.bf16 %v1437_v41, %v1417_v1 }
0x100d   :  { %v1455_v12 = vsel %vm1071_vm13, %v1449_v63, %v1451_v48 }
0x100e   :  { %v1459_v29 = vmul.f32 %v3679_v17, %v1455_v12  ;;  %1642 = vmatprep.subr.bf16.mxu0 %v1571_v16 }
0x100f   :  { %1643 = vmatpush1.bf16.msra.mxu0 %v1570_v43 }
0x1010   :  { %v1453_v47 = vpop.permute.xlu0 %1452  ;;  %v1447_v10 = vpop.permute.xlu1 %1446  ;;  %v1573_v56 = vpack.c.bf16 %v1459_v29, %v3920_v22 }
0x1011   :  { %v1454_v54 = vsel %vm1071_vm13, %v1451_v48, %v1453_v47  ;;  %v1456_v50 = vsel %vm1071_vm13, %v1447_v10, %v1449_v63  ;;  %v1457_v61 = vsel %vm1071_vm13, %v1453_v47, %v1447_v10 }
0x1012   :  { %v1460_v0 = vmul.f32 %v3685_v19, %v1454_v54  ;;  %v1458_v2 = vmul.f32 %v3719_v52, %v1456_v50  ;;  %v1461_v3 = vmul.f32 %v3722_v37, %v1457_v61  ;;  %1603 = vmatprep.subr.bf16.mxu1 %v1573_v56 }
0x1014   :  { %v1574_v42 = vpack.c.bf16 %v1460_v0, %v3936_v30  ;;  %v1572_v58 = vpack.c.bf16 %v1458_v2, %v3918_v38  ;;  %v1471_v31 = vpop.permute.xlu0 %1470  ;;  %v1469_v15 = vpop.permute.xlu1 %1468  ;;  %v1575_v23 = vpack.c.bf16 %v1461_v3, %v3930_v44 }
0x1015   :  { %v1475_v32 = vsel %vm1092_vm14, %v1469_v15, %v1471_v31 }
0x1016   :  { %1604 = vmatpush1.bf16.msra.mxu1 %v1572_v58  ;;  %1644 = vmatprep.subr.bf16.mxu0 %v1575_v23  ;;  %v1479_v45 = vmul.f32 %v1475_v32, %v3803_v62 }
0x1017   :  { %1645 = vmatpush1.bf16.msra.mxu0 %v1574_v42 }
0x1018   :  { %v1491_v27 = vpop.permute.xlu0 %1490  ;;  %v1489_v55 = vpop.permute.xlu1 %1488 }
0x1019   :  { %v1495_v41 = vsel %vm1117_vm1, %v1489_v55, %v1491_v27 }
0x101a   :  { %v1499_v1 = vmul.f32 %v3771_v33, %v1495_v41 }
0x101c   :  { %v1487_v43 = vpop.permute.xlu0 %1486  ;;  %v1467_v48 = vpop.permute.xlu1 %1466  ;;  %v1577_v63 = vpack.c.bf16 %v1499_v1, %v1479_v45 }
0x101d   :  { %v1496_v16 = vsel %vm1117_vm1, %v1487_v43, %v1489_v55  ;;  %v1476_v12 = vsel %vm1092_vm14, %v1467_v48, %v1469_v15 }
0x101e   :  { %v1498_v29 = vmul.f32 %v3765_v39, %v1496_v16  ;;  %v1478_v47 = vmul.f32 %v1476_v12, %v3799_v36  ;;  %1605 = vmatprep.subr.bf16.mxu1 %v1577_v63 }
0x1020   :  { %v1576_v10 = vpack.c.bf16 %v1498_v29, %v1478_v47  ;;  %v1493_v56 = vpop.permute.xlu0 %1492  ;;  %v1473_v54 = vpop.permute.xlu1 %1472 }
0x1021   :  { %v1494_v50 = vsel %vm1117_vm1, %v1491_v27, %v1493_v56  ;;  %v1497_v61 = vsel %vm1117_vm1, %v1493_v56, %v1487_v43  ;;  %v1474_v0 = vsel %vm1092_vm14, %v1471_v31, %v1473_v54  ;;  %v1477_v2 = vsel %vm1092_vm14, %v1473_v54, %v1467_v48 }
0x1022   :  { %v1500_v3 = vmul.f32 %v3817_v35, %v1494_v50  ;;  %v1501_v42 = vmul.f32 %v3831_v53, %v1497_v61  ;;  %v1480_v58 = vmul.f32 %v1474_v0, %v3843_v60  ;;  %v1481_v15 = vmul.f32 %v1477_v2, %v3854_v40  ;;  %1606 = vmatpush1.bf16.msra.mxu1 %v1576_v10  ;;  %v2937_v0 = vld [vmem:[%s4693_s2 + $0x18] sm:$0xf] }
0x1024   :  { %v1578_v23 = vpack.c.bf16 %v1500_v3, %v1480_v58  ;;  %v1509_v32 = vpop.permute.xlu0 %1508  ;;  %v1507_v27 = vpop.permute.xlu1 %1506  ;;  %v1579_v55 = vpack.c.bf16 %v1501_v42, %v1481_v15 }
0x1025   :  { %v1516_v41 = vsel %vm1138_vm2, %v1507_v27, %v1509_v32 }
0x1026   :  { %v1518_v31 = vmul.f32 %v1516_v41, %v3836_v25  ;;  %1646 = vmatprep.subr.bf16.mxu0 %v1579_v55 }
0x1027   :  { %1647 = vmatpush1.bf16.msra.mxu0 %v1578_v23 }
0x1028   :  { %v1513_v45 = vpop.permute.xlu0 %1512  ;;  %v1511_v1 = vpop.permute.xlu1 %1510  ;;  %v1580_v16 = vpack.c.bf16 %v1518_v31, %v1518_v31 }
0x1029   :  { %v1517_v43 = vsel %vm1138_vm2, %v1513_v45, %v1507_v27  ;;  %v1514_v48 = vsel %vm1138_vm2, %v1511_v1, %v1513_v45  ;;  %v1515_v63 = vsel %vm1138_vm2, %v1509_v32, %v1511_v1  ;;  %v2943_v45 = vld [vmem:[%s4694_s3 + $0x58] sm:$0xff] }
0x102a   :  { %v1521_v12 = vmul.f32 %v1517_v43, %v3867_v26  ;;  %v1519_v29 = vmul.f32 %v1515_v63, %v3871_v34  ;;  %v1520_v47 = vmul.f32 %v1514_v48, %v3875_v14  ;;  %v1588_v50 = vsel %vm151_vm3, %v1580_v16, 0 }
0x102c   :  { %v1583_v10 = vpack.c.bf16 %v1521_v12, %v1521_v12  ;;  %v1581_v56 = vpack.c.bf16 %v1519_v29, %v1519_v29  ;;  %v1582_v54 = vpack.c.bf16 %v1520_v47, %v1520_v47 }
0x102e   :  { %2938 = vmatprep.subr.msk.bf16.mxu1 %vm151_vm3, %v1581_v56  ;;  %2940 = vmatprep.subr.msk.bf16.mxu0 %vm151_vm3, %v1583_v10  ;;  %v1594_v61 = vsel %vm151_vm3, %v1582_v54, 0 }
0x102f   :  { %1608 = vmatpush1.bf16.msra.mxu1 %v1588_v50  ;;  %1649 = vmatpush1.bf16.msra.mxu0 %v1594_v61 }
0x1032   :  { %2939 = vmatmul.mubr.msk.bf16.vlgmr.msra.gmra.mrb[16].mxu1 %vm147_vm4, %v2937_v0  ;;  %2941 = vmatmul.mubr.msk.bf16.vlgmr.msra.gmra.mrb[20].mxu0 %vm147_vm4, %v2937_v0  ;;  %v2942_v0 = vld [vmem:[%s4694_s3 + $0x50] sm:$0xff] }
0x1033   :  { %2002 = vmatprep.mubr.bf16.mxu1 %v3160_v4  ;;  %2043 = vmatprep.mubr.bf16.mxu0 %v3160_v4 }
0x1105   :  { %v1633_v2 = vpop.f32.mrb[16].mxu1  ;;  %v1674_v3 = vpop.f32.mrb[20].mxu0 }
0x1106   :  { %v1635_v42 = vpop.f32.mrb[17].mxu1  ;;  %v1676_v58 = vpop.f32.mrb[21].mxu0 }
0x1107   :  { %v1685_v15 = vadd.f32 %v1635_v42, %v1633_v2  ;;  %v1637_v23 = vpop.f32.mrb[18].mxu1  ;;  %v1678_v32 = vpop.f32.mrb[22].mxu0 }
0x1108   :  { %v1638_v27 = vpop.f32.mrb[19].mxu1  ;;  %v1679_v55 = vpop.f32.mrb[23].mxu0 }
0x1109   :  { %v1686_v41 = vadd.f32 %v1685_v15, %v1674_v3 }
0x110b   :  { %v1687_v31 = vadd.f32 %v1686_v41, %v1676_v58 }
0x110d   :  { %1688 = vadd.xlane.f32.xlu1 %v1687_v31 }
0x111e   :  { %1722 = vperm.xlu1 %3083, %v2943_v45  }
0x119a   :  { %v1689_v1 = vpop.xlane.xlu1 %1688 }
0x119b   :  { %v1690_v43 = vmul.f32 0.001953125, %v1689_v1 }
0x119d   :  { %v1691_v48 = vsub.f32 %v1633_v2, %v1690_v43  ;;  %v1692_v63 = vsub.f32 %v1635_v42, %v1690_v43  ;;  %v1693_v16 = vsub.f32 %v1674_v3, %v1690_v43  ;;  %v1694_v12 = vsub.f32 %v1676_v58, %v1690_v43 }
0x119e   :  { %v1723_v31 = vpop.permute.xlu1 %1722 }
0x119f   :  { %v1695_v29 = vmul.f32 %v1691_v48, %v1691_v48  ;;  %v1696_v47 = vmul.f32 %v1692_v63, %v1692_v63  ;;  %v1697_v10 = vmul.f32 %v1693_v16, %v1693_v16  ;;  %v1698_v54 = vmul.f32 %v1694_v12, %v1694_v12 }
0x11a1   :  { %v1699_v56 = vadd.f32 %v1696_v47, %v1695_v29 }
0x11a3   :  { %v1700_v50 = vadd.f32 %v1699_v56, %v1697_v10 }
0x11a5   :  { %v1701_v61 = vadd.f32 %v1700_v50, %v1698_v54 }
0x11a7   :  { %1702 = vadd.xlane.f32.xlu0 %v1701_v61 }
0x11bd   :  { %1713 = vperm.xlu0 %3082, %v2942_v0  }
0x1234   :  { %v1703_v15 = vpop.xlane.xlu0 %1702 }
0x1235   :  { %v1704_v23 = vmul.f32 0.001953125, %v1703_v15 }
0x1237   :  { %v1705_v32 = vadd.f32 1e-05, %v1704_v23 }
0x1239   :  { %3142 = vrsqrt.f32 %v1705_v32 }
0x123c   :  { %v1714_v58 = vpop.permute.xlu0 %1713 }
0x1243   :  { %v3143_v2 = vpop.eup %3142 }
0x1244   :  { %v1707_v3 = vmul.f32 %v3143_v2, %v1691_v48  ;;  %v1708_v42 = vmul.f32 %v3143_v2, %v1692_v63  ;;  %v1710_v27 = vmul.f32 %v3143_v2, %v1694_v12  ;;  %v1709_v43 = vmul.f32 %v3143_v2, %v1693_v16 }
0x1246   :  { %v1716_v55 = vmul.f32 %v1714_v58, %v1707_v3  ;;  %v1717_v41 = vmul.f32 %v1714_v58, %v1708_v42  ;;  %v1719_v29 = vmul.f32 %v1714_v58, %v1710_v27  ;;  %v1718_v48 = vmul.f32 %v1714_v58, %v1709_v43 }
0x1248   :  { %v1725_v45 = vadd.f32 %v1723_v31, %v1716_v55  ;;  %v1726_v1 = vadd.f32 %v1723_v31, %v1717_v41  ;;  %v1728_v63 = vadd.f32 %v1723_v31, %v1719_v29  ;;  %v1727_v16 = vadd.f32 %v1723_v31, %v1718_v48 }
0x124a   :  { %v4107_v47 = vmax.f32 %v1725_v45, 0.0  ;;  %v4109_v10 = vmax.f32 %v1726_v1, 0.0  ;;  %v4119_v12 = vmax.f32 %v1728_v63, 0.0  ;;  %v4125_v56 = vmax.f32 %v1727_v16, 0.0 }
0x124c   :  { %1735 = vrot.lane.b32.xlu0 %v4109_v10, %s3161_s1  ;;  %1733 = vrot.lane.b32.xlu1 %v4107_v47, %s3161_s1 }
0x1250   :  { %1755 = vrot.lane.b32.xlu0 %v4109_v10, %s3162_s21  ;;  %1753 = vrot.lane.b32.xlu1 %v4107_v47, %s3162_s21 }
0x1254   :  { %1759 = vrot.lane.b32.xlu0 %v4119_v12, %s3162_s21  ;;  %1739 = vrot.lane.b32.xlu1 %v4119_v12, %s3161_s1 }
0x1258   :  { %1757 = vrot.lane.b32.xlu0 %v4125_v56, %s3162_s21  ;;  %1737 = vrot.lane.b32.xlu1 %v4125_v56, %s3161_s1 }
0x125c   :  { %1775 = vrot.lane.b32.xlu0 %v4109_v10, %s3164_s23  ;;  %1773 = vrot.lane.b32.xlu1 %v4107_v47, %s3164_s23 }
0x1260   :  { %1795 = vrot.lane.b32.xlu0 %v4109_v10, %s3153_s25  ;;  %1793 = vrot.lane.b32.xlu1 %v4107_v47, %s3153_s25 }
0x1264   :  { %1799 = vrot.lane.b32.xlu0 %v4119_v12, %s3153_s25  ;;  %1779 = vrot.lane.b32.xlu1 %v4119_v12, %s3164_s23 }
0x1268   :  { %1797 = vrot.lane.b32.xlu0 %v4125_v56, %s3153_s25  ;;  %1777 = vrot.lane.b32.xlu1 %v4125_v56, %s3164_s23 }
0x126c   :  { %1821 = vrot.lane.b32.xlu0 %v4125_v56, %s3157_s29  ;;  %1819 = vrot.lane.b32.xlu1 %v4109_v10, %s3157_s29 }
0x1270   :  { %1823 = vrot.lane.b32.xlu0 %v4119_v12, %s3157_s29  ;;  %1817 = vrot.lane.b32.xlu1 %v4107_v47, %s3157_s29 }
0x1274   :  { %1841 = vrot.lane.b32.xlu0 %v4125_v56, %s3163_s22  ;;  %1839 = vrot.lane.b32.xlu1 %v4109_v10, %s3163_s22 }
0x1278   :  { %1861 = vrot.lane.b32.xlu0 %v4125_v56, %s3165_s24  ;;  %1859 = vrot.lane.b32.xlu1 %v4109_v10, %s3165_s24 }
0x127c   :  { %1857 = vrot.lane.b32.xlu0 %v4107_v47, %s3165_s24  ;;  %1837 = vrot.lane.b32.xlu1 %v4107_v47, %s3163_s22 }
0x1280   :  { %1863 = vrot.lane.b32.xlu0 %v4119_v12, %s3165_s24  ;;  %1843 = vrot.lane.b32.xlu1 %v4119_v12, %s3163_s22 }
0x1284   :  { %1879 = vrot.lane.b32.xlu0 %v4109_v10, %s3166_s0  ;;  %1877 = vrot.lane.b32.xlu1 %v4107_v47, %s3166_s0 }
0x1288   :  { %1883 = vrot.lane.b32.xlu0 %v4119_v12, %s3166_s0  ;;  %1881 = vrot.lane.b32.xlu1 %v4125_v56, %s3166_s0 }
0x12be   :  { %v1736_v54 = vpop.permute.xlu0 %1735  ;;  %v1734_v50 = vpop.permute.xlu1 %1733 }
0x12bf   :  { %v1743_v61 = vsel %vm975_vm9, %v1734_v50, %v1736_v54 }
0x12c0   :  { %v1746_v32 = vmul.f32 %v1743_v61, %v3643_v59 }
0x12c2   :  { %v1756_v0 = vpop.permute.xlu0 %1755  ;;  %v1754_v15 = vpop.permute.xlu1 %1753 }
0x12c3   :  { %v1763_v23 = vsel %vm1000_vm10, %v1754_v15, %v1756_v0 }
0x12c4   :  { %v1766_v2 = vmul.f32 %v3628_v49, %v1763_v23 }
0x12c6   :  { %v1760_v3 = vpop.permute.xlu0 %1759  ;;  %v1740_v42 = vpop.permute.xlu1 %1739  ;;  %v1936_v58 = vpack.c.bf16 %v1766_v2, %v1746_v32 }
0x12c7   :  { %v1764_v27 = vsel %vm1000_vm10, %v1760_v3, %v1754_v15  ;;  %v1744_v55 = vsel %vm975_vm9, %v1740_v42, %v1734_v50 }
0x12c8   :  { %v1765_v41 = vmul.f32 %v3676_v13, %v1764_v27  ;;  %v1745_v31 = vmul.f32 %v1744_v55, %v3696_v20  ;;  %1970 = vmatprep.subr.bf16.mxu1 %v1936_v58 }
0x12ca   :  { %v1935_v45 = vpack.c.bf16 %v1765_v41, %v1745_v31  ;;  %v1758_v1 = vpop.permute.xlu0 %1757  ;;  %v1738_v43 = vpop.permute.xlu1 %1737 }
0x12cb   :  { %v1761_v29 = vsel %vm1000_vm10, %v1758_v1, %v1760_v3  ;;  %v1762_v48 = vsel %vm1000_vm10, %v1756_v0, %v1758_v1  ;;  %v1741_v63 = vsel %vm975_vm9, %v1738_v43, %v1740_v42  ;;  %v1742_v16 = vsel %vm975_vm9, %v1736_v54, %v1738_v43 }
0x12cc   :  { %v1767_v50 = vmul.f32 %v3662_v5, %v1762_v48  ;;  %v1768_v61 = vmul.f32 %v3682_v18, %v1761_v29  ;;  %v1747_v15 = vmul.f32 %v1742_v16, %v3689_v11  ;;  %v1748_v23 = vmul.f32 %v1741_v63, %v3700_v21  ;;  %1971 = vmatpush1.bf16.msra.mxu1 %v1935_v45 }
0x12ce   :  { %v1937_v32 = vpack.c.bf16 %v1767_v50, %v1747_v15  ;;  %v1776_v2 = vpop.permute.xlu0 %1775  ;;  %v1774_v3 = vpop.permute.xlu1 %1773  ;;  %v1938_v58 = vpack.c.bf16 %v1768_v61, %v1748_v23 }
0x12cf   :  { %v1783_v0 = vsel %vm1021_vm7, %v1774_v3, %v1776_v2 }
0x12d0   :  { %2011 = vmatprep.subr.bf16.mxu0 %v1938_v58  ;;  %v1786_v55 = vmul.f32 %v1783_v0, %v3711_v24 }
0x12d1   :  { %2012 = vmatpush1.bf16.msra.mxu0 %v1937_v32 }
0x12d2   :  { %v1796_v42 = vpop.permute.xlu0 %1795  ;;  %v1794_v54 = vpop.permute.xlu1 %1793 }
0x12d3   :  { %v1803_v27 = vsel %vm1046_vm8, %v1794_v54, %v1796_v42 }
0x12d4   :  { %v1806_v41 = vmul.f32 %v3631_v51, %v1803_v27 }
0x12d6   :  { %v1800_v31 = vpop.permute.xlu0 %1799  ;;  %v1780_v45 = vpop.permute.xlu1 %1779  ;;  %v1940_v1 = vpack.c.bf16 %v1806_v41, %v1786_v55 }
0x12d7   :  { %v1804_v43 = vsel %vm1046_vm8, %v1800_v31, %v1794_v54  ;;  %v1784_v29 = vsel %vm1021_vm7, %v1780_v45, %v1774_v3 }
0x12d8   :  { %v1805_v48 = vmul.f32 %v3671_v9, %v1804_v43  ;;  %v1785_v63 = vmul.f32 %v1784_v29, %v3743_v57  ;;  %1972 = vmatprep.subr.bf16.mxu1 %v1940_v1 }
0x12da   :  { %v1939_v16 = vpack.c.bf16 %v1805_v48, %v1785_v63  ;;  %v1798_v50 = vpop.permute.xlu0 %1797  ;;  %v1778_v61 = vpop.permute.xlu1 %1777 }
0x12db   :  { %v1801_v15 = vsel %vm1046_vm8, %v1798_v50, %v1800_v31  ;;  %v1802_v23 = vsel %vm1046_vm8, %v1796_v42, %v1798_v50  ;;  %v1781_v32 = vsel %vm1021_vm7, %v1778_v61, %v1780_v45  ;;  %v1782_v3 = vsel %vm1021_vm7, %v1776_v2, %v1778_v61 }
0x12dc   :  { %v1807_v58 = vmul.f32 %v3665_v6, %v1802_v23  ;;  %v1808_v0 = vmul.f32 %v3668_v8, %v1801_v15  ;;  %v1787_v54 = vmul.f32 %v1782_v3, %v3715_v46  ;;  %v1788_v27 = vmul.f32 %v1781_v32, %v3747_v28  ;;  %1973 = vmatpush1.bf16.msra.mxu1 %v1939_v16 }
0x12de   :  { %v1941_v55 = vpack.c.bf16 %v1807_v58, %v1787_v54  ;;  %v1822_v41 = vpop.permute.xlu0 %1821  ;;  %v1820_v31 = vpop.permute.xlu1 %1819  ;;  %v1942_v1 = vpack.c.bf16 %v1808_v0, %v1788_v27 }
0x12df   :  { %v1826_v42 = vsel %vm1071_vm13, %v1820_v31, %v1822_v41 }
0x12e0   :  { %v1830_v45 = vmul.f32 %v3679_v17, %v1826_v42  ;;  %2013 = vmatprep.subr.bf16.mxu0 %v1942_v1 }
0x12e1   :  { %2014 = vmatpush1.bf16.msra.mxu0 %v1941_v55 }
0x12e2   :  { %v1824_v2 = vpop.permute.xlu0 %1823  ;;  %v1818_v43 = vpop.permute.xlu1 %1817  ;;  %v1944_v29 = vpack.c.bf16 %v1830_v45, %v4109_v10 }
0x12e3   :  { %v1825_v48 = vsel %vm1071_vm13, %v1822_v41, %v1824_v2  ;;  %v1827_v63 = vsel %vm1071_vm13, %v1818_v43, %v1820_v31  ;;  %v1828_v16 = vsel %vm1071_vm13, %v1824_v2, %v1818_v43 }
0x12e4   :  { %v1831_v50 = vmul.f32 %v3685_v19, %v1825_v48  ;;  %v1829_v61 = vmul.f32 %v3719_v52, %v1827_v63  ;;  %v1832_v15 = vmul.f32 %v3722_v37, %v1828_v16  ;;  %1974 = vmatprep.subr.bf16.mxu1 %v1944_v29 }
0x12e6   :  { %v1945_v23 = vpack.c.bf16 %v1831_v50, %v4125_v56  ;;  %v1943_v10 = vpack.c.bf16 %v1829_v61, %v4107_v47  ;;  %v1842_v32 = vpop.permute.xlu0 %1841  ;;  %v1840_v3 = vpop.permute.xlu1 %1839  ;;  %v1946_v58 = vpack.c.bf16 %v1832_v15, %v4119_v12 }
0x12e7   :  { %v1846_v0 = vsel %vm1092_vm14, %v1840_v3, %v1842_v32 }
0x12e8   :  { %1975 = vmatpush1.bf16.msra.mxu1 %v1943_v10  ;;  %2015 = vmatprep.subr.bf16.mxu0 %v1946_v58  ;;  %v1850_v41 = vmul.f32 %v1846_v0, %v3803_v62 }
0x12e9   :  { %2016 = vmatpush1.bf16.msra.mxu0 %v1945_v23 }
0x12ea   :  { %v1862_v54 = vpop.permute.xlu0 %1861  ;;  %v1860_v27 = vpop.permute.xlu1 %1859 }
0x12eb   :  { %v1866_v55 = vsel %vm1117_vm1, %v1860_v27, %v1862_v54 }
0x12ec   :  { %v1870_v56 = vmul.f32 %v3771_v33, %v1866_v55 }
0x12ee   :  { %v1858_v47 = vpop.permute.xlu0 %1857  ;;  %v1838_v31 = vpop.permute.xlu1 %1837  ;;  %v1948_v1 = vpack.c.bf16 %v1870_v56, %v1850_v41 }
0x12ef   :  { %v1867_v12 = vsel %vm1117_vm1, %v1858_v47, %v1860_v27  ;;  %v1847_v42 = vsel %vm1092_vm14, %v1838_v31, %v1840_v3 }
0x12f0   :  { %v1869_v45 = vmul.f32 %v3765_v39, %v1867_v12  ;;  %v1849_v2 = vmul.f32 %v1847_v42, %v3799_v36  ;;  %1976 = vmatprep.subr.bf16.mxu1 %v1948_v1 }
0x12f2   :  { %v1947_v43 = vpack.c.bf16 %v1869_v45, %v1849_v2  ;;  %v1864_v29 = vpop.permute.xlu0 %1863  ;;  %v1844_v48 = vpop.permute.xlu1 %1843 }
0x12f3   :  { %v1865_v63 = vsel %vm1117_vm1, %v1862_v54, %v1864_v29  ;;  %v1868_v16 = vsel %vm1117_vm1, %v1864_v29, %v1858_v47  ;;  %v1845_v50 = vsel %vm1092_vm14, %v1842_v32, %v1844_v48  ;;  %v1848_v61 = vsel %vm1092_vm14, %v1844_v48, %v1838_v31 }
0x12f4   :  { %v1871_v15 = vmul.f32 %v3817_v35, %v1865_v63  ;;  %v1872_v23 = vmul.f32 %v3831_v53, %v1868_v16  ;;  %v1851_v10 = vmul.f32 %v1845_v50, %v3843_v60  ;;  %v1852_v3 = vmul.f32 %v1848_v61, %v3854_v40  ;;  %1977 = vmatpush1.bf16.msra.mxu1 %v1947_v43  ;;  %v2944_v50 = vld [vmem:[%s4693_s2 + $0x1c] sm:$0xf] }
0x12f6   :  { %v1949_v58 = vpack.c.bf16 %v1871_v15, %v1851_v10  ;;  %v1880_v0 = vpop.permute.xlu0 %1879  ;;  %v1878_v54 = vpop.permute.xlu1 %1877  ;;  %v1950_v27 = vpack.c.bf16 %v1872_v23, %v1852_v3 }
0x12f7   :  { %v1887_v55 = vsel %vm1138_vm2, %v1878_v54, %v1880_v0 }
0x12f8   :  { %v1889_v32 = vmul.f32 %v1887_v55, %v3836_v25  ;;  %2017 = vmatprep.subr.bf16.mxu0 %v1950_v27 }
0x12f9   :  { %2018 = vmatpush1.bf16.msra.mxu0 %v1949_v58 }
0x12fa   :  { %v1884_v41 = vpop.permute.xlu0 %1883  ;;  %v1882_v56 = vpop.permute.xlu1 %1881  ;;  %v1951_v12 = vpack.c.bf16 %v1889_v32, %v1889_v32 }
0x12fb   :  { %v1888_v47 = vsel %vm1138_vm2, %v1884_v41, %v1878_v54  ;;  %v1885_v31 = vsel %vm1138_vm2, %v1882_v56, %v1884_v41  ;;  %v1886_v1 = vsel %vm1138_vm2, %v1880_v0, %v1882_v56  ;;  %v2950_v41 = vld [vmem:[%s4694_s3 + $0x68] sm:$0xff] }
0x12fc   :  { %v1892_v42 = vmul.f32 %v1888_v47, %v3867_v26  ;;  %v1890_v45 = vmul.f32 %v1886_v1, %v3871_v34  ;;  %v1891_v2 = vmul.f32 %v1885_v31, %v3875_v14  ;;  %v1959_v63 = vsel %vm151_vm3, %v1951_v12, 0 }
0x12fe   :  { %v1954_v43 = vpack.c.bf16 %v1892_v42, %v1892_v42  ;;  %v1952_v29 = vpack.c.bf16 %v1890_v45, %v1890_v45  ;;  %v1953_v48 = vpack.c.bf16 %v1891_v2, %v1891_v2 }
0x1300   :  { %2945 = vmatprep.subr.msk.bf16.mxu1 %vm151_vm3, %v1952_v29  ;;  %2947 = vmatprep.subr.msk.bf16.mxu0 %vm151_vm3, %v1954_v43  ;;  %v1965_v16 = vsel %vm151_vm3, %v1953_v48, 0 }
0x1301   :  { %1979 = vmatpush1.bf16.msra.mxu1 %v1959_v63  ;;  %2020 = vmatpush1.bf16.msra.mxu0 %v1965_v16 }
0x1304   :  { %2946 = vmatmul.mubr.msk.bf16.vlgmr.msra.gmra.mrb[20].mxu1 %vm147_vm4, %v2944_v50  ;;  %2948 = vmatmul.mubr.msk.bf16.vlgmr.msra.gmra.mrb[24].mxu0 %vm147_vm4, %v2944_v50  ;;  %v2949_v50 = vld [vmem:[%s4694_s3 + $0x60] sm:$0xff] }
0x1305   :  { %2377 = vmatprep.mubr.bf16.mxu1 %v3160_v4  ;;  %2418 = vmatprep.mubr.bf16.mxu0 %v3160_v4 }
0x13d7   :  { %v2004_v61 = vpop.f32.mrb[20].mxu1  ;;  %v2045_v15 = vpop.f32.mrb[24].mxu0 }
0x13d8   :  { %v2006_v23 = vpop.f32.mrb[21].mxu1  ;;  %v2047_v10 = vpop.f32.mrb[25].mxu0 }
0x13d9   :  { %v2056_v3 = vadd.f32 %v2006_v23, %v2004_v61  ;;  %v2008_v58 = vpop.f32.mrb[22].mxu1  ;;  %v2049_v0 = vpop.f32.mrb[26].mxu0 }
0x13da   :  { %v2009_v54 = vpop.f32.mrb[23].mxu1  ;;  %v2050_v27 = vpop.f32.mrb[27].mxu0 }
0x13db   :  { %v2057_v55 = vadd.f32 %v2056_v3, %v2045_v15 }
0x13dd   :  { %v2058_v32 = vadd.f32 %v2057_v55, %v2047_v10 }
0x13df   :  { %2059 = vadd.xlane.f32.xlu1 %v2058_v32 }
0x13f0   :  { %2093 = vperm.xlu1 %3083, %v2950_v41  }
0x146c   :  { %v2060_v56 = vpop.xlane.xlu1 %2059 }
0x146d   :  { %v2061_v47 = vmul.f32 0.001953125, %v2060_v56 }
0x146f   :  { %v2062_v31 = vsub.f32 %v2004_v61, %v2061_v47  ;;  %v2063_v1 = vsub.f32 %v2006_v23, %v2061_v47  ;;  %v2064_v12 = vsub.f32 %v2045_v15, %v2061_v47  ;;  %v2065_v42 = vsub.f32 %v2047_v10, %v2061_v47 }
0x1470   :  { %v2094_v32 = vpop.permute.xlu1 %2093 }
0x1471   :  { %v2066_v45 = vmul.f32 %v2062_v31, %v2062_v31  ;;  %v2067_v2 = vmul.f32 %v2063_v1, %v2063_v1  ;;  %v2068_v43 = vmul.f32 %v2064_v12, %v2064_v12  ;;  %v2069_v48 = vmul.f32 %v2065_v42, %v2065_v42 }
0x1473   :  { %v2070_v29 = vadd.f32 %v2067_v2, %v2066_v45 }
0x1475   :  { %v2071_v63 = vadd.f32 %v2070_v29, %v2068_v43 }
0x1477   :  { %v2072_v16 = vadd.f32 %v2071_v63, %v2069_v48 }
0x1479   :  { %2073 = vadd.xlane.f32.xlu0 %v2072_v16 }
0x148f   :  { %2084 = vperm.xlu0 %3082, %v2949_v50  }
0x1506   :  { %v2074_v3 = vpop.xlane.xlu0 %2073 }
0x1507   :  { %v2075_v58 = vmul.f32 0.001953125, %v2074_v3 }
0x1509   :  { %v2076_v0 = vadd.f32 1e-05, %v2075_v58 }
0x150b   :  { %3144 = vrsqrt.f32 %v2076_v0 }
0x150e   :  { %v2085_v54 = vpop.permute.xlu0 %2084 }
0x1515   :  { %v3145_v61 = vpop.eup %3144 }
0x1516   :  { %v2078_v15 = vmul.f32 %v3145_v61, %v2062_v31  ;;  %v2079_v23 = vmul.f32 %v3145_v61, %v2063_v1  ;;  %v2081_v10 = vmul.f32 %v3145_v61, %v2065_v42  ;;  %v2080_v41 = vmul.f32 %v3145_v61, %v2064_v12 }
0x1518   :  { %v2087_v27 = vmul.f32 %v2085_v54, %v2078_v15  ;;  %v2088_v55 = vmul.f32 %v2085_v54, %v2079_v23  ;;  %v2090_v56 = vmul.f32 %v2085_v54, %v2081_v10  ;;  %v2089_v29 = vmul.f32 %v2085_v54, %v2080_v41 }
0x151a   :  { %v2096_v47 = vadd.f32 %v2094_v32, %v2087_v27  ;;  %v2097_v45 = vadd.f32 %v2094_v32, %v2088_v55  ;;  %v2099_v48 = vadd.f32 %v2094_v32, %v2090_v56  ;;  %v2098_v31 = vadd.f32 %v2094_v32, %v2089_v29 }
0x151c   :  { %v2100_v2 = vadd.f32 %v2096_v47, %v3918_v38  ;;  %v2101_v43 = vadd.f32 %v2097_v45, %v3920_v22  ;;  %v2103_v1 = vadd.f32 %v2099_v48, %v3930_v44  ;;  %v2102_v38 = vadd.f32 %v2098_v31, %v3936_v30 }
0x151e   :  { %v4298_v63 = vmax.f32 %v2100_v2, 0.0  ;;  %v4300_v16 = vmax.f32 %v2101_v43, 0.0  ;;  %v4312_v22 = vmax.f32 %v2103_v1, 0.0  ;;  %v4318_v12 = vmax.f32 %v2102_v38, 0.0 }
0x1520   :  { %2110 = vrot.lane.b32.xlu0 %v4300_v16, %s3161_s1  ;;  %2108 = vrot.lane.b32.xlu1 %v4298_v63, %s3161_s1 }
0x1524   :  { %2130 = vrot.lane.b32.xlu0 %v4300_v16, %s3162_s21  ;;  %2128 = vrot.lane.b32.xlu1 %v4298_v63, %s3162_s21 }
0x1528   :  { %2134 = vrot.lane.b32.xlu0 %v4312_v22, %s3162_s21  ;;  %2114 = vrot.lane.b32.xlu1 %v4312_v22, %s3161_s1 }
0x152c   :  { %2132 = vrot.lane.b32.xlu0 %v4318_v12, %s3162_s21  ;;  %2112 = vrot.lane.b32.xlu1 %v4318_v12, %s3161_s1 }
0x1530   :  { %2150 = vrot.lane.b32.xlu0 %v4300_v16, %s3164_s23  ;;  %2148 = vrot.lane.b32.xlu1 %v4298_v63, %s3164_s23 }
0x1534   :  { %2170 = vrot.lane.b32.xlu0 %v4300_v16, %s3153_s25  ;;  %2168 = vrot.lane.b32.xlu1 %v4298_v63, %s3153_s25 }
0x1538   :  { %2174 = vrot.lane.b32.xlu0 %v4312_v22, %s3153_s25  ;;  %2154 = vrot.lane.b32.xlu1 %v4312_v22, %s3164_s23 }
0x153c   :  { %2172 = vrot.lane.b32.xlu0 %v4318_v12, %s3153_s25  ;;  %2152 = vrot.lane.b32.xlu1 %v4318_v12, %s3164_s23 }
0x1540   :  { %2196 = vrot.lane.b32.xlu0 %v4318_v12, %s3157_s29  ;;  %2194 = vrot.lane.b32.xlu1 %v4300_v16, %s3157_s29 }
0x1544   :  { %2198 = vrot.lane.b32.xlu0 %v4312_v22, %s3157_s29  ;;  %2192 = vrot.lane.b32.xlu1 %v4298_v63, %s3157_s29 }
0x1548   :  { %2216 = vrot.lane.b32.xlu0 %v4318_v12, %s3163_s22  ;;  %2214 = vrot.lane.b32.xlu1 %v4300_v16, %s3163_s22 }
0x154c   :  { %2236 = vrot.lane.b32.xlu0 %v4318_v12, %s3165_s24  ;;  %2234 = vrot.lane.b32.xlu1 %v4300_v16, %s3165_s24 }
0x1550   :  { %2232 = vrot.lane.b32.xlu0 %v4298_v63, %s3165_s24  ;;  %2212 = vrot.lane.b32.xlu1 %v4298_v63, %s3163_s22 }
0x1554   :  { %2238 = vrot.lane.b32.xlu0 %v4312_v22, %s3165_s24  ;;  %2218 = vrot.lane.b32.xlu1 %v4312_v22, %s3163_s22 }
0x1558   :  { %2254 = vrot.lane.b32.xlu0 %v4300_v16, %s3166_s0  ;;  %2252 = vrot.lane.b32.xlu1 %v4298_v63, %s3166_s0 }
0x155c   :  { %2258 = vrot.lane.b32.xlu0 %v4312_v22, %s3166_s0  ;;  %2256 = vrot.lane.b32.xlu1 %v4318_v12, %s3166_s0 }
0x1592   :  { %v2111_v44 = vpop.permute.xlu0 %2110  ;;  %v2109_v30 = vpop.permute.xlu1 %2108 }
0x1593   :  { %v2118_v42 = vsel %vm975_vm9, %v2109_v30, %v2111_v44 }
0x1594   :  { %v2121_v0 = vmul.f32 %v2118_v42, %v3643_v59 }
0x1596   :  { %v2131_v50 = vpop.permute.xlu0 %2130  ;;  %v2129_v3 = vpop.permute.xlu1 %2128 }
0x1597   :  { %v2138_v58 = vsel %vm1000_vm10, %v2129_v3, %v2131_v50 }
0x1598   :  { %v2141_v61 = vmul.f32 %v3628_v49, %v2138_v58 }
0x159a   :  { %v2135_v15 = vpop.permute.xlu0 %2134  ;;  %v2115_v23 = vpop.permute.xlu1 %2114  ;;  %v2311_v10 = vpack.c.bf16 %v2141_v61, %v2121_v0 }
0x159b   :  { %v2139_v54 = vsel %vm1000_vm10, %v2135_v15, %v2129_v3  ;;  %v2119_v27 = vsel %vm975_vm9, %v2115_v23, %v2109_v30 }
0x159c   :  { %v2140_v55 = vmul.f32 %v3676_v13, %v2139_v54  ;;  %v2120_v32 = vmul.f32 %v2119_v27, %v3696_v20  ;;  %2345 = vmatprep.subr.bf16.mxu1 %v2311_v10 }
0x159e   :  { %v2310_v41 = vpack.c.bf16 %v2140_v55, %v2120_v32  ;;  %v2133_v56 = vpop.permute.xlu0 %2132  ;;  %v2113_v47 = vpop.permute.xlu1 %2112 }
0x159f   :  { %v2136_v45 = vsel %vm1000_vm10, %v2133_v56, %v2135_v15  ;;  %v2137_v2 = vsel %vm1000_vm10, %v2131_v50, %v2133_v56  ;;  %v2116_v43 = vsel %vm975_vm9, %v2113_v47, %v2115_v23  ;;  %v2117_v29 = vsel %vm975_vm9, %v2111_v44, %v2113_v47 }
0x15a0   :  { %v2142_v48 = vmul.f32 %v3662_v5, %v2137_v2  ;;  %v2143_v31 = vmul.f32 %v3682_v18, %v2136_v45  ;;  %v2122_v1 = vmul.f32 %v2117_v29, %v3689_v11  ;;  %v2123_v38 = vmul.f32 %v2116_v43, %v3700_v21  ;;  %2346 = vmatpush1.bf16.msra.mxu1 %v2310_v41 }
0x15a2   :  { %v2312_v30 = vpack.c.bf16 %v2142_v48, %v2122_v1  ;;  %v2151_v42 = vpop.permute.xlu0 %2150  ;;  %v2149_v3 = vpop.permute.xlu1 %2148  ;;  %v2313_v58 = vpack.c.bf16 %v2143_v31, %v2123_v38 }
0x15a3   :  { %v2158_v50 = vsel %vm1021_vm7, %v2149_v3, %v2151_v42 }
0x15a4   :  { %2386 = vmatprep.subr.bf16.mxu0 %v2313_v58  ;;  %v2161_v15 = vmul.f32 %v2158_v50, %v3711_v24 }
0x15a5   :  { %2387 = vmatpush1.bf16.msra.mxu0 %v2312_v30 }
0x15a6   :  { %v2171_v0 = vpop.permute.xlu0 %2170  ;;  %v2169_v44 = vpop.permute.xlu1 %2168 }
0x15a7   :  { %v2178_v61 = vsel %vm1046_vm8, %v2169_v44, %v2171_v0 }
0x15a8   :  { %v2181_v23 = vmul.f32 %v3631_v51, %v2178_v61 }
0x15aa   :  { %v2175_v10 = vpop.permute.xlu0 %2174  ;;  %v2155_v54 = vpop.permute.xlu1 %2154  ;;  %v2315_v27 = vpack.c.bf16 %v2181_v23, %v2161_v15 }
0x15ab   :  { %v2179_v55 = vsel %vm1046_vm8, %v2175_v10, %v2169_v44  ;;  %v2159_v32 = vsel %vm1021_vm7, %v2155_v54, %v2149_v3 }
0x15ac   :  { %v2180_v41 = vmul.f32 %v3671_v9, %v2179_v55  ;;  %v2160_v56 = vmul.f32 %v2159_v32, %v3743_v57  ;;  %2347 = vmatprep.subr.bf16.mxu1 %v2315_v27 }
0x15ae   :  { %v2314_v47 = vpack.c.bf16 %v2180_v41, %v2160_v56  ;;  %v2173_v45 = vpop.permute.xlu0 %2172  ;;  %v2153_v2 = vpop.permute.xlu1 %2152 }
0x15af   :  { %v2176_v43 = vsel %vm1046_vm8, %v2173_v45, %v2175_v10  ;;  %v2177_v29 = vsel %vm1046_vm8, %v2171_v0, %v2173_v45  ;;  %v2156_v48 = vsel %vm1021_vm7, %v2153_v2, %v2155_v54  ;;  %v2157_v31 = vsel %vm1021_vm7, %v2151_v42, %v2153_v2 }
0x15b0   :  { %v2182_v1 = vmul.f32 %v3665_v6, %v2177_v29  ;;  %v2183_v38 = vmul.f32 %v3668_v8, %v2176_v43  ;;  %v2162_v30 = vmul.f32 %v2157_v31, %v3715_v46  ;;  %v2163_v3 = vmul.f32 %v2156_v48, %v3747_v28  ;;  %2348 = vmatpush1.bf16.msra.mxu1 %v2314_v47 }
0x15b2   :  { %v2316_v58 = vpack.c.bf16 %v2182_v1, %v2162_v30  ;;  %v2197_v50 = vpop.permute.xlu0 %2196  ;;  %v2195_v44 = vpop.permute.xlu1 %2194  ;;  %v2317_v61 = vpack.c.bf16 %v2183_v38, %v2163_v3 }
0x15b3   :  { %v2201_v0 = vsel %vm1071_vm13, %v2195_v44, %v2197_v50 }
0x15b4   :  { %v2205_v15 = vmul.f32 %v3679_v17, %v2201_v0  ;;  %2388 = vmatprep.subr.bf16.mxu0 %v2317_v61 }
0x15b5   :  { %2389 = vmatpush1.bf16.msra.mxu0 %v2316_v58 }
0x15b6   :  { %v2199_v42 = vpop.permute.xlu0 %2198  ;;  %v2193_v23 = vpop.permute.xlu1 %2192  ;;  %v2319_v10 = vpack.c.bf16 %v2205_v15, %v4300_v16 }
0x15b7   :  { %v2200_v54 = vsel %vm1071_vm13, %v2197_v50, %v2199_v42  ;;  %v2202_v27 = vsel %vm1071_vm13, %v2193_v23, %v2195_v44  ;;  %v2203_v55 = vsel %vm1071_vm13, %v2199_v42, %v2193_v23 }
0x15b8   :  { %v2206_v32 = vmul.f32 %v3685_v19, %v2200_v54  ;;  %v2204_v41 = vmul.f32 %v3719_v52, %v2202_v27  ;;  %v2207_v56 = vmul.f32 %v3722_v37, %v2203_v55  ;;  %2349 = vmatprep.subr.bf16.mxu1 %v2319_v10 }
0x15ba   :  { %v2320_v47 = vpack.c.bf16 %v2206_v32, %v4318_v12  ;;  %v2318_v45 = vpack.c.bf16 %v2204_v41, %v4298_v63  ;;  %v2217_v2 = vpop.permute.xlu0 %2216  ;;  %v2215_v43 = vpop.permute.xlu1 %2214  ;;  %v2321_v29 = vpack.c.bf16 %v2207_v56, %v4312_v22 }
0x15bb   :  { %v2221_v48 = vsel %vm1092_vm14, %v2215_v43, %v2217_v2 }
0x15bc   :  { %2350 = vmatpush1.bf16.msra.mxu1 %v2318_v45  ;;  %2390 = vmatprep.subr.bf16.mxu0 %v2321_v29  ;;  %v2225_v30 = vmul.f32 %v2221_v48, %v3803_v62 }
0x15bd   :  { %2391 = vmatpush1.bf16.msra.mxu0 %v2320_v47 }
0x15be   :  { %v2237_v31 = vpop.permute.xlu0 %2236  ;;  %v2235_v1 = vpop.permute.xlu1 %2234 }
0x15bf   :  { %v2241_v38 = vsel %vm1117_vm1, %v2235_v1, %v2237_v31 }
0x15c0   :  { %v2245_v3 = vmul.f32 %v3771_v33, %v2241_v38 }
0x15c2   :  { %v2233_v58 = vpop.permute.xlu0 %2232  ;;  %v2213_v50 = vpop.permute.xlu1 %2212  ;;  %v2323_v44 = vpack.c.bf16 %v2245_v3, %v2225_v30 }
0x15c3   :  { %v2242_v61 = vsel %vm1117_vm1, %v2233_v58, %v2235_v1  ;;  %v2222_v0 = vsel %vm1092_vm14, %v2213_v50, %v2215_v43 }
0x15c4   :  { %v2244_v15 = vmul.f32 %v3765_v39, %v2242_v61  ;;  %v2224_v42 = vmul.f32 %v2222_v0, %v3799_v36  ;;  %2351 = vmatprep.subr.bf16.mxu1 %v2323_v44 }
0x15c6   :  { %v2322_v23 = vpack.c.bf16 %v2244_v15, %v2224_v42  ;;  %v2239_v10 = vpop.permute.xlu0 %2238  ;;  %v2219_v54 = vpop.permute.xlu1 %2218 }
0x15c7   :  { %v2240_v27 = vsel %vm1117_vm1, %v2237_v31, %v2239_v10  ;;  %v2243_v55 = vsel %vm1117_vm1, %v2239_v10, %v2233_v58  ;;  %v2220_v32 = vsel %vm1092_vm14, %v2217_v2, %v2219_v54  ;;  %v2223_v41 = vsel %vm1092_vm14, %v2219_v54, %v2213_v50 }
0x15c8   :  { %v2246_v56 = vmul.f32 %v3817_v35, %v2240_v27  ;;  %v2247_v47 = vmul.f32 %v3831_v53, %v2243_v55  ;;  %v2226_v45 = vmul.f32 %v2220_v32, %v3843_v60  ;;  %v2227_v43 = vmul.f32 %v2223_v41, %v3854_v40  ;;  %2352 = vmatpush1.bf16.msra.mxu1 %v2322_v23  ;;  %v2951_v32 = vld [vmem:[%s4693_s2 + $0x20] sm:$0xf] }
0x15ca   :  { %v2324_v29 = vpack.c.bf16 %v2246_v56, %v2226_v45  ;;  %v2255_v48 = vpop.permute.xlu0 %2254  ;;  %v2253_v31 = vpop.permute.xlu1 %2252  ;;  %v2325_v1 = vpack.c.bf16 %v2247_v47, %v2227_v43 }
0x15cb   :  { %v2262_v38 = vsel %vm1138_vm2, %v2253_v31, %v2255_v48 }
0x15cc   :  { %v2264_v2 = vmul.f32 %v2262_v38, %v3836_v25  ;;  %2392 = vmatprep.subr.bf16.mxu0 %v2325_v1 }
0x15cd   :  { %2393 = vmatpush1.bf16.msra.mxu0 %v2324_v29 }
0x15ce   :  { %v2259_v30 = vpop.permute.xlu0 %2258  ;;  %v2257_v3 = vpop.permute.xlu1 %2256  ;;  %v2326_v61 = vpack.c.bf16 %v2264_v2, %v2264_v2 }
0x15cf   :  { %v2263_v58 = vsel %vm1138_vm2, %v2259_v30, %v2253_v31  ;;  %v2260_v50 = vsel %vm1138_vm2, %v2257_v3, %v2259_v30  ;;  %v2261_v44 = vsel %vm1138_vm2, %v2255_v48, %v2257_v3  ;;  %v2957_v30 = vld [vmem:[%s4694_s3 + $0x78] sm:$0xff] }
0x15d0   :  { %v2267_v0 = vmul.f32 %v2263_v58, %v3867_v26  ;;  %v2265_v15 = vmul.f32 %v2261_v44, %v3871_v34  ;;  %v2266_v42 = vmul.f32 %v2260_v50, %v3875_v14  ;;  %v2334_v27 = vsel %vm151_vm3, %v2326_v61, 0 }
0x15d2   :  { %v2329_v23 = vpack.c.bf16 %v2267_v0, %v2267_v0  ;;  %v2327_v10 = vpack.c.bf16 %v2265_v15, %v2265_v15  ;;  %v2328_v54 = vpack.c.bf16 %v2266_v42, %v2266_v42 }
0x15d4   :  { %2952 = vmatprep.subr.msk.bf16.mxu1 %vm151_vm3, %v2327_v10  ;;  %2954 = vmatprep.subr.msk.bf16.mxu0 %vm151_vm3, %v2329_v23  ;;  %v2340_v55 = vsel %vm151_vm3, %v2328_v54, 0 }
0x15d5   :  { %2354 = vmatpush1.bf16.msra.mxu1 %v2334_v27  ;;  %2395 = vmatpush1.bf16.msra.mxu0 %v2340_v55  ;;  %v2956_v55 = vld [vmem:[%s4694_s3 + $0x70] sm:$0xff] }
0x15d8   :  { %2953 = vmatmul.mubr.msk.bf16.vlgmr.msra.gmra.mrb[24].mxu1 %vm147_vm4, %v2951_v32  ;;  %2955 = vmatmul.mubr.msk.bf16.vlgmr.msra.gmra.mrb[28].mxu0 %vm147_vm4, %v2951_v32 }
0x15d9   :  { %2748 = vmatprep.mubr.bf16.mxu1 %v3160_v4  ;;  %2789 = vmatprep.mubr.bf16.mxu0 %v3160_v4 }
0x16ab   :  { %v2379_v41 = vpop.f32.mrb[24].mxu1  ;;  %v2420_v56 = vpop.f32.mrb[28].mxu0 }
0x16ac   :  { %v2381_v47 = vpop.f32.mrb[25].mxu1  ;;  %v2422_v45 = vpop.f32.mrb[29].mxu0 }
0x16ad   :  { %v2431_v43 = vadd.f32 %v2381_v47, %v2379_v41  ;;  %v2383_v29 = vpop.f32.mrb[26].mxu1  ;;  %v2424_v48 = vpop.f32.mrb[30].mxu0 }
0x16ae   :  { %v2384_v31 = vpop.f32.mrb[27].mxu1  ;;  %v2425_v1 = vpop.f32.mrb[31].mxu0 }
0x16af   :  { %v2432_v38 = vadd.f32 %v2431_v43, %v2420_v56 }
0x16b1   :  { %v2433_v2 = vadd.f32 %v2432_v38, %v2422_v45 }
0x16b3   :  { %2434 = vadd.xlane.f32.xlu1 %v2433_v2 }
0x16c4   :  { %2468 = vperm.xlu1 %3083, %v2957_v30  }
0x1740   :  { %v2435_v3 = vpop.xlane.xlu1 %2434 }
0x1741   :  { %v2436_v58 = vmul.f32 0.001953125, %v2435_v3 }
0x1743   :  { %v2437_v4 = vsub.f32 %v2379_v41, %v2436_v58  ;;  %v2438_v50 = vsub.f32 %v2381_v47, %v2436_v58  ;;  %v2439_v44 = vsub.f32 %v2420_v56, %v2436_v58  ;;  %v2440_v61 = vsub.f32 %v2422_v45, %v2436_v58 }
0x1744   :  { %v2469_v38 = vpop.permute.xlu1 %2468 }
0x1745   :  { %v2441_v0 = vmul.f32 %v2437_v4, %v2437_v4  ;;  %v2442_v15 = vmul.f32 %v2438_v50, %v2438_v50  ;;  %v2443_v42 = vmul.f32 %v2439_v44, %v2439_v44  ;;  %v2444_v10 = vmul.f32 %v2440_v61, %v2440_v61 }
0x1747   :  { %v2445_v23 = vadd.f32 %v2442_v15, %v2441_v0 }
0x1749   :  { %v2446_v54 = vadd.f32 %v2445_v23, %v2443_v42 }
0x174b   :  { %v2447_v27 = vadd.f32 %v2446_v54, %v2444_v10 }
0x174d   :  { %2448 = vadd.xlane.f32.xlu0 %v2447_v27 }
0x1763   :  { %2459 = vperm.xlu0 %3082, %v2956_v55  }
0x17da   :  { %v2449_v32 = vpop.xlane.xlu0 %2448 }
0x17db   :  { %v2450_v43 = vmul.f32 0.001953125, %v2449_v32 }
0x17dd   :  { %v2451_v29 = vadd.f32 1e-05, %v2450_v43 }
0x17df   :  { %3146 = vrsqrt.f32 %v2451_v29 }
0x17e2   :  { %v2460_v45 = vpop.permute.xlu0 %2459 }
0x17e9   :  { %v3147_v41 = vpop.eup %3146 }
0x17ea   :  { %v2453_v56 = vmul.f32 %v3147_v41, %v2437_v4  ;;  %v2454_v47 = vmul.f32 %v3147_v41, %v2438_v50  ;;  %v2456_v48 = vmul.f32 %v3147_v41, %v2440_v61  ;;  %v2455_v3 = vmul.f32 %v3147_v41, %v2439_v44 }
0x17ec   :  { %v2462_v31 = vmul.f32 %v2460_v45, %v2453_v56  ;;  %v2463_v1 = vmul.f32 %v2460_v45, %v2454_v47  ;;  %v2465_v58 = vmul.f32 %v2460_v45, %v2456_v48  ;;  %v2464_v4 = vmul.f32 %v2460_v45, %v2455_v3 }
0x17ee   :  { %v2471_v2 = vadd.f32 %v2469_v38, %v2462_v31  ;;  %v2472_v30 = vadd.f32 %v2469_v38, %v2463_v1  ;;  %v2474_v50 = vadd.f32 %v2469_v38, %v2465_v58  ;;  %v2473_v44 = vadd.f32 %v2469_v38, %v2464_v4 }
0x17f0   :  { %v4489_v0 = vmax.f32 %v2471_v2, 0.0  ;;  %v4491_v15 = vmax.f32 %v2472_v30, 0.0  ;;  %v4501_v61 = vmax.f32 %v2474_v50, 0.0  ;;  %v4507_v42 = vmax.f32 %v2473_v44, 0.0 }
0x17f2   :  { %2481 = vrot.lane.b32.xlu0 %v4491_v15, %s3161_s1  ;;  %2479 = vrot.lane.b32.xlu1 %v4489_v0, %s3161_s1 }
0x17f6   :  { %2501 = vrot.lane.b32.xlu0 %v4491_v15, %s3162_s21  ;;  %2499 = vrot.lane.b32.xlu1 %v4489_v0, %s3162_s21 }
0x17fa   :  { %2505 = vrot.lane.b32.xlu0 %v4501_v61, %s3162_s21  ;;  %2485 = vrot.lane.b32.xlu1 %v4501_v61, %s3161_s1 }
0x17fe   :  { %2503 = vrot.lane.b32.xlu0 %v4507_v42, %s3162_s21  ;;  %2483 = vrot.lane.b32.xlu1 %v4507_v42, %s3161_s1 }
0x1802   :  { %2521 = vrot.lane.b32.xlu0 %v4491_v15, %s3164_s23  ;;  %2519 = vrot.lane.b32.xlu1 %v4489_v0, %s3164_s23 }
0x1806   :  { %2541 = vrot.lane.b32.xlu0 %v4491_v15, %s3153_s25  ;;  %2539 = vrot.lane.b32.xlu1 %v4489_v0, %s3153_s25 }
0x180a   :  { %2545 = vrot.lane.b32.xlu0 %v4501_v61, %s3153_s25  ;;  %2525 = vrot.lane.b32.xlu1 %v4501_v61, %s3164_s23 }
0x180e   :  { %2543 = vrot.lane.b32.xlu0 %v4507_v42, %s3153_s25  ;;  %2523 = vrot.lane.b32.xlu1 %v4507_v42, %s3164_s23 }
0x1812   :  { %2567 = vrot.lane.b32.xlu0 %v4507_v42, %s3157_s29  ;;  %2565 = vrot.lane.b32.xlu1 %v4491_v15, %s3157_s29 }
0x1816   :  { %2569 = vrot.lane.b32.xlu0 %v4501_v61, %s3157_s29  ;;  %2563 = vrot.lane.b32.xlu1 %v4489_v0, %s3157_s29 }
0x181a   :  { %2587 = vrot.lane.b32.xlu0 %v4507_v42, %s3163_s22  ;;  %2585 = vrot.lane.b32.xlu1 %v4491_v15, %s3163_s22 }
0x181e   :  { %2607 = vrot.lane.b32.xlu0 %v4507_v42, %s3165_s24  ;;  %2605 = vrot.lane.b32.xlu1 %v4491_v15, %s3165_s24 }
0x1822   :  { %2603 = vrot.lane.b32.xlu0 %v4489_v0, %s3165_s24  ;;  %2583 = vrot.lane.b32.xlu1 %v4489_v0, %s3163_s22 }
0x1826   :  { %2609 = vrot.lane.b32.xlu0 %v4501_v61, %s3165_s24  ;;  %2589 = vrot.lane.b32.xlu1 %v4501_v61, %s3163_s22 }
0x182a   :  { %2625 = vrot.lane.b32.xlu0 %v4491_v15, %s3166_s0  ;;  %2623 = vrot.lane.b32.xlu1 %v4489_v0, %s3166_s0 }
0x182e   :  { %2629 = vrot.lane.b32.xlu0 %v4501_v61, %s3166_s0  ;;  %2627 = vrot.lane.b32.xlu1 %v4507_v42, %s3166_s0 }
0x1864   :  { %v2482_v23 = vpop.permute.xlu0 %2481  ;;  %v2480_v10 = vpop.permute.xlu1 %2479 }
0x1865   :  { %v2489_v54 = vsel %vm975_vm9, %v2480_v10, %v2482_v23 }
0x1866   :  { %v2492_v43 = vmul.f32 %v2489_v54, %v3643_v59 }
0x1868   :  { %v2502_v27 = vpop.permute.xlu0 %2501  ;;  %v2500_v55 = vpop.permute.xlu1 %2499 }
0x1869   :  { %v2509_v32 = vsel %vm1000_vm10, %v2500_v55, %v2502_v27 }
0x186a   :  { %v2512_v29 = vmul.f32 %v3628_v49, %v2509_v32 }
0x186c   :  { %v2506_v41 = vpop.permute.xlu0 %2505  ;;  %v2486_v56 = vpop.permute.xlu1 %2485  ;;  %v2682_v47 = vpack.c.bf16 %v2512_v29, %v2492_v43 }
0x186d   :  { %v2510_v45 = vsel %vm1000_vm10, %v2506_v41, %v2500_v55  ;;  %v2490_v48 = vsel %vm975_vm9, %v2486_v56, %v2480_v10 }
0x186e   :  { %v2511_v31 = vmul.f32 %v3676_v13, %v2510_v45  ;;  %v2491_v1 = vmul.f32 %v2490_v48, %v3696_v20  ;;  %2716 = vmatprep.subr.bf16.mxu1 %v2682_v47 }
0x1870   :  { %v2681_v38 = vpack.c.bf16 %v2511_v31, %v2491_v1  ;;  %v2504_v2 = vpop.permute.xlu0 %2503  ;;  %v2484_v30 = vpop.permute.xlu1 %2483 }
0x1871   :  { %v2507_v49 = vsel %vm1000_vm10, %v2504_v2, %v2506_v41  ;;  %v2508_v59 = vsel %vm1000_vm10, %v2502_v27, %v2504_v2  ;;  %v2487_v3 = vsel %vm975_vm9, %v2484_v30, %v2486_v56  ;;  %v2488_v58 = vsel %vm975_vm9, %v2482_v23, %v2484_v30 }
0x1872   :  { %v2513_v13 = vmul.f32 %v3662_v5, %v2508_v59  ;;  %v2514_v20 = vmul.f32 %v3682_v18, %v2507_v49  ;;  %v2493_v4 = vmul.f32 %v2488_v58, %v3689_v11  ;;  %v2494_v50 = vmul.f32 %v2487_v3, %v3700_v21  ;;  %2717 = vmatpush1.bf16.msra.mxu1 %v2681_v38 }
0x1874   :  { %v2683_v44 = vpack.c.bf16 %v2513_v13, %v2493_v4  ;;  %v2522_v10 = vpop.permute.xlu0 %2521  ;;  %v2520_v54 = vpop.permute.xlu1 %2519  ;;  %v2684_v55 = vpack.c.bf16 %v2514_v20, %v2494_v50 }
0x1875   :  { %v2529_v27 = vsel %vm1021_vm7, %v2520_v54, %v2522_v10 }
0x1876   :  { %2757 = vmatprep.subr.bf16.mxu0 %v2684_v55  ;;  %v2532_v18 = vmul.f32 %v2529_v27, %v3711_v24 }
0x1877   :  { %2758 = vmatpush1.bf16.msra.mxu0 %v2683_v44 }
0x1878   :  { %v2542_v32 = vpop.permute.xlu0 %2541  ;;  %v2540_v23 = vpop.permute.xlu1 %2539 }
0x1879   :  { %v2549_v5 = vsel %vm1046_vm8, %v2540_v23, %v2542_v32 }
0x187a   :  { %v2552_v11 = vmul.f32 %v3631_v51, %v2549_v5 }
0x187c   :  { %v2546_v21 = vpop.permute.xlu0 %2545  ;;  %v2526_v43 = vpop.permute.xlu1 %2525  ;;  %v2686_v29 = vpack.c.bf16 %v2552_v11, %v2532_v18 }
0x187d   :  { %v2550_v41 = vsel %vm1046_vm8, %v2546_v21, %v2540_v23  ;;  %v2530_v56 = vsel %vm1021_vm7, %v2526_v43, %v2520_v54 }
0x187e   :  { %v2551_v47 = vmul.f32 %v3671_v9, %v2550_v41  ;;  %v2531_v45 = vmul.f32 %v2530_v56, %v3743_v57  ;;  %2718 = vmatprep.subr.bf16.mxu1 %v2686_v29 }
0x1880   :  { %v2685_v48 = vpack.c.bf16 %v2551_v47, %v2531_v45  ;;  %v2544_v31 = vpop.permute.xlu0 %2543  ;;  %v2524_v1 = vpop.permute.xlu1 %2523 }
0x1881   :  { %v2547_v51 = vsel %vm1046_vm8, %v2544_v31, %v2546_v21  ;;  %v2548_v24 = vsel %vm1046_vm8, %v2542_v32, %v2544_v31  ;;  %v2527_v38 = vsel %vm1021_vm7, %v2524_v1, %v2526_v43  ;;  %v2528_v2 = vsel %vm1021_vm7, %v2522_v10, %v2524_v1 }
0x1882   :  { %v2553_v9 = vmul.f32 %v3665_v6, %v2548_v24  ;;  %v2554_v57 = vmul.f32 %v3668_v8, %v2547_v51  ;;  %v2533_v30 = vmul.f32 %v2528_v2, %v3715_v46  ;;  %v2534_v49 = vmul.f32 %v2527_v38, %v3747_v28  ;;  %2719 = vmatpush1.bf16.msra.mxu1 %v2685_v48 }
0x1884   :  { %v2687_v59 = vpack.c.bf16 %v2553_v9, %v2533_v30  ;;  %v2568_v3 = vpop.permute.xlu0 %2567  ;;  %v2566_v58 = vpop.permute.xlu1 %2565  ;;  %v2688_v13 = vpack.c.bf16 %v2554_v57, %v2534_v49 }
0x1885   :  { %v2572_v20 = vsel %vm1071_vm13, %v2566_v58, %v2568_v3 }
0x1886   :  { %v2576_v4 = vmul.f32 %v3679_v17, %v2572_v20  ;;  %2759 = vmatprep.subr.bf16.mxu0 %v2688_v13 }
0x1887   :  { %2760 = vmatpush1.bf16.msra.mxu0 %v2687_v59 }
0x1888   :  { %v2570_v50 = vpop.permute.xlu0 %2569  ;;  %v2564_v6 = vpop.permute.xlu1 %2563  ;;  %v2690_v8 = vpack.c.bf16 %v2576_v4, %v4491_v15 }
0x1889   :  { %v2571_v46 = vsel %vm1071_vm13, %v2568_v3, %v2570_v50  ;;  %v2573_v28 = vsel %vm1071_vm13, %v2564_v6, %v2566_v58  ;;  %v2574_v44 = vsel %vm1071_vm13, %v2570_v50, %v2564_v6 }
0x188a   :  { %v2577_v10 = vmul.f32 %v3685_v19, %v2571_v46  ;;  %v2575_v54 = vmul.f32 %v3719_v52, %v2573_v28  ;;  %v2578_v17 = vmul.f32 %v3722_v37, %v2574_v44  ;;  %2720 = vmatprep.subr.bf16.mxu1 %v2690_v8 }
0x188c   :  { %v2691_v55 = vpack.c.bf16 %v2577_v10, %v4507_v42  ;;  %v2689_v15 = vpack.c.bf16 %v2575_v54, %v4489_v0  ;;  %v2588_v27 = vpop.permute.xlu0 %2587  ;;  %v2586_v32 = vpop.permute.xlu1 %2585  ;;  %v2692_v23 = vpack.c.bf16 %v2578_v17, %v4501_v61 }
0x188d   :  { %v2592_v5 = vsel %vm1092_vm14, %v2586_v32, %v2588_v27 }
0x188e   :  { %2721 = vmatpush1.bf16.msra.mxu1 %v2689_v15  ;;  %2761 = vmatprep.subr.bf16.mxu0 %v2692_v23  ;;  %v2596_v37 = vmul.f32 %v2592_v5, %v3803_v62  ;;  %v2964_v15 = vld [vmem:[%s4694_s3 + $0x88] sm:$0xff] }
0x188f   :  { %2762 = vmatpush1.bf16.msra.mxu0 %v2691_v55 }
0x1890   :  { %v2608_v19 = vpop.permute.xlu0 %2607  ;;  %v2606_v18 = vpop.permute.xlu1 %2605 }
0x1891   :  { %v2612_v52 = vsel %vm1117_vm1, %v2606_v18, %v2608_v19 }
0x1892   :  { %v2616_v42 = vmul.f32 %v3771_v33, %v2612_v52 }
0x1894   :  { %v2604_v0 = vpop.permute.xlu0 %2603  ;;  %v2584_v11 = vpop.permute.xlu1 %2583  ;;  %v2694_v21 = vpack.c.bf16 %v2616_v42, %v2596_v37 }
0x1895   :  { %v2613_v61 = vsel %vm1117_vm1, %v2604_v0, %v2606_v18  ;;  %v2593_v43 = vsel %vm1092_vm14, %v2584_v11, %v2586_v32 }
0x1896   :  { %v2615_v29 = vmul.f32 %v3765_v39, %v2613_v61  ;;  %v2595_v41 = vmul.f32 %v2593_v43, %v3799_v36  ;;  %2722 = vmatprep.subr.bf16.mxu1 %v2694_v21  ;;  %v2963_v43 = vld [vmem:[%s4694_s3 + $0x80] sm:$0xff] }
0x1898   :  { %v2693_v56 = vpack.c.bf16 %v2615_v29, %v2595_v41  ;;  %v2610_v47 = vpop.permute.xlu0 %2609  ;;  %v2590_v45 = vpop.permute.xlu1 %2589 }
0x1899   :  { %v2611_v33 = vsel %vm1117_vm1, %v2608_v19, %v2610_v47  ;;  %v2614_v62 = vsel %vm1117_vm1, %v2610_v47, %v2604_v0  ;;  %v2591_v48 = vsel %vm1092_vm14, %v2588_v27, %v2590_v45  ;;  %v2594_v31 = vsel %vm1092_vm14, %v2590_v45, %v2584_v11 }
0x189a   :  { %v2617_v39 = vmul.f32 %v3817_v35, %v2611_v33  ;;  %v2618_v36 = vmul.f32 %v3831_v53, %v2614_v62  ;;  %v2597_v1 = vmul.f32 %v2591_v48, %v3843_v60  ;;  %v2598_v51 = vmul.f32 %v2594_v31, %v3854_v40  ;;  %2723 = vmatpush1.bf16.msra.mxu1 %v2693_v56 }
0x189c   :  { %v2695_v24 = vpack.c.bf16 %v2617_v39, %v2597_v1  ;;  %v2626_v38 = vpop.permute.xlu0 %2625  ;;  %v2624_v2 = vpop.permute.xlu1 %2623  ;;  %v2696_v9 = vpack.c.bf16 %v2618_v36, %v2598_v51 }
0x189d   :  { %v2633_v57 = vsel %vm1138_vm2, %v2624_v2, %v2626_v38 }
0x189e   :  { %v2635_v30 = vmul.f32 %v2633_v57, %v3836_v25  ;;  %2763 = vmatprep.subr.bf16.mxu0 %v2696_v9 }
0x189f   :  { %2764 = vmatpush1.bf16.msra.mxu0 %v2695_v24 }
0x18a0   :  { %v2630_v49 = vpop.permute.xlu0 %2629  ;;  %v2628_v35 = vpop.permute.xlu1 %2627  ;;  %v2697_v59 = vpack.c.bf16 %v2635_v30, %v2635_v30 }
0x18a1   :  { %v2634_v53 = vsel %vm1138_vm2, %v2630_v49, %v2624_v2  ;;  %v2631_v60 = vsel %vm1138_vm2, %v2628_v35, %v2630_v49  ;;  %v2632_v40 = vsel %vm1138_vm2, %v2626_v38, %v2628_v35 }
0x18a2   :  { %v2638_v3 = vmul.f32 %v2634_v53, %v3867_v26  ;;  %v2636_v58 = vmul.f32 %v2632_v40, %v3871_v34  ;;  %v2637_v25 = vmul.f32 %v2631_v60, %v3875_v14  ;;  %v2705_v50 = vsel %vm151_vm3, %v2697_v59, 0 }
0x18a4   :  { %v2700_v13 = vpack.c.bf16 %v2638_v3, %v2638_v3  ;;  %v2698_v20 = vpack.c.bf16 %v2636_v58, %v2636_v58  ;;  %v2699_v4 = vpack.c.bf16 %v2637_v25, %v2637_v25 }
0x18a6   :  { %2959 = vmatprep.subr.msk.bf16.mxu1 %vm151_vm3, %v2698_v20  ;;  %2961 = vmatprep.subr.msk.bf16.mxu0 %vm151_vm3, %v2700_v13  ;;  %v2711_v6 = vsel %vm151_vm3, %v2699_v4, 0 }
0x18a7   :  { %2725 = vmatpush1.bf16.msra.mxu1 %v2705_v50  ;;  %2766 = vmatpush1.bf16.msra.mxu0 %v2711_v6 }
0x18aa   :  { %2960 = vmatmul.mubr.msk.bf16.vlgmr.msra.gmra.mrb[28].mxu1 %vm147_vm4, %v2958_v7  ;;  %2962 = vmatmul.mubr.msk.bf16.vlgmr.msra.gmra.mrb[32].mxu0 %vm147_vm4, %v2958_v7 }
0x197d   :  { %v2750_v26 = vpop.f32.mrb[28].mxu1  ;;  %v2791_v34 = vpop.f32.mrb[32].mxu0 }
0x197e   :  { %v2752_v14 = vpop.f32.mrb[29].mxu1  ;;  %v2793_v8 = vpop.f32.mrb[33].mxu0 }
0x197f   :  { %v2802_v46 = vadd.f32 %v2752_v14, %v2750_v26  ;;  %v2754_v28 = vpop.f32.mrb[30].mxu1  ;;  %v2795_v44 = vpop.f32.mrb[34].mxu0 }
0x1980   :  { %v2755_v10 = vpop.f32.mrb[31].mxu1  ;;  %v2796_v54 = vpop.f32.mrb[35].mxu0 }
0x1981   :  { %v2803_v17 = vadd.f32 %v2802_v46, %v2791_v34 }
0x1983   :  { %v2804_v55 = vadd.f32 %v2803_v17, %v2793_v8 }
0x1985   :  { %2805 = vadd.xlane.f32.xlu1 %v2804_v55 }
0x1996   :  { %2839 = vperm.xlu1 %3083, %v2964_v15  }
0x1a12   :  { %v2806_v27 = vpop.xlane.xlu1 %2805 }
0x1a13   :  { %v2807_v32 = vmul.f32 0.001953125, %v2806_v27 }
0x1a15   :  { %v2808_v23 = vsub.f32 %v2750_v26, %v2807_v32  ;;  %v2809_v5 = vsub.f32 %v2752_v14, %v2807_v32  ;;  %v2810_v19 = vsub.f32 %v2791_v34, %v2807_v32  ;;  %v2811_v18 = vsub.f32 %v2793_v8, %v2807_v32 }
0x1a16   :  { %v2840_v24 = vpop.permute.xlu1 %2839 }
0x1a17   :  { %v2812_v52 = vmul.f32 %v2808_v23, %v2808_v23  ;;  %v2813_v37 = vmul.f32 %v2809_v5, %v2809_v5  ;;  %v2814_v42 = vmul.f32 %v2810_v19, %v2810_v19  ;;  %v2815_v11 = vmul.f32 %v2811_v18, %v2811_v18 }
0x1a19   :  { %v2816_v0 = vadd.f32 %v2813_v37, %v2812_v52 }
0x1a1b   :  { %v2817_v21 = vadd.f32 %v2816_v0, %v2814_v42 }
0x1a1d   :  { %v2818_v61 = vadd.f32 %v2817_v21, %v2815_v11 }
0x1a1f   :  { %2819 = vadd.xlane.f32.xlu0 %v2818_v61 }
0x1a35   :  { %2830 = vperm.xlu0 %3082, %v2963_v43  }
0x1aac   :  { %v2820_v29 = vpop.xlane.xlu0 %2819 }
0x1aad   :  { %v2821_v41 = vmul.f32 0.001953125, %v2820_v29 }
0x1aaf   :  { %v2822_v56 = vadd.f32 1e-05, %v2821_v41 }
0x1ab1   :  { %3148 = vrsqrt.f32 %v2822_v56 }
0x1ab4   :  { %v2831_v31 = vpop.permute.xlu0 %2830 }
0x1abb   :  { %v3149_v47 = vpop.eup %3148 }
0x1abc   :  { %v2824_v45 = vmul.f32 %v3149_v47, %v2808_v23  ;;  %v2825_v33 = vmul.f32 %v3149_v47, %v2809_v5  ;;  %v2826_v62 = vmul.f32 %v3149_v47, %v2810_v19  ;;  %v2827_v48 = vmul.f32 %v3149_v47, %v2811_v18 }
0x1abe   :  { %v2833_v39 = vmul.f32 %v2831_v31, %v2824_v45  ;;  %v2834_v36 = vmul.f32 %v2831_v31, %v2825_v33  ;;  %v2835_v1 = vmul.f32 %v2831_v31, %v2826_v62  ;;  %v2836_v51 = vmul.f32 %v2831_v31, %v2827_v48 }
0x1ac0   :  { %v2842_v38 = vadd.f32 %v2840_v24, %v2833_v39  ;;  %v2843_v2 = vadd.f32 %v2840_v24, %v2834_v36  ;;  %v2844_v9 = vadd.f32 %v2840_v24, %v2835_v1  ;;  %v2845_v57 = vadd.f32 %v2840_v24, %v2836_v51 }
0x1ac2   :  { %v2846_v30 = vadd.f32 %v2842_v38, %v4298_v63  ;;  %v2847_v49 = vadd.f32 %v2843_v2, %v4300_v16  ;;  %v2848_v35 = vadd.f32 %v2844_v9, %v4318_v12  ;;  %v2849_v53 = vadd.f32 %v2845_v57, %v4312_v22 }
0x1ac4   :  { %v2850_v60 = vmax.f32 %v2846_v30, 0.0  ;;  %v2851_v40 = vmax.f32 %v2847_v49, 0.0  ;;  %v2852_v59 = vmax.f32 %v2848_v35, 0.0  ;;  %v2853_v3 = vmax.f32 %v2849_v53, 0.0 }
0x1ac6   :  { %2854 = vst [vmem:[%s4696_s4] sm:$0xff] %v2850_v60  ;;  %2855 = vst [vmem:[%s4696_s4 + $0x8] sm:$0xff] %v2851_v40 }
0x1ac7   :  { %2856 = vst [vmem:[%s4696_s4 + $0x10] sm:$0xff] %v2852_v59  ;;  %2857 = vst [vmem:[%s4696_s4 + $0x18] sm:$0xff] %v2853_v3 }

</bundles_post_ra>
